<compile_context>
chip_gen: v7x
topology: tpu7x:2x2x1
jax: 0.10.0
libtpu: 0.0.40
codegen_flags: <defaults>
</compile_context>

<pallas_src>
import jax
import jax.numpy as jnp
from jax import lax
from jax.experimental import pallas as pl
from jax.experimental.pallas import tpu as pltpu

BN_EPS = 1e-5


def _decoder_residual_block_kernel(
        x_ref, w1_ref, b1_ref, g1_ref, bt1_ref,
        w5_ref, b5_ref, g2_ref, bt2_ref,
        w2_ref, b2_ref, g3_ref, bt3_ref,
        sew1_ref, sew2_ref,
        out_ref, xp_ref, col_ref):
    NHW, C = x_ref.shape
    N, Hp, Wp, D = xp_ref.shape
    H, W = Hp - 4, Wp - 4
    HW = NHW // N

    def bn_train(h, g_ref, b_ref):
        # training-mode batch statistics over all rows (= N,H,W), biased var
        mean = jnp.mean(h, axis=0, keepdims=True)
        var = jnp.mean((h - mean) ** 2, axis=0, keepdims=True)
        h = (h - mean) * lax.rsqrt(var + BN_EPS)
        return h * g_ref[...] + b_ref[...]

    def swish(h):
        return h * jax.nn.sigmoid(h)

    x = x_ref[...]                                            # (NHW, C) f32

    # --- Conv2d(dim, G*dim, kernel_size=1) + BN + Swish ---------------------
    h = jnp.dot(x.astype(jnp.bfloat16), w1_ref[...],
                preferred_element_type=jnp.float32) + b1_ref[...]
    h = swish(bn_train(h, g1_ref, bt1_ref))                   # (NHW, D) f32

    # --- Conv2d(G*dim, G*dim, 5, padding=2, groups=G) + BN + Swish ----------
    # im2col against the block-diagonal densified weight: a single K=25*D dot.
    # Zero only the halo border of the padded scratch; interior is overwritten.
    xp_ref[:, 0:2, :, :] = jnp.zeros((N, 2, Wp, D), xp_ref.dtype)
    xp_ref[:, Hp - 2:Hp, :, :] = jnp.zeros((N, 2, Wp, D), xp_ref.dtype)
    xp_ref[:, :, 0:2, :] = jnp.zeros((N, Hp, 2, D), xp_ref.dtype)
    xp_ref[:, :, Wp - 2:Wp, :] = jnp.zeros((N, Hp, 2, D), xp_ref.dtype)
    xp_ref[:, 2:2 + H, 2:2 + W, :] = h.reshape(N, H, W, D)

    for i in range(5):
        for j in range(5):
            t = i * 5 + j
            col_ref[:, t * D:(t + 1) * D] = (
                xp_ref[:, i:i + H, j:j + W, :]
                .reshape(NHW, D).astype(jnp.bfloat16))

    h = jnp.dot(col_ref[...], w5_ref[...],
                preferred_element_type=jnp.float32) + b5_ref[...]
    h = swish(bn_train(h, g2_ref, bt2_ref))                   # (NHW, D) f32

    # --- Conv2d(G*dim, dim, kernel_size=1) + BN -----------------------------
    h = jnp.dot(h.astype(jnp.bfloat16), w2_ref[...],
                preferred_element_type=jnp.float32) + b2_ref[...]
    h = bn_train(h, g3_ref, bt3_ref)                          # (NHW, C) f32

    # --- SELayer(dim, reduction=16) -----------------------------------------
    h3 = h.reshape(N, HW, C)
    pooled = jnp.mean(h3, axis=1)                             # (N, C)
    y = jnp.maximum(jnp.dot(pooled, sew1_ref[...],
                            preferred_element_type=jnp.float32), 0.0)
    y = jax.nn.sigmoid(jnp.dot(y, sew2_ref[...],
                               preferred_element_type=jnp.float32))
    h3 = h3 * y[:, None, :]

    # --- residual ------------------------------------------------------------
    out_ref[...] = (x + 0.1 * h3.reshape(NHW, C)).astype(out_ref.dtype)


def prepare_kernel_params(params):
    """One-time host-side weight prep: bf16 matmul weights and the grouped-5x5
    weight densified into a block-diagonal (25*D, D) im2col matrix."""
    w5g = params["w5g"]                                       # (G, 5, 5, C, C)
    G, kh, kw, C, _ = w5g.shape
    D = G * C
    w5_dense = jnp.zeros((kh, kw, D, D), jnp.float32)
    for g in range(G):
        w5_dense = w5_dense.at[:, :, g * C:(g + 1) * C,
                               g * C:(g + 1) * C].set(w5g[g])
    kp = {k: v for k, v in params.items() if k != "w5g"}
    kp["w1"] = params["w1"].astype(jnp.bfloat16)
    kp["w2"] = params["w2"].astype(jnp.bfloat16)
    kp["w5"] = w5_dense.reshape(kh * kw * D, D).astype(jnp.bfloat16)
    return kp


def decoder_residual_block_nhwc(x_nhwc, kp):
    N, H, W, C = x_nhwc.shape
    D = kp["w1"].shape[1]
    KK = kp["w5"].shape[0] // D                               # 25
    NHW = N * H * W
    x2 = x_nhwc.reshape(NHW, C).astype(jnp.float32)           # free reshape

    inputs = (x2, kp["w1"], kp["b1"], kp["g1"], kp["bt1"],
              kp["w5"], kp["b5"], kp["g2"], kp["bt2"],
              kp["w2"], kp["b2"], kp["g3"], kp["bt3"],
              kp["se_w1"], kp["se_w2"])

    def full_spec(a):
        nd = a.ndim
        return pl.BlockSpec(a.shape, lambda i, nd=nd: (0,) * nd)

    out = pl.pallas_call(
        _decoder_residual_block_kernel,
        out_shape=jax.ShapeDtypeStruct((NHW, C), jnp.float32),
        grid=(1,),
        in_specs=[full_spec(a) for a in inputs],
        out_specs=pl.BlockSpec((NHW, C), lambda i: (0, 0)),
        scratch_shapes=[
            pltpu.VMEM((N, H + 4, W + 4, D), jnp.float32),    # padded halo buf
            pltpu.VMEM((NHW, KK * D), jnp.bfloat16),          # im2col patches
        ],
        compiler_params=pltpu.CompilerParams(
            dimension_semantics=("arbitrary",),
            vmem_limit_bytes=32 * 1024 * 1024),
    )(*inputs)
    return out.reshape(N, H, W, C)


def decoder_residual_block_forward(x_nchw, params):
    """PyTorch-compatible NCHW entry point.  In an NHWC-native pipeline call
    decoder_residual_block_nhwc directly and skip these two HBM transposes."""
    kp = prepare_kernel_params(params)
    x_nhwc = jnp.transpose(x_nchw, (0, 2, 3, 1))
    out = decoder_residual_block_nhwc(x_nhwc, kp)
    return jnp.transpose(out, (0, 3, 1, 2))


def init_params(key, dim, n_group):
    C, G = dim, n_group
    D = G * C
    r = max(dim // 16, 1)
    ks = jax.random.split(key, 14)

    def nrm(k, shape, scale):
        return jax.random.normal(k, shape, jnp.float32) * scale

    return {
        "w1": nrm(ks[0], (C, D), 0.10),          # 1x1 conv, (in, out)
        "b1": nrm(ks[1], (1, D), 0.05),
        "g1": 1.0 + nrm(ks[2], (1, D), 0.10),
        "bt1": nrm(ks[3], (1, D), 0.10),
        "w5g": nrm(ks[4], (G, 5, 5, C, C), 0.05),  # grouped 5x5 (g,kh,kw,ci,co)
        "b5": nrm(ks[5], (1, D), 0.05),
        "g2": 1.0 + nrm(ks[6], (1, D), 0.10),
        "bt2": nrm(ks[7], (1, D), 0.10),
        "w2": nrm(ks[8], (D, C), 0.10),          # 1x1 conv, (in, out)
        "b2": nrm(ks[9], (1, C), 0.05),
        "g3": 1.0 + nrm(ks[10], (1, C), 0.10),
        "bt3": nrm(ks[11], (1, C), 0.10),
        "se_w1": nrm(ks[12], (C, r), 0.20),
        "se_w2": nrm(ks[13], (r, C), 0.20),
    }


def reference_forward(x_nchw, params, n_group):
    """Pure-JAX (non-Pallas) reference with identical semantics, f32 HIGHEST."""
    C = x_nchw.shape[1]
    G = n_group
    D = G * C
    x = jnp.transpose(x_nchw, (0, 2, 3, 1)).astype(jnp.float32)
    hp = lax.Precision.HIGHEST
    dn = ("NHWC", "HWIO", "NHWC")

    def bn(h, g, b):
        m = jnp.mean(h, axis=(0, 1, 2))
        v = jnp.mean((h - m) ** 2, axis=(0, 1, 2))
        return (h - m) * lax.rsqrt(v + BN_EPS) * g[0] + b[0]

    def swish(t):
        return t * jax.nn.sigmoid(t)

    h = jnp.einsum("nhwc,cd->nhwd", x, params["w1"], precision=hp) + params["b1"][0]
    h = swish(bn(h, params["g1"], params["bt1"]))

    w5_hwio = jnp.transpose(params["w5g"], (1, 2, 3, 0, 4)).reshape(5, 5, C, D)
    h = lax.conv_general_dilated(h, w5_hwio, (1, 1), "SAME",
                                 dimension_numbers=dn,
                                 feature_group_count=G,
                                 precision=hp) + params["b5"][0]
    h = swish(bn(h, params["g2"], params["bt2"]))

    h = jnp.einsum("nhwd,dc->nhwc", h, params["w2"], precision=hp) + params["b2"][0]
    h = bn(h, params["g3"], params["bt3"])

    pooled = jnp.mean(h, axis=(1, 2))
    y = jax.nn.relu(pooled @ params["se_w1"])
    y = jax.nn.sigmoid(y @ params["se_w2"])
    h = h * y[:, None, None, :]
    return jnp.transpose(x + 0.1 * h, (0, 3, 1, 2))


if __name__ == "__main__":
    key = jax.random.PRNGKey(0)
    k_x, k_p = jax.random.split(key)
    # dim=32 keeps the SE hidden width (dim // 16 = 2) nonzero; n_group=4 gives
    # a hidden width of G*dim = 128, which is exactly one full lane dimension.
    N, C, H, W = 2, 32, 8, 8
    n_group = 4
    x = jax.random.normal(k_x, (N, C, H, W), jnp.float32)
    params = init_params(k_p, C, n_group)

    out = jax.block_until_ready(decoder_residual_block_forward(x, params))
    ref = reference_forward(x, params, n_group)
    assert out.shape == ref.shape == x.shape
    err = float(jnp.max(jnp.abs(out - ref)))
    if err > 1e-2:
        raise AssertionError(f"Pallas kernel mismatch vs reference: max abs err = {err}")
    print("KERNEL_OK")
</pallas_src>

<mosaic_0001>
module attributes {stable_mosaic.version = 11 : i64} {
  func.func @_decoder_residual_block_kernel(%arg0: i32, %arg1: memref<128x32xf32, #tpu.memory_space<vmem>>, %arg2: memref<32x128xbf16, #tpu.memory_space<vmem>>, %arg3: memref<1x128xf32, #tpu.memory_space<vmem>>, %arg4: memref<1x128xf32, #tpu.memory_space<vmem>>, %arg5: memref<1x128xf32, #tpu.memory_space<vmem>>, %arg6: memref<3200x128xbf16, #tpu.memory_space<vmem>>, %arg7: memref<1x128xf32, #tpu.memory_space<vmem>>, %arg8: memref<1x128xf32, #tpu.memory_space<vmem>>, %arg9: memref<1x128xf32, #tpu.memory_space<vmem>>, %arg10: memref<128x32xbf16, #tpu.memory_space<vmem>>, %arg11: memref<1x32xf32, #tpu.memory_space<vmem>>, %arg12: memref<1x32xf32, #tpu.memory_space<vmem>>, %arg13: memref<1x32xf32, #tpu.memory_space<vmem>>, %arg14: memref<32x2xf32, #tpu.memory_space<vmem>>, %arg15: memref<2x32xf32, #tpu.memory_space<vmem>>, %arg16: memref<128x32xf32, #tpu.memory_space<vmem>>, %arg17: memref<2x12x12x128xf32, #tpu.memory_space<vmem>>, %arg18: memref<128x3200xbf16, #tpu.memory_space<vmem>>) attributes {dimension_semantics = [#tpu.dimension_semantics<arbitrary>], iteration_bounds = array<i64: 1>, scalar_prefetch = 0 : i64, scratch_operands = 2 : i64, tpu.core_type = #tpu.core_type<tc>, window_params = [{pipeline_mode = #tpu.pipeline_mode<synchronous>, transform_indices = @transform_0, window_bounds = array<i64: 128, 32>}, {pipeline_mode = #tpu.pipeline_mode<synchronous>, transform_indices = @transform_1, window_bounds = array<i64: 32, 128>}, {pipeline_mode = #tpu.pipeline_mode<synchronous>, transform_indices = @transform_2, window_bounds = array<i64: 1, 128>}, {pipeline_mode = #tpu.pipeline_mode<synchronous>, transform_indices = @transform_3, window_bounds = array<i64: 1, 128>}, {pipeline_mode = #tpu.pipeline_mode<synchronous>, transform_indices = @transform_4, window_bounds = array<i64: 1, 128>}, {pipeline_mode = #tpu.pipeline_mode<synchronous>, transform_indices = @transform_5, window_bounds = array<i64: 3200, 128>}, {pipeline_mode = #tpu.pipeline_mode<synchronous>, transform_indices = @transform_6, window_bounds = array<i64: 1, 128>}, {pipeline_mode = #tpu.pipeline_mode<synchronous>, transform_indices = @transform_7, window_bounds = array<i64: 1, 128>}, {pipeline_mode = #tpu.pipeline_mode<synchronous>, transform_indices = @transform_8, window_bounds = array<i64: 1, 128>}, {pipeline_mode = #tpu.pipeline_mode<synchronous>, transform_indices = @transform_9, window_bounds = array<i64: 128, 32>}, {pipeline_mode = #tpu.pipeline_mode<synchronous>, transform_indices = @transform_10, window_bounds = array<i64: 1, 32>}, {pipeline_mode = #tpu.pipeline_mode<synchronous>, transform_indices = @transform_11, window_bounds = array<i64: 1, 32>}, {pipeline_mode = #tpu.pipeline_mode<synchronous>, transform_indices = @transform_12, window_bounds = array<i64: 1, 32>}, {pipeline_mode = #tpu.pipeline_mode<synchronous>, transform_indices = @transform_13, window_bounds = array<i64: 32, 2>}, {pipeline_mode = #tpu.pipeline_mode<synchronous>, transform_indices = @transform_14, window_bounds = array<i64: 2, 32>}, {pipeline_mode = #tpu.pipeline_mode<synchronous>, transform_indices = @transform_15, window_bounds = array<i64: 128, 32>}]} {
    %c0 = arith.constant 0 : index
    %c0_0 = arith.constant 0 : index
    %0 = vector.load %arg1[%c0, %c0_0] : memref<128x32xf32, #tpu.memory_space<vmem>>, vector<128x32xf32>
    %1 = arith.truncf %0 : vector<128x32xf32> to vector<128x32xbf16>
    %c0_1 = arith.constant 0 : index
    %c0_2 = arith.constant 0 : index
    %2 = vector.load %arg2[%c0_1, %c0_2] : memref<32x128xbf16, #tpu.memory_space<vmem>>, vector<32x128xbf16>
    %cst = arith.constant dense<0.000000e+00> : vector<128x128xf32>
    %3 = tpu.matmul %1, %2, %cst {dimension_numbers = #tpu.dot_dimension_numbers<[1], [0], [0], [1], [0, 0, 1, 1], [], []>} : vector<128x32xbf16>, vector<32x128xbf16>, vector<128x128xf32> -> vector<128x128xf32>
    %c0_3 = arith.constant 0 : index
    %c0_4 = arith.constant 0 : index
    %4 = vector.load %arg3[%c0_3, %c0_4] : memref<1x128xf32, #tpu.memory_space<vmem>>, vector<1x128xf32>
    %5 = vector.broadcast %4 : vector<1x128xf32> to vector<128x128xf32>
    %6 = arith.addf %3, %5 : vector<128x128xf32>
    %cst_5 = arith.constant dense<0.000000e+00> : vector<128xf32>
    %7 = vector.multi_reduction <add>, %6, %cst_5 [0] : vector<128x128xf32> to vector<128xf32>
    %8 = vector.shape_cast %7 : vector<128xf32> to vector<1x128xf32>
    %cst_6 = arith.constant 1.280000e+02 : f32
    %9 = vector.broadcast %cst_6 : f32 to vector<1x128xf32>
    %10 = arith.divf %8, %9 : vector<1x128xf32>
    %11 = vector.broadcast %10 : vector<1x128xf32> to vector<128x128xf32>
    %12 = arith.subf %6, %11 : vector<128x128xf32>
    %13 = arith.mulf %12, %12 : vector<128x128xf32>
    %cst_7 = arith.constant dense<0.000000e+00> : vector<128xf32>
    %14 = vector.multi_reduction <add>, %13, %cst_7 [0] : vector<128x128xf32> to vector<128xf32>
    %15 = vector.shape_cast %14 : vector<128xf32> to vector<1x128xf32>
    %cst_8 = arith.constant 1.280000e+02 : f32
    %16 = vector.broadcast %cst_8 : f32 to vector<1x128xf32>
    %17 = arith.divf %15, %16 : vector<1x128xf32>
    %18 = vector.broadcast %10 : vector<1x128xf32> to vector<128x128xf32>
    %19 = arith.subf %6, %18 : vector<128x128xf32>
    %cst_9 = arith.constant 9.99999974E-6 : f32
    %20 = vector.broadcast %cst_9 : f32 to vector<1x128xf32>
    %21 = arith.addf %17, %20 : vector<1x128xf32>
    %22 = math.rsqrt %21 : vector<1x128xf32>
    %23 = vector.broadcast %22 : vector<1x128xf32> to vector<128x128xf32>
    %24 = arith.mulf %19, %23 : vector<128x128xf32>
    %c0_10 = arith.constant 0 : index
    %c0_11 = arith.constant 0 : index
    %25 = vector.load %arg4[%c0_10, %c0_11] : memref<1x128xf32, #tpu.memory_space<vmem>>, vector<1x128xf32>
    %26 = vector.broadcast %25 : vector<1x128xf32> to vector<128x128xf32>
    %27 = arith.mulf %24, %26 : vector<128x128xf32>
    %c0_12 = arith.constant 0 : index
    %c0_13 = arith.constant 0 : index
    %28 = vector.load %arg5[%c0_12, %c0_13] : memref<1x128xf32, #tpu.memory_space<vmem>>, vector<1x128xf32>
    %29 = vector.broadcast %28 : vector<1x128xf32> to vector<128x128xf32>
    %30 = arith.addf %27, %29 : vector<128x128xf32>
    %31 = arith.negf %30 : vector<128x128xf32>
    %32 = math.exp %31 : vector<128x128xf32>
    %cst_14 = arith.constant 1.000000e+00 : f32
    %33 = vector.broadcast %cst_14 : f32 to vector<128x128xf32>
    %34 = arith.addf %33, %32 : vector<128x128xf32>
    %35 = arith.divf %33, %34 : vector<128x128xf32>
    %36 = arith.mulf %30, %35 : vector<128x128xf32>
    %cst_15 = arith.constant 0.000000e+00 : f32
    %37 = vector.broadcast %cst_15 : f32 to vector<2x2x12x128xf32>
    %c0_16 = arith.constant 0 : index
    %c0_17 = arith.constant 0 : index
    %c0_18 = arith.constant 0 : index
    %c0_19 = arith.constant 0 : index
    %38 = vector.load %arg17[%c0_16, %c0_17, %c0_18, %c0_19] : memref<2x12x12x128xf32, #tpu.memory_space<vmem>>, vector<2x2x12x128xf32>
    tpu.vector_store %arg17[%c0_16, %c0_17, %c0_18, %c0_19], %37 {strides = array<i32>} : memref<2x12x12x128xf32, #tpu.memory_space<vmem>>, vector<2x2x12x128xf32>,
    %cst_20 = arith.constant 0.000000e+00 : f32
    %39 = vector.broadcast %cst_20 : f32 to vector<2x2x12x128xf32>
    %c0_21 = arith.constant 0 : index
    %c10 = arith.constant 10 : index
    %c0_22 = arith.constant 0 : index
    %c0_23 = arith.constant 0 : index
    %40 = vector.load %arg17[%c0_21, %c10, %c0_22, %c0_23] : memref<2x12x12x128xf32, #tpu.memory_space<vmem>>, vector<2x2x12x128xf32>
    tpu.vector_store %arg17[%c0_21, %c10, %c0_22, %c0_23], %39 {strides = array<i32>} : memref<2x12x12x128xf32, #tpu.memory_space<vmem>>, vector<2x2x12x128xf32>,
    %cst_24 = arith.constant 0.000000e+00 : f32
    %41 = vector.broadcast %cst_24 : f32 to vector<2x12x2x128xf32>
    %c0_25 = arith.constant 0 : index
    %c0_26 = arith.constant 0 : index
    %c0_27 = arith.constant 0 : index
    %c0_28 = arith.constant 0 : index
    %42 = vector.load %arg17[%c0_25, %c0_26, %c0_27, %c0_28] : memref<2x12x12x128xf32, #tpu.memory_space<vmem>>, vector<2x12x2x128xf32>
    tpu.vector_store %arg17[%c0_25, %c0_26, %c0_27, %c0_28], %41 {strides = array<i32>} : memref<2x12x12x128xf32, #tpu.memory_space<vmem>>, vector<2x12x2x128xf32>,
    %cst_29 = arith.constant 0.000000e+00 : f32
    %43 = vector.broadcast %cst_29 : f32 to vector<2x12x2x128xf32>
    %c0_30 = arith.constant 0 : index
    %c0_31 = arith.constant 0 : index
    %c10_32 = arith.constant 10 : index
    %c0_33 = arith.constant 0 : index
    %44 = vector.load %arg17[%c0_30, %c0_31, %c10_32, %c0_33] : memref<2x12x12x128xf32, #tpu.memory_space<vmem>>, vector<2x12x2x128xf32>
    tpu.vector_store %arg17[%c0_30, %c0_31, %c10_32, %c0_33], %43 {strides = array<i32>} : memref<2x12x12x128xf32, #tpu.memory_space<vmem>>, vector<2x12x2x128xf32>,
    %45 = vector.shape_cast %36 : vector<128x128xf32> to vector<2x8x8x128xf32>
    %c0_34 = arith.constant 0 : index
    %c2 = arith.constant 2 : index
    %c2_35 = arith.constant 2 : index
    %c0_36 = arith.constant 0 : index
    %46 = vector.load %arg17[%c0_34, %c2, %c2_35, %c0_36] : memref<2x12x12x128xf32, #tpu.memory_space<vmem>>, vector<2x8x8x128xf32>
    tpu.vector_store %arg17[%c0_34, %c2, %c2_35, %c0_36], %45 {strides = array<i32>} : memref<2x12x12x128xf32, #tpu.memory_space<vmem>>, vector<2x8x8x128xf32>,
    %c0_37 = arith.constant 0 : index
    %c0_38 = arith.constant 0 : index
    %c0_39 = arith.constant 0 : index
    %c0_40 = arith.constant 0 : index
    %47 = vector.load %arg17[%c0_37, %c0_38, %c0_39, %c0_40] : memref<2x12x12x128xf32, #tpu.memory_space<vmem>>, vector<2x8x8x128xf32>
    %48 = vector.shape_cast %47 : vector<2x8x8x128xf32> to vector<128x128xf32>
    %49 = arith.truncf %48 : vector<128x128xf32> to vector<128x128xbf16>
    %c0_41 = arith.constant 0 : index
    %c0_42 = arith.constant 0 : index
    %50 = vector.load %arg18[%c0_41, %c0_42] : memref<128x3200xbf16, #tpu.memory_space<vmem>>, vector<128x128xbf16>
    tpu.vector_store %arg18[%c0_41, %c0_42], %49 {strides = array<i32>} : memref<128x3200xbf16, #tpu.memory_space<vmem>>, vector<128x128xbf16>,
    %c0_43 = arith.constant 0 : index
    %c0_44 = arith.constant 0 : index
    %c1 = arith.constant 1 : index
    %c0_45 = arith.constant 0 : index
    %51 = vector.load %arg17[%c0_43, %c0_44, %c1, %c0_45] : memref<2x12x12x128xf32, #tpu.memory_space<vmem>>, vector<2x8x8x128xf32>
    %52 = vector.shape_cast %51 : vector<2x8x8x128xf32> to vector<128x128xf32>
    %53 = arith.truncf %52 : vector<128x128xf32> to vector<128x128xbf16>
    %c0_46 = arith.constant 0 : index
    %c128 = arith.constant 128 : index
    %54 = vector.load %arg18[%c0_46, %c128] : memref<128x3200xbf16, #tpu.memory_space<vmem>>, vector<128x128xbf16>
    tpu.vector_store %arg18[%c0_46, %c128], %53 {strides = array<i32>} : memref<128x3200xbf16, #tpu.memory_space<vmem>>, vector<128x128xbf16>,
    %c0_47 = arith.constant 0 : index
    %c0_48 = arith.constant 0 : index
    %c2_49 = arith.constant 2 : index
    %c0_50 = arith.constant 0 : index
    %55 = vector.load %arg17[%c0_47, %c0_48, %c2_49, %c0_50] : memref<2x12x12x128xf32, #tpu.memory_space<vmem>>, vector<2x8x8x128xf32>
    %56 = vector.shape_cast %55 : vector<2x8x8x128xf32> to vector<128x128xf32>
    %57 = arith.truncf %56 : vector<128x128xf32> to vector<128x128xbf16>
    %c0_51 = arith.constant 0 : index
    %c256 = arith.constant 256 : index
    %58 = vector.load %arg18[%c0_51, %c256] : memref<128x3200xbf16, #tpu.memory_space<vmem>>, vector<128x128xbf16>
    tpu.vector_store %arg18[%c0_51, %c256], %57 {strides = array<i32>} : memref<128x3200xbf16, #tpu.memory_space<vmem>>, vector<128x128xbf16>,
    %c0_52 = arith.constant 0 : index
    %c0_53 = arith.constant 0 : index
    %c3 = arith.constant 3 : index
    %c0_54 = arith.constant 0 : index
    %59 = vector.load %arg17[%c0_52, %c0_53, %c3, %c0_54] : memref<2x12x12x128xf32, #tpu.memory_space<vmem>>, vector<2x8x8x128xf32>
    %60 = vector.shape_cast %59 : vector<2x8x8x128xf32> to vector<128x128xf32>
    %61 = arith.truncf %60 : vector<128x128xf32> to vector<128x128xbf16>
    %c0_55 = arith.constant 0 : index
    %c384 = arith.constant 384 : index
    %62 = vector.load %arg18[%c0_55, %c384] : memref<128x3200xbf16, #tpu.memory_space<vmem>>, vector<128x128xbf16>
    tpu.vector_store %arg18[%c0_55, %c384], %61 {strides = array<i32>} : memref<128x3200xbf16, #tpu.memory_space<vmem>>, vector<128x128xbf16>,
    %c0_56 = arith.constant 0 : index
    %c0_57 = arith.constant 0 : index
    %c4 = arith.constant 4 : index
    %c0_58 = arith.constant 0 : index
    %63 = vector.load %arg17[%c0_56, %c0_57, %c4, %c0_58] : memref<2x12x12x128xf32, #tpu.memory_space<vmem>>, vector<2x8x8x128xf32>
    %64 = vector.shape_cast %63 : vector<2x8x8x128xf32> to vector<128x128xf32>
    %65 = arith.truncf %64 : vector<128x128xf32> to vector<128x128xbf16>
    %c0_59 = arith.constant 0 : index
    %c512 = arith.constant 512 : index
    %66 = vector.load %arg18[%c0_59, %c512] : memref<128x3200xbf16, #tpu.memory_space<vmem>>, vector<128x128xbf16>
    tpu.vector_store %arg18[%c0_59, %c512], %65 {strides = array<i32>} : memref<128x3200xbf16, #tpu.memory_space<vmem>>, vector<128x128xbf16>,
    %c0_60 = arith.constant 0 : index
    %c1_61 = arith.constant 1 : index
    %c0_62 = arith.constant 0 : index
    %c0_63 = arith.constant 0 : index
    %67 = vector.load %arg17[%c0_60, %c1_61, %c0_62, %c0_63] : memref<2x12x12x128xf32, #tpu.memory_space<vmem>>, vector<2x8x8x128xf32>
    %68 = vector.shape_cast %67 : vector<2x8x8x128xf32> to vector<128x128xf32>
    %69 = arith.truncf %68 : vector<128x128xf32> to vector<128x128xbf16>
    %c0_64 = arith.constant 0 : index
    %c640 = arith.constant 640 : index
    %70 = vector.load %arg18[%c0_64, %c640] : memref<128x3200xbf16, #tpu.memory_space<vmem>>, vector<128x128xbf16>
    tpu.vector_store %arg18[%c0_64, %c640], %69 {strides = array<i32>} : memref<128x3200xbf16, #tpu.memory_space<vmem>>, vector<128x128xbf16>,
    %c0_65 = arith.constant 0 : index
    %c1_66 = arith.constant 1 : index
    %c1_67 = arith.constant 1 : index
    %c0_68 = arith.constant 0 : index
    %71 = vector.load %arg17[%c0_65, %c1_66, %c1_67, %c0_68] : memref<2x12x12x128xf32, #tpu.memory_space<vmem>>, vector<2x8x8x128xf32>
    %72 = vector.shape_cast %71 : vector<2x8x8x128xf32> to vector<128x128xf32>
    %73 = arith.truncf %72 : vector<128x128xf32> to vector<128x128xbf16>
    %c0_69 = arith.constant 0 : index
    %c768 = arith.constant 768 : index
    %74 = vector.load %arg18[%c0_69, %c768] : memref<128x3200xbf16, #tpu.memory_space<vmem>>, vector<128x128xbf16>
    tpu.vector_store %arg18[%c0_69, %c768], %73 {strides = array<i32>} : memref<128x3200xbf16, #tpu.memory_space<vmem>>, vector<128x128xbf16>,
    %c0_70 = arith.constant 0 : index
    %c1_71 = arith.constant 1 : index
    %c2_72 = arith.constant 2 : index
    %c0_73 = arith.constant 0 : index
    %75 = vector.load %arg17[%c0_70, %c1_71, %c2_72, %c0_73] : memref<2x12x12x128xf32, #tpu.memory_space<vmem>>, vector<2x8x8x128xf32>
    %76 = vector.shape_cast %75 : vector<2x8x8x128xf32> to vector<128x128xf32>
    %77 = arith.truncf %76 : vector<128x128xf32> to vector<128x128xbf16>
    %c0_74 = arith.constant 0 : index
    %c896 = arith.constant 896 : index
    %78 = vector.load %arg18[%c0_74, %c896] : memref<128x3200xbf16, #tpu.memory_space<vmem>>, vector<128x128xbf16>
    tpu.vector_store %arg18[%c0_74, %c896], %77 {strides = array<i32>} : memref<128x3200xbf16, #tpu.memory_space<vmem>>, vector<128x128xbf16>,
    %c0_75 = arith.constant 0 : index
    %c1_76 = arith.constant 1 : index
    %c3_77 = arith.constant 3 : index
    %c0_78 = arith.constant 0 : index
    %79 = vector.load %arg17[%c0_75, %c1_76, %c3_77, %c0_78] : memref<2x12x12x128xf32, #tpu.memory_space<vmem>>, vector<2x8x8x128xf32>
    %80 = vector.shape_cast %79 : vector<2x8x8x128xf32> to vector<128x128xf32>
    %81 = arith.truncf %80 : vector<128x128xf32> to vector<128x128xbf16>
    %c0_79 = arith.constant 0 : index
    %c1024 = arith.constant 1024 : index
    %82 = vector.load %arg18[%c0_79, %c1024] : memref<128x3200xbf16, #tpu.memory_space<vmem>>, vector<128x128xbf16>
    tpu.vector_store %arg18[%c0_79, %c1024], %81 {strides = array<i32>} : memref<128x3200xbf16, #tpu.memory_space<vmem>>, vector<128x128xbf16>,
    %c0_80 = arith.constant 0 : index
    %c1_81 = arith.constant 1 : index
    %c4_82 = arith.constant 4 : index
    %c0_83 = arith.constant 0 : index
    %83 = vector.load %arg17[%c0_80, %c1_81, %c4_82, %c0_83] : memref<2x12x12x128xf32, #tpu.memory_space<vmem>>, vector<2x8x8x128xf32>
    %84 = vector.shape_cast %83 : vector<2x8x8x128xf32> to vector<128x128xf32>
    %85 = arith.truncf %84 : vector<128x128xf32> to vector<128x128xbf16>
    %c0_84 = arith.constant 0 : index
    %c1152 = arith.constant 1152 : index
    %86 = vector.load %arg18[%c0_84, %c1152] : memref<128x3200xbf16, #tpu.memory_space<vmem>>, vector<128x128xbf16>
    tpu.vector_store %arg18[%c0_84, %c1152], %85 {strides = array<i32>} : memref<128x3200xbf16, #tpu.memory_space<vmem>>, vector<128x128xbf16>,
    %c0_85 = arith.constant 0 : index
    %c2_86 = arith.constant 2 : index
    %c0_87 = arith.constant 0 : index
    %c0_88 = arith.constant 0 : index
    %87 = vector.load %arg17[%c0_85, %c2_86, %c0_87, %c0_88] : memref<2x12x12x128xf32, #tpu.memory_space<vmem>>, vector<2x8x8x128xf32>
    %88 = vector.shape_cast %87 : vector<2x8x8x128xf32> to vector<128x128xf32>
    %89 = arith.truncf %88 : vector<128x128xf32> to vector<128x128xbf16>
    %c0_89 = arith.constant 0 : index
    %c1280 = arith.constant 1280 : index
    %90 = vector.load %arg18[%c0_89, %c1280] : memref<128x3200xbf16, #tpu.memory_space<vmem>>, vector<128x128xbf16>
    tpu.vector_store %arg18[%c0_89, %c1280], %89 {strides = array<i32>} : memref<128x3200xbf16, #tpu.memory_space<vmem>>, vector<128x128xbf16>,
    %c0_90 = arith.constant 0 : index
    %c2_91 = arith.constant 2 : index
    %c1_92 = arith.constant 1 : index
    %c0_93 = arith.constant 0 : index
    %91 = vector.load %arg17[%c0_90, %c2_91, %c1_92, %c0_93] : memref<2x12x12x128xf32, #tpu.memory_space<vmem>>, vector<2x8x8x128xf32>
    %92 = vector.shape_cast %91 : vector<2x8x8x128xf32> to vector<128x128xf32>
    %93 = arith.truncf %92 : vector<128x128xf32> to vector<128x128xbf16>
    %c0_94 = arith.constant 0 : index
    %c1408 = arith.constant 1408 : index
    %94 = vector.load %arg18[%c0_94, %c1408] : memref<128x3200xbf16, #tpu.memory_space<vmem>>, vector<128x128xbf16>
    tpu.vector_store %arg18[%c0_94, %c1408], %93 {strides = array<i32>} : memref<128x3200xbf16, #tpu.memory_space<vmem>>, vector<128x128xbf16>,
    %c0_95 = arith.constant 0 : index
    %c2_96 = arith.constant 2 : index
    %c2_97 = arith.constant 2 : index
    %c0_98 = arith.constant 0 : index
    %95 = vector.load %arg17[%c0_95, %c2_96, %c2_97, %c0_98] : memref<2x12x12x128xf32, #tpu.memory_space<vmem>>, vector<2x8x8x128xf32>
    %96 = vector.shape_cast %95 : vector<2x8x8x128xf32> to vector<128x128xf32>
    %97 = arith.truncf %96 : vector<128x128xf32> to vector<128x128xbf16>
    %c0_99 = arith.constant 0 : index
    %c1536 = arith.constant 1536 : index
    %98 = vector.load %arg18[%c0_99, %c1536] : memref<128x3200xbf16, #tpu.memory_space<vmem>>, vector<128x128xbf16>
    tpu.vector_store %arg18[%c0_99, %c1536], %97 {strides = array<i32>} : memref<128x3200xbf16, #tpu.memory_space<vmem>>, vector<128x128xbf16>,
    %c0_100 = arith.constant 0 : index
    %c2_101 = arith.constant 2 : index
    %c3_102 = arith.constant 3 : index
    %c0_103 = arith.constant 0 : index
    %99 = vector.load %arg17[%c0_100, %c2_101, %c3_102, %c0_103] : memref<2x12x12x128xf32, #tpu.memory_space<vmem>>, vector<2x8x8x128xf32>
    %100 = vector.shape_cast %99 : vector<2x8x8x128xf32> to vector<128x128xf32>
    %101 = arith.truncf %100 : vector<128x128xf32> to vector<128x128xbf16>
    %c0_104 = arith.constant 0 : index
    %c1664 = arith.constant 1664 : index
    %102 = vector.load %arg18[%c0_104, %c1664] : memref<128x3200xbf16, #tpu.memory_space<vmem>>, vector<128x128xbf16>
    tpu.vector_store %arg18[%c0_104, %c1664], %101 {strides = array<i32>} : memref<128x3200xbf16, #tpu.memory_space<vmem>>, vector<128x128xbf16>,
    %c0_105 = arith.constant 0 : index
    %c2_106 = arith.constant 2 : index
    %c4_107 = arith.constant 4 : index
    %c0_108 = arith.constant 0 : index
    %103 = vector.load %arg17[%c0_105, %c2_106, %c4_107, %c0_108] : memref<2x12x12x128xf32, #tpu.memory_space<vmem>>, vector<2x8x8x128xf32>
    %104 = vector.shape_cast %103 : vector<2x8x8x128xf32> to vector<128x128xf32>
    %105 = arith.truncf %104 : vector<128x128xf32> to vector<128x128xbf16>
    %c0_109 = arith.constant 0 : index
    %c1792 = arith.constant 1792 : index
    %106 = vector.load %arg18[%c0_109, %c1792] : memref<128x3200xbf16, #tpu.memory_space<vmem>>, vector<128x128xbf16>
    tpu.vector_store %arg18[%c0_109, %c1792], %105 {strides = array<i32>} : memref<128x3200xbf16, #tpu.memory_space<vmem>>, vector<128x128xbf16>,
    %c0_110 = arith.constant 0 : index
    %c3_111 = arith.constant 3 : index
    %c0_112 = arith.constant 0 : index
    %c0_113 = arith.constant 0 : index
    %107 = vector.load %arg17[%c0_110, %c3_111, %c0_112, %c0_113] : memref<2x12x12x128xf32, #tpu.memory_space<vmem>>, vector<2x8x8x128xf32>
    %108 = vector.shape_cast %107 : vector<2x8x8x128xf32> to vector<128x128xf32>
    %109 = arith.truncf %108 : vector<128x128xf32> to vector<128x128xbf16>
    %c0_114 = arith.constant 0 : index
    %c1920 = arith.constant 1920 : index
    %110 = vector.load %arg18[%c0_114, %c1920] : memref<128x3200xbf16, #tpu.memory_space<vmem>>, vector<128x128xbf16>
    tpu.vector_store %arg18[%c0_114, %c1920], %109 {strides = array<i32>} : memref<128x3200xbf16, #tpu.memory_space<vmem>>, vector<128x128xbf16>,
    %c0_115 = arith.constant 0 : index
    %c3_116 = arith.constant 3 : index
    %c1_117 = arith.constant 1 : index
    %c0_118 = arith.constant 0 : index
    %111 = vector.load %arg17[%c0_115, %c3_116, %c1_117, %c0_118] : memref<2x12x12x128xf32, #tpu.memory_space<vmem>>, vector<2x8x8x128xf32>
    %112 = vector.shape_cast %111 : vector<2x8x8x128xf32> to vector<128x128xf32>
    %113 = arith.truncf %112 : vector<128x128xf32> to vector<128x128xbf16>
    %c0_119 = arith.constant 0 : index
    %c2048 = arith.constant 2048 : index
    %114 = vector.load %arg18[%c0_119, %c2048] : memref<128x3200xbf16, #tpu.memory_space<vmem>>, vector<128x128xbf16>
    tpu.vector_store %arg18[%c0_119, %c2048], %113 {strides = array<i32>} : memref<128x3200xbf16, #tpu.memory_space<vmem>>, vector<128x128xbf16>,
    %c0_120 = arith.constant 0 : index
    %c3_121 = arith.constant 3 : index
    %c2_122 = arith.constant 2 : index
    %c0_123 = arith.constant 0 : index
    %115 = vector.load %arg17[%c0_120, %c3_121, %c2_122, %c0_123] : memref<2x12x12x128xf32, #tpu.memory_space<vmem>>, vector<2x8x8x128xf32>
    %116 = vector.shape_cast %115 : vector<2x8x8x128xf32> to vector<128x128xf32>
    %117 = arith.truncf %116 : vector<128x128xf32> to vector<128x128xbf16>
    %c0_124 = arith.constant 0 : index
    %c2176 = arith.constant 2176 : index
    %118 = vector.load %arg18[%c0_124, %c2176] : memref<128x3200xbf16, #tpu.memory_space<vmem>>, vector<128x128xbf16>
    tpu.vector_store %arg18[%c0_124, %c2176], %117 {strides = array<i32>} : memref<128x3200xbf16, #tpu.memory_space<vmem>>, vector<128x128xbf16>,
    %c0_125 = arith.constant 0 : index
    %c3_126 = arith.constant 3 : index
    %c3_127 = arith.constant 3 : index
    %c0_128 = arith.constant 0 : index
    %119 = vector.load %arg17[%c0_125, %c3_126, %c3_127, %c0_128] : memref<2x12x12x128xf32, #tpu.memory_space<vmem>>, vector<2x8x8x128xf32>
    %120 = vector.shape_cast %119 : vector<2x8x8x128xf32> to vector<128x128xf32>
    %121 = arith.truncf %120 : vector<128x128xf32> to vector<128x128xbf16>
    %c0_129 = arith.constant 0 : index
    %c2304 = arith.constant 2304 : index
    %122 = vector.load %arg18[%c0_129, %c2304] : memref<128x3200xbf16, #tpu.memory_space<vmem>>, vector<128x128xbf16>
    tpu.vector_store %arg18[%c0_129, %c2304], %121 {strides = array<i32>} : memref<128x3200xbf16, #tpu.memory_space<vmem>>, vector<128x128xbf16>,
    %c0_130 = arith.constant 0 : index
    %c3_131 = arith.constant 3 : index
    %c4_132 = arith.constant 4 : index
    %c0_133 = arith.constant 0 : index
    %123 = vector.load %arg17[%c0_130, %c3_131, %c4_132, %c0_133] : memref<2x12x12x128xf32, #tpu.memory_space<vmem>>, vector<2x8x8x128xf32>
    %124 = vector.shape_cast %123 : vector<2x8x8x128xf32> to vector<128x128xf32>
    %125 = arith.truncf %124 : vector<128x128xf32> to vector<128x128xbf16>
    %c0_134 = arith.constant 0 : index
    %c2432 = arith.constant 2432 : index
    %126 = vector.load %arg18[%c0_134, %c2432] : memref<128x3200xbf16, #tpu.memory_space<vmem>>, vector<128x128xbf16>
    tpu.vector_store %arg18[%c0_134, %c2432], %125 {strides = array<i32>} : memref<128x3200xbf16, #tpu.memory_space<vmem>>, vector<128x128xbf16>,
    %c0_135 = arith.constant 0 : index
    %c4_136 = arith.constant 4 : index
    %c0_137 = arith.constant 0 : index
    %c0_138 = arith.constant 0 : index
    %127 = vector.load %arg17[%c0_135, %c4_136, %c0_137, %c0_138] : memref<2x12x12x128xf32, #tpu.memory_space<vmem>>, vector<2x8x8x128xf32>
    %128 = vector.shape_cast %127 : vector<2x8x8x128xf32> to vector<128x128xf32>
    %129 = arith.truncf %128 : vector<128x128xf32> to vector<128x128xbf16>
    %c0_139 = arith.constant 0 : index
    %c2560 = arith.constant 2560 : index
    %130 = vector.load %arg18[%c0_139, %c2560] : memref<128x3200xbf16, #tpu.memory_space<vmem>>, vector<128x128xbf16>
    tpu.vector_store %arg18[%c0_139, %c2560], %129 {strides = array<i32>} : memref<128x3200xbf16, #tpu.memory_space<vmem>>, vector<128x128xbf16>,
    %c0_140 = arith.constant 0 : index
    %c4_141 = arith.constant 4 : index
    %c1_142 = arith.constant 1 : index
    %c0_143 = arith.constant 0 : index
    %131 = vector.load %arg17[%c0_140, %c4_141, %c1_142, %c0_143] : memref<2x12x12x128xf32, #tpu.memory_space<vmem>>, vector<2x8x8x128xf32>
    %132 = vector.shape_cast %131 : vector<2x8x8x128xf32> to vector<128x128xf32>
    %133 = arith.truncf %132 : vector<128x128xf32> to vector<128x128xbf16>
    %c0_144 = arith.constant 0 : index
    %c2688 = arith.constant 2688 : index
    %134 = vector.load %arg18[%c0_144, %c2688] : memref<128x3200xbf16, #tpu.memory_space<vmem>>, vector<128x128xbf16>
    tpu.vector_store %arg18[%c0_144, %c2688], %133 {strides = array<i32>} : memref<128x3200xbf16, #tpu.memory_space<vmem>>, vector<128x128xbf16>,
    %c0_145 = arith.constant 0 : index
    %c4_146 = arith.constant 4 : index
    %c2_147 = arith.constant 2 : index
    %c0_148 = arith.constant 0 : index
    %135 = vector.load %arg17[%c0_145, %c4_146, %c2_147, %c0_148] : memref<2x12x12x128xf32, #tpu.memory_space<vmem>>, vector<2x8x8x128xf32>
    %136 = vector.shape_cast %135 : vector<2x8x8x128xf32> to vector<128x128xf32>
    %137 = arith.truncf %136 : vector<128x128xf32> to vector<128x128xbf16>
    %c0_149 = arith.constant 0 : index
    %c2816 = arith.constant 2816 : index
    %138 = vector.load %arg18[%c0_149, %c2816] : memref<128x3200xbf16, #tpu.memory_space<vmem>>, vector<128x128xbf16>
    tpu.vector_store %arg18[%c0_149, %c2816], %137 {strides = array<i32>} : memref<128x3200xbf16, #tpu.memory_space<vmem>>, vector<128x128xbf16>,
    %c0_150 = arith.constant 0 : index
    %c4_151 = arith.constant 4 : index
    %c3_152 = arith.constant 3 : index
    %c0_153 = arith.constant 0 : index
    %139 = vector.load %arg17[%c0_150, %c4_151, %c3_152, %c0_153] : memref<2x12x12x128xf32, #tpu.memory_space<vmem>>, vector<2x8x8x128xf32>
    %140 = vector.shape_cast %139 : vector<2x8x8x128xf32> to vector<128x128xf32>
    %141 = arith.truncf %140 : vector<128x128xf32> to vector<128x128xbf16>
    %c0_154 = arith.constant 0 : index
    %c2944 = arith.constant 2944 : index
    %142 = vector.load %arg18[%c0_154, %c2944] : memref<128x3200xbf16, #tpu.memory_space<vmem>>, vector<128x128xbf16>
    tpu.vector_store %arg18[%c0_154, %c2944], %141 {strides = array<i32>} : memref<128x3200xbf16, #tpu.memory_space<vmem>>, vector<128x128xbf16>,
    %c0_155 = arith.constant 0 : index
    %c4_156 = arith.constant 4 : index
    %c4_157 = arith.constant 4 : index
    %c0_158 = arith.constant 0 : index
    %143 = vector.load %arg17[%c0_155, %c4_156, %c4_157, %c0_158] : memref<2x12x12x128xf32, #tpu.memory_space<vmem>>, vector<2x8x8x128xf32>
    %144 = vector.shape_cast %143 : vector<2x8x8x128xf32> to vector<128x128xf32>
    %145 = arith.truncf %144 : vector<128x128xf32> to vector<128x128xbf16>
    %c0_159 = arith.constant 0 : index
    %c3072 = arith.constant 3072 : index
    %146 = vector.load %arg18[%c0_159, %c3072] : memref<128x3200xbf16, #tpu.memory_space<vmem>>, vector<128x128xbf16>
    tpu.vector_store %arg18[%c0_159, %c3072], %145 {strides = array<i32>} : memref<128x3200xbf16, #tpu.memory_space<vmem>>, vector<128x128xbf16>,
    %c0_160 = arith.constant 0 : index
    %c0_161 = arith.constant 0 : index
    %147 = vector.load %arg18[%c0_160, %c0_161] : memref<128x3200xbf16, #tpu.memory_space<vmem>>, vector<128x3200xbf16>
    %c0_162 = arith.constant 0 : index
    %c0_163 = arith.constant 0 : index
    %148 = vector.load %arg6[%c0_162, %c0_163] : memref<3200x128xbf16, #tpu.memory_space<vmem>>, vector<3200x128xbf16>
    %cst_164 = arith.constant dense<0.000000e+00> : vector<128x128xf32>
    %149 = tpu.matmul %147, %148, %cst_164 {dimension_numbers = #tpu.dot_dimension_numbers<[1], [0], [0], [1], [0, 0, 1, 1], [], []>} : vector<128x3200xbf16>, vector<3200x128xbf16>, vector<128x128xf32> -> vector<128x128xf32>
    %c0_165 = arith.constant 0 : index
    %c0_166 = arith.constant 0 : index
    %150 = vector.load %arg7[%c0_165, %c0_166] : memref<1x128xf32, #tpu.memory_space<vmem>>, vector<1x128xf32>
    %151 = vector.broadcast %150 : vector<1x128xf32> to vector<128x128xf32>
    %152 = arith.addf %149, %151 : vector<128x128xf32>
    %cst_167 = arith.constant dense<0.000000e+00> : vector<128xf32>
    %153 = vector.multi_reduction <add>, %152, %cst_167 [0] : vector<128x128xf32> to vector<128xf32>
    %154 = vector.shape_cast %153 : vector<128xf32> to vector<1x128xf32>
    %cst_168 = arith.constant 1.280000e+02 : f32
    %155 = vector.broadcast %cst_168 : f32 to vector<1x128xf32>
    %156 = arith.divf %154, %155 : vector<1x128xf32>
    %157 = vector.broadcast %156 : vector<1x128xf32> to vector<128x128xf32>
    %158 = arith.subf %152, %157 : vector<128x128xf32>
    %159 = arith.mulf %158, %158 : vector<128x128xf32>
    %cst_169 = arith.constant dense<0.000000e+00> : vector<128xf32>
    %160 = vector.multi_reduction <add>, %159, %cst_169 [0] : vector<128x128xf32> to vector<128xf32>
    %161 = vector.shape_cast %160 : vector<128xf32> to vector<1x128xf32>
    %cst_170 = arith.constant 1.280000e+02 : f32
    %162 = vector.broadcast %cst_170 : f32 to vector<1x128xf32>
    %163 = arith.divf %161, %162 : vector<1x128xf32>
    %164 = vector.broadcast %156 : vector<1x128xf32> to vector<128x128xf32>
    %165 = arith.subf %152, %164 : vector<128x128xf32>
    %cst_171 = arith.constant 9.99999974E-6 : f32
    %166 = vector.broadcast %cst_171 : f32 to vector<1x128xf32>
    %167 = arith.addf %163, %166 : vector<1x128xf32>
    %168 = math.rsqrt %167 : vector<1x128xf32>
    %169 = vector.broadcast %168 : vector<1x128xf32> to vector<128x128xf32>
    %170 = arith.mulf %165, %169 : vector<128x128xf32>
    %c0_172 = arith.constant 0 : index
    %c0_173 = arith.constant 0 : index
    %171 = vector.load %arg8[%c0_172, %c0_173] : memref<1x128xf32, #tpu.memory_space<vmem>>, vector<1x128xf32>
    %172 = vector.broadcast %171 : vector<1x128xf32> to vector<128x128xf32>
    %173 = arith.mulf %170, %172 : vector<128x128xf32>
    %c0_174 = arith.constant 0 : index
    %c0_175 = arith.constant 0 : index
    %174 = vector.load %arg9[%c0_174, %c0_175] : memref<1x128xf32, #tpu.memory_space<vmem>>, vector<1x128xf32>
    %175 = vector.broadcast %174 : vector<1x128xf32> to vector<128x128xf32>
    %176 = arith.addf %173, %175 : vector<128x128xf32>
    %177 = arith.negf %176 : vector<128x128xf32>
    %178 = math.exp %177 : vector<128x128xf32>
    %cst_176 = arith.constant 1.000000e+00 : f32
    %179 = vector.broadcast %cst_176 : f32 to vector<128x128xf32>
    %180 = arith.addf %179, %178 : vector<128x128xf32>
    %181 = arith.divf %179, %180 : vector<128x128xf32>
    %182 = arith.mulf %176, %181 : vector<128x128xf32>
    %183 = arith.truncf %182 : vector<128x128xf32> to vector<128x128xbf16>
    %c0_177 = arith.constant 0 : index
    %c0_178 = arith.constant 0 : index
    %184 = vector.load %arg10[%c0_177, %c0_178] : memref<128x32xbf16, #tpu.memory_space<vmem>>, vector<128x32xbf16>
    %cst_179 = arith.constant dense<0.000000e+00> : vector<128x32xf32>
    %185 = tpu.matmul %183, %184, %cst_179 {dimension_numbers = #tpu.dot_dimension_numbers<[1], [0], [0], [1], [0, 0, 1, 1], [], []>} : vector<128x128xbf16>, vector<128x32xbf16>, vector<128x32xf32> -> vector<128x32xf32>
    %c0_180 = arith.constant 0 : index
    %c0_181 = arith.constant 0 : index
    %186 = vector.load %arg11[%c0_180, %c0_181] : memref<1x32xf32, #tpu.memory_space<vmem>>, vector<1x32xf32>
    %187 = vector.broadcast %186 : vector<1x32xf32> to vector<128x32xf32>
    %188 = arith.addf %185, %187 : vector<128x32xf32>
    %cst_182 = arith.constant dense<0.000000e+00> : vector<32xf32>
    %189 = vector.multi_reduction <add>, %188, %cst_182 [0] : vector<128x32xf32> to vector<32xf32>
    %190 = vector.shape_cast %189 : vector<32xf32> to vector<1x32xf32>
    %cst_183 = arith.constant 1.280000e+02 : f32
    %191 = vector.broadcast %cst_183 : f32 to vector<1x32xf32>
    %192 = arith.divf %190, %191 : vector<1x32xf32>
    %193 = vector.broadcast %192 : vector<1x32xf32> to vector<128x32xf32>
    %194 = arith.subf %188, %193 : vector<128x32xf32>
    %195 = arith.mulf %194, %194 : vector<128x32xf32>
    %cst_184 = arith.constant dense<0.000000e+00> : vector<32xf32>
    %196 = vector.multi_reduction <add>, %195, %cst_184 [0] : vector<128x32xf32> to vector<32xf32>
    %197 = vector.shape_cast %196 : vector<32xf32> to vector<1x32xf32>
    %cst_185 = arith.constant 1.280000e+02 : f32
    %198 = vector.broadcast %cst_185 : f32 to vector<1x32xf32>
    %199 = arith.divf %197, %198 : vector<1x32xf32>
    %200 = vector.broadcast %192 : vector<1x32xf32> to vector<128x32xf32>
    %201 = arith.subf %188, %200 : vector<128x32xf32>
    %cst_186 = arith.constant 9.99999974E-6 : f32
    %202 = vector.broadcast %cst_186 : f32 to vector<1x32xf32>
    %203 = arith.addf %199, %202 : vector<1x32xf32>
    %204 = math.rsqrt %203 : vector<1x32xf32>
    %205 = vector.broadcast %204 : vector<1x32xf32> to vector<128x32xf32>
    %206 = arith.mulf %201, %205 : vector<128x32xf32>
    %c0_187 = arith.constant 0 : index
    %c0_188 = arith.constant 0 : index
    %207 = vector.load %arg12[%c0_187, %c0_188] : memref<1x32xf32, #tpu.memory_space<vmem>>, vector<1x32xf32>
    %208 = vector.broadcast %207 : vector<1x32xf32> to vector<128x32xf32>
    %209 = arith.mulf %206, %208 : vector<128x32xf32>
    %c0_189 = arith.constant 0 : index
    %c0_190 = arith.constant 0 : index
    %210 = vector.load %arg13[%c0_189, %c0_190] : memref<1x32xf32, #tpu.memory_space<vmem>>, vector<1x32xf32>
    %211 = vector.broadcast %210 : vector<1x32xf32> to vector<128x32xf32>
    %212 = arith.addf %209, %211 : vector<128x32xf32>
    %213 = vector.shape_cast %212 : vector<128x32xf32> to vector<2x64x32xf32>
    %cst_191 = arith.constant dense<0.000000e+00> : vector<2x32xf32>
    %214 = vector.multi_reduction <add>, %213, %cst_191 [1] : vector<2x64x32xf32> to vector<2x32xf32>
    %cst_192 = arith.constant 6.400000e+01 : f32
    %215 = vector.broadcast %cst_192 : f32 to vector<2x32xf32>
    %216 = arith.divf %214, %215 : vector<2x32xf32>
    %c0_193 = arith.constant 0 : index
    %c0_194 = arith.constant 0 : index
    %217 = vector.load %arg14[%c0_193, %c0_194] : memref<32x2xf32, #tpu.memory_space<vmem>>, vector<32x2xf32>
    %cst_195 = arith.constant dense<0.000000e+00> : vector<2x2xf32>
    %218 = tpu.matmul %216, %217, %cst_195 {dimension_numbers = #tpu.dot_dimension_numbers<[1], [0], [0], [1], [0, 0, 1, 1], [], []>} : vector<2x32xf32>, vector<32x2xf32>, vector<2x2xf32> -> vector<2x2xf32>
    %cst_196 = arith.constant 0.000000e+00 : f32
    %219 = vector.broadcast %cst_196 : f32 to vector<2x2xf32>
    %220 = arith.maximumf %218, %219 : vector<2x2xf32>
    %c0_197 = arith.constant 0 : index
    %c0_198 = arith.constant 0 : index
    %221 = vector.load %arg15[%c0_197, %c0_198] : memref<2x32xf32, #tpu.memory_space<vmem>>, vector<2x32xf32>
    %cst_199 = arith.constant dense<0.000000e+00> : vector<2x32xf32>
    %222 = tpu.matmul %220, %221, %cst_199 {dimension_numbers = #tpu.dot_dimension_numbers<[1], [0], [0], [1], [0, 0, 1, 1], [], []>} : vector<2x2xf32>, vector<2x32xf32>, vector<2x32xf32> -> vector<2x32xf32>
    %223 = arith.negf %222 : vector<2x32xf32>
    %224 = math.exp %223 : vector<2x32xf32>
    %cst_200 = arith.constant 1.000000e+00 : f32
    %225 = vector.broadcast %cst_200 : f32 to vector<2x32xf32>
    %226 = arith.addf %225, %224 : vector<2x32xf32>
    %227 = arith.divf %225, %226 : vector<2x32xf32>
    %228 = vector.shape_cast %227 : vector<2x32xf32> to vector<2x1x32xf32>
    %229 = vector.broadcast %228 : vector<2x1x32xf32> to vector<2x64x32xf32>
    %230 = arith.mulf %213, %229 : vector<2x64x32xf32>
    %231 = vector.shape_cast %230 : vector<2x64x32xf32> to vector<128x32xf32>
    %cst_201 = arith.constant 1.000000e-01 : f32
    %232 = vector.broadcast %cst_201 : f32 to vector<128x32xf32>
    %233 = arith.mulf %232, %231 : vector<128x32xf32>
    %234 = arith.addf %0, %233 : vector<128x32xf32>
    %c0_202 = arith.constant 0 : index
    %c0_203 = arith.constant 0 : index
    %235 = vector.load %arg16[%c0_202, %c0_203] : memref<128x32xf32, #tpu.memory_space<vmem>>, vector<128x32xf32>
    tpu.vector_store %arg16[%c0_202, %c0_203], %234 {strides = array<i32>} : memref<128x32xf32, #tpu.memory_space<vmem>>, vector<128x32xf32>,
    return
  }
  func.func @transform_0(%arg0: i32) -> (i32, i32) {
    %c0_i32 = arith.constant 0 : i32
    %c0_i32_0 = arith.constant 0 : i32
    %c0_i32_1 = arith.constant 0 : i32
    return %c0_i32, %c0_i32_0 : i32, i32
  }
  func.func @transform_1(%arg0: i32) -> (i32, i32) {
    %c0_i32 = arith.constant 0 : i32
    %c0_i32_0 = arith.constant 0 : i32
    %c0_i32_1 = arith.constant 0 : i32
    return %c0_i32, %c0_i32_0 : i32, i32
  }
  func.func @transform_2(%arg0: i32) -> (i32, i32) {
    %c0_i32 = arith.constant 0 : i32
    %c0_i32_0 = arith.constant 0 : i32
    %c0_i32_1 = arith.constant 0 : i32
    return %c0_i32, %c0_i32_0 : i32, i32
  }
  func.func @transform_3(%arg0: i32) -> (i32, i32) {
    %c0_i32 = arith.constant 0 : i32
    %c0_i32_0 = arith.constant 0 : i32
    %c0_i32_1 = arith.constant 0 : i32
    return %c0_i32, %c0_i32_0 : i32, i32
  }
  func.func @transform_4(%arg0: i32) -> (i32, i32) {
    %c0_i32 = arith.constant 0 : i32
    %c0_i32_0 = arith.constant 0 : i32
    %c0_i32_1 = arith.constant 0 : i32
    return %c0_i32, %c0_i32_0 : i32, i32
  }
  func.func @transform_5(%arg0: i32) -> (i32, i32) {
    %c0_i32 = arith.constant 0 : i32
    %c0_i32_0 = arith.constant 0 : i32
    %c0_i32_1 = arith.constant 0 : i32
    return %c0_i32, %c0_i32_0 : i32, i32
  }
  func.func @transform_6(%arg0: i32) -> (i32, i32) {
    %c0_i32 = arith.constant 0 : i32
    %c0_i32_0 = arith.constant 0 : i32
    %c0_i32_1 = arith.constant 0 : i32
    return %c0_i32, %c0_i32_0 : i32, i32
  }
  func.func @transform_7(%arg0: i32) -> (i32, i32) {
    %c0_i32 = arith.constant 0 : i32
    %c0_i32_0 = arith.constant 0 : i32
    %c0_i32_1 = arith.constant 0 : i32
    return %c0_i32, %c0_i32_0 : i32, i32
  }
  func.func @transform_8(%arg0: i32) -> (i32, i32) {
    %c0_i32 = arith.constant 0 : i32
    %c0_i32_0 = arith.constant 0 : i32
    %c0_i32_1 = arith.constant 0 : i32
    return %c0_i32, %c0_i32_0 : i32, i32
  }
  func.func @transform_9(%arg0: i32) -> (i32, i32) {
    %c0_i32 = arith.constant 0 : i32
    %c0_i32_0 = arith.constant 0 : i32
    %c0_i32_1 = arith.constant 0 : i32
    return %c0_i32, %c0_i32_0 : i32, i32
  }
  func.func @transform_10(%arg0: i32) -> (i32, i32) {
    %c0_i32 = arith.constant 0 : i32
    %c0_i32_0 = arith.constant 0 : i32
    %c0_i32_1 = arith.constant 0 : i32
    return %c0_i32, %c0_i32_0 : i32, i32
  }
  func.func @transform_11(%arg0: i32) -> (i32, i32) {
    %c0_i32 = arith.constant 0 : i32
    %c0_i32_0 = arith.constant 0 : i32
    %c0_i32_1 = arith.constant 0 : i32
    return %c0_i32, %c0_i32_0 : i32, i32
  }
  func.func @transform_12(%arg0: i32) -> (i32, i32) {
    %c0_i32 = arith.constant 0 : i32
    %c0_i32_0 = arith.constant 0 : i32
    %c0_i32_1 = arith.constant 0 : i32
    return %c0_i32, %c0_i32_0 : i32, i32
  }
  func.func @transform_13(%arg0: i32) -> (i32, i32) {
    %c0_i32 = arith.constant 0 : i32
    %c0_i32_0 = arith.constant 0 : i32
    %c0_i32_1 = arith.constant 0 : i32
    return %c0_i32, %c0_i32_0 : i32, i32
  }
  func.func @transform_14(%arg0: i32) -> (i32, i32) {
    %c0_i32 = arith.constant 0 : i32
    %c0_i32_0 = arith.constant 0 : i32
    %c0_i32_1 = arith.constant 0 : i32
    return %c0_i32, %c0_i32_0 : i32, i32
  }
  func.func @transform_15(%arg0: i32) -> (i32, i32) {
    %c0_i32 = arith.constant 0 : i32
    %c0_i32_0 = arith.constant 0 : i32
    %c0_i32_1 = arith.constant 0 : i32
    return %c0_i32, %c0_i32_0 : i32, i32
  }
}

</mosaic_0001>

<bundles_post_ra>
// kernel: tpu_custom_call.1
= control target key start
LH: loop header
LB: loop body
LE: loop exit
PB: predicated region body
PF: predicated region fallthrough
CT: control target
= control target key end

     0   :  { %20 = vsyncpa [#allocation5], 0  ;;  %s6935_s18 = smov [#allocation4]   ;;  %s8932_s0 = inlined_call_operand.vmem [shape: f32[128,32], index: 0, kind: input, shape index: {}]   ;;  %s8933_s1 = inlined_call_operand.vmem [shape: bf16[32,128], index: 1, kind: input, shape index: {}]   ;;  %s8934_s2 = inlined_call_operand.vmem [shape: f32[1,128], index: 2, kind: input, shape index: {}]   ;;  %s8935_s3 = inlined_call_operand.vmem [shape: f32[1,128], index: 3, kind: input, shape index: {}]   ;;  %s8936_s4 = inlined_call_operand.vmem [shape: f32[1,128], index: 4, kind: input, shape index: {}]   ;;  %s8937_s5 = inlined_call_operand.hbm [shape: bf16[3200,128], index: 5, kind: input, shape index: {}]   ;;  %s8938_s6 = inlined_call_operand.vmem [shape: f32[1,128], index: 6, kind: input, shape index: {}]   ;;  %s8939_s7 = inlined_call_operand.vmem [shape: f32[1,128], index: 7, kind: input, shape index: {}]   ;;  %s8940_s8 = inlined_call_operand.vmem [shape: f32[1,128], index: 8, kind: input, shape index: {}]   ;;  %s8941_s9 = inlined_call_operand.vmem [shape: bf16[128,32], index: 9, kind: input, shape index: {}]   ;;  %s8942_s10 = inlined_call_operand.vmem [shape: f32[1,32], index: 10, kind: input, shape index: {}]   ;;  %s8943_s11 = inlined_call_operand.vmem [shape: f32[1,32], index: 11, kind: input, shape index: {}]   ;;  %s8944_s12 = inlined_call_operand.vmem [shape: f32[1,32], index: 12, kind: input, shape index: {}]   ;;  %s8945_s13 = inlined_call_operand.vmem [shape: f32[32,2], index: 13, kind: input, shape index: {}]   ;;  %s8946_s14 = inlined_call_operand.vmem [shape: f32[2,32], index: 14, kind: input, shape index: {}]   ;;  %s8947_s15 = inlined_call_operand.vmem [shape: f32[128,32], index: 15, kind: output, shape index: {}]  }
   0x1   :  { %s36_s19 = sshll.u32 %s6935_s18, 4  ;;  %s6911_s22 = scalar_lea.hbm %s8937_s5, 25600  ;;  %s37_s19 = int_to_ptr.vmem [resolvable:$true] %s36_s19 }
   0x2   :  { %p6912_p0 = scmp.ne.s32.totalorder %s8937_s5, %s6911_s22  ;;  %p6915_p1 = scmp.lt.u32.totalorder %s6911_s22, %s8937_s5 }
   0x4   :  { %p6917_p2 = pnand %p6915_p1, %p6912_p0 }
   0x6   :  { %6920 = shalt.err (!%p6917_p2)
}
   0x7   :  { %s6921_s27 = scalar_lea.vmem %s37_s19, 25600  ;;  %p6926_p4 = scmp.lt.s32.totalorder %s37_s19, %s37_s19 }
   0x8   :  { %p6922_p3 = scmp.ne.s32.totalorder %s37_s19, %s6921_s27  ;;  %p6927_p5 = scmp.lt.s32.totalorder %s6921_s27, %s6921_s27 }
   0xa   :  { %p6928_p6 = por %p6927_p5, %p6926_p4 }
   0xc   :  { %p6929_p7 = pnand %p6928_p6, %p6922_p3 }
   0xe   :  { %6932 = shalt.err (!%p6929_p7)
}
   0xf   :  { %s6936_s28 = smov 64   ;;  %s6937_s29 = smov 4  }
  0x10   :  { %42 = dma.hbm_to_vmem [thread:$0]  %s8937_s5, 25600, %s37_s19, [#allocation5], %s6936_s28, %s6936_s28, %s6937_s29  }
  0x11   :  { %6933 = dma.done.wait [#allocation5], 25600  }
  0x12   :  { %6934 = vsyncadd [#allocation5], 4294941696  ;;  %v6546_v0 = vld [vmem:[%s8933_s1] sm:$0xff]   ;;  %v6547_v1 = vld [vmem:[%s8933_s1 + $0x8] sm:$0xff]   ;;  %vm112_vm0 = vcmask 261120   ;;  %vm6940_vm1 = vmmov 0  }
  0x13   :  { %6433 = vmatprep.subr.bf16.mxu0 %v6546_v0  ;;  %v65_v2 = vld [vmem:[%s8932_s0] sm:$0xff]  ;;  %v66_v3 = vld [vmem:[%s8932_s0 + $0x8] sm:$0xff]  ;;  %v67_v5 = vld [vmem:[%s8932_s0 + $0x10] sm:$0xff]  ;;  %vm5091_vm2 = vcmask 1041409   ;;  %vm5171_vm3 = vcmask 1041408   ;;  %vm5167_vm4 = vcmask 15360  }
  0x14   :  { %6434 = vmatpush3.bf16.msra.mxu0 %v6546_v0  ;;  %v81_v4 = vpack.c.bf16 %v66_v3, %v65_v2  ;;  %v68_v6 = vld [vmem:[%s8932_s0 + $0x18] sm:$0xff]  ;;  %v69_v7 = vld [vmem:[%s8932_s0 + $0x20] sm:$0xff]  ;;  %v70_v8 = vld [vmem:[%s8932_s0 + $0x28] sm:$0xff] }
  0x15   :  { %6435 = vmatprep.subr.bf16.mxu0 %v6547_v1  ;;  %v82_v9 = vpack.c.bf16 %v68_v6, %v67_v5  ;;  %v83_v10 = vpack.c.bf16 %v70_v8, %v69_v7  ;;  %v71_v11 = vld [vmem:[%s8932_s0 + $0x30] sm:$0xff]  ;;  %v72_v12 = vld [vmem:[%s8932_s0 + $0x38] sm:$0xff]  ;;  %v73_v13 = vld [vmem:[%s8932_s0 + $0x40] sm:$0xff] }
  0x16   :  { %6437 = vmatprep.mubr.msk.bf16.mxu0 %vm112_vm0, %v81_v4  ;;  %v74_v14 = vld [vmem:[%s8932_s0 + $0x48] sm:$0xff]  ;;  %v84_v15 = vpack.c.bf16 %v72_v12, %v71_v11  ;;  %v75_v17 = vld [vmem:[%s8932_s0 + $0x50] sm:$0xff]  ;;  %v76_v18 = vld [vmem:[%s8932_s0 + $0x58] sm:$0xff] }
  0x17   :  { %v85_v16 = vpack.c.bf16 %v74_v14, %v73_v13  ;;  %v77_v19 = vld [vmem:[%s8932_s0 + $0x60] sm:$0xff]  ;;  %v78_v20 = vld [vmem:[%s8932_s0 + $0x68] sm:$0xff]  ;;  %v86_v21 = vpack.c.bf16 %v76_v18, %v75_v17  ;;  %v79_v23 = vld [vmem:[%s8932_s0 + $0x70] sm:$0xff] }
  0x18   :  { %6436 = vmatpush3.bf16.msra.mxu0 %v6547_v1  ;;  %v87_v22 = vpack.c.bf16 %v78_v20, %v77_v19  ;;  %v80_v24 = vld [vmem:[%s8932_s0 + $0x78] sm:$0xff]  ;;  %v7099_v27 = vld [vmem:[%s8934_s2] ss:$0 sm:$0xff]  ;;  %v6552_v51 = vld [vmem:[#allocation4 + $0x48] sm:$0xff]  }
  0x19   :  { %v88_v25 = vpack.c.bf16 %v80_v24, %v79_v23  ;;  %v6548_v43 = vld [vmem:[#allocation4 + $0x40] sm:$0xff]   ;;  %v6553_v55 = vld [vmem:[#allocation4 + $0x8] sm:$0xff]   ;;  %v6556_v63 = vld [vmem:[#allocation4 + $0x50] sm:$0xff]  }
  0x1a   :  { %v6549_v46 = vld [vmem:[#allocation4] sm:$0xff]   ;;  %5626 = vmatprep.subr.bf16.mxu1 %v6548_v43  ;;  %v6554_v57 = vld [vmem:[#allocation4 + $0xc8] sm:$0xff]   ;;  %v6557_v2 = vld [vmem:[#allocation4 + $0x10] sm:$0xff]  }
  0x1b   :  { %6438 = vmatmul.mubr.msk.bf16.vlgmr.msra.gmra.mrb[0].mxu0 %vm112_vm0, %v82_v9  ;;  %v6550_v47 = vld [vmem:[#allocation4 + $0xc0] sm:$0xff]   ;;  %5627 = vmatpush3.bf16.msra.mxu1 %v6549_v46  ;;  %v6555_v61 = vld [vmem:[#allocation4 + $0x88] sm:$0xff]   ;;  %v6558_v3 = vld [vmem:[#allocation4 + $0xd0] sm:$0xff]  }
  0x1c   :  { %6441 = vmatprep.mubr.msk.bf16.mxu0 %vm112_vm0, %v83_v10  ;;  %v6551_v50 = vld [vmem:[#allocation4 + $0x80] sm:$0xff]   ;;  %5690 = vmatprep.subr.bf16.mxu0 %v6550_v47  ;;  %v6559_v6 = vld [vmem:[#allocation4 + $0x90] sm:$0xff]   ;;  %v6560_v7 = vld [vmem:[#allocation4 + $0x58] sm:$0xff]  }
  0x1d   :  { %5691 = vmatpush3.bf16.msra.mxu0 %v6551_v50  ;;  %5628 = vmatprep.subr.bf16.mxu1 %v6552_v51  ;;  %v6561_v11 = vld [vmem:[#allocation4 + $0x18] sm:$0xff]   ;;  %v6564_v19 = vld [vmem:[#allocation4 + $0x60] sm:$0xff]   ;;  %v6574_v43 = vld [vmem:[#allocation4 + $0xf0] sm:$0xff]  }
  0x1e   :  { %5692 = vmatprep.subr.bf16.mxu0 %v6554_v57  ;;  %v6562_v13 = vld [vmem:[#allocation4 + $0xd8] sm:$0xff]   ;;  %v6566_v23 = vld [vmem:[#allocation4 + $0xe0] sm:$0xff]   ;;  %v6575_v46 = vld [vmem:[#allocation4 + $0xb0] sm:$0xff]  }
  0x1f   :  { %5629 = vmatpush3.bf16.msra.mxu1 %v6553_v55  ;;  %v6563_v17 = vld [vmem:[#allocation4 + $0x98] sm:$0xff]  }
  0x20   :  { %5630 = vmatprep.subr.bf16.mxu1 %v6556_v63  ;;  %v6576_v47 = vld [vmem:[#allocation4 + $0x78] sm:$0xff]  }
  0x21   :  { %5693 = vmatpush3.bf16.msra.mxu0 %v6555_v61  ;;  %v6577_v50 = vld [vmem:[#allocation4 + $0x38] sm:$0xff]  }
  0x22   :  { %5694 = vmatprep.subr.bf16.mxu0 %v6558_v3  ;;  %v6578_v51 = vld [vmem:[#allocation4 + $0xf8] sm:$0xff]  }
  0x23   :  { %6442 = vmatmul.mubr.msk.bf16.gmra.mrb[4].mxu0 %vm112_vm0, %v84_v15  ;;  %5631 = vmatpush3.bf16.msra.mxu1 %v6557_v2  ;;  %v6579_v57 = vld [vmem:[#allocation4 + $0xb8] sm:$0xff]  }
  0x24   :  { %6445 = vmatprep.mubr.msk.bf16.mxu0 %vm112_vm0, %v85_v16  ;;  %5632 = vmatprep.subr.bf16.mxu1 %v6560_v7  ;;  %v6580_v7 = vld [vmem:[#allocation4 + $0x140] sm:$0xff]  }
  0x25   :  { %5695 = vmatpush3.bf16.msra.mxu0 %v6559_v6 }
  0x26   :  { %5696 = vmatprep.subr.bf16.mxu0 %v6562_v13  ;;  %v6583_v13 = vld [vmem:[#allocation4 + $0x108] sm:$0xff]  }
  0x27   :  { %5633 = vmatpush3.bf16.msra.mxu1 %v6561_v11 }
  0x28   :  { %5634 = vmatprep.subr.bf16.mxu1 %v6564_v19 }
  0x29   :  { %5697 = vmatpush3.bf16.msra.mxu0 %v6563_v17 }
  0x2a   :  { %5698 = vmatprep.subr.bf16.mxu0 %v6566_v23 }
  0x2b   :  { %6446 = vmatmul.mubr.msk.bf16.gmra.mrb[8].mxu0 %vm112_vm0, %v86_v21 }
  0x2c   :  { %6449 = vmatprep.mubr.msk.bf16.mxu0 %vm112_vm0, %v87_v22  ;;  %v6565_v22 = vld [vmem:[#allocation4 + $0x20] sm:$0xff]  }
  0x2d   :  { %5635 = vmatpush3.bf16.msra.mxu1 %v6565_v22 }
  0x33   :  { %6450 = vmatmul.mubr.msk.bf16.gmra.mrb[12].mxu0 %vm112_vm0, %v88_v25 }
  0xee   :  { %v6439_v26 = vpop.f32.mrb[0].mxu0 }
  0xef   :  { %v171_v28 = vpop.f32.mrb[1].mxu0  ;;  %v7108_v33 = vadd.f32 %v6439_v26, %v7099_v27  ;;  %v6567_v26 = vld [vmem:[#allocation4 + $0xa0] sm:$0xff]  }
  0xf0   :  { %v6440_v29 = vpop.f32.mrb[2].mxu0  ;;  %v7102_v31 = vadd.f32 %v7099_v27, %v171_v28  ;;  %v6568_v28 = vld [vmem:[#allocation4 + $0x68] sm:$0xff]   ;;  %5699 = vmatpush3.bf16.msra.mxu0 %v6567_v26  ;;  %v6587_v26 = vld [vmem:[#allocation4 + $0x118] sm:$0xff]  }
  0xf1   :  { %v174_v30 = vpop.f32.mrb[3].mxu0  ;;  %v7113_v35 = vadd.f32 %v6440_v29, %v7099_v27  ;;  %5636 = vmatprep.subr.bf16.mxu1 %v6568_v28 }
  0xf2   :  { %v7105_v32 = vadd.f32 %v7099_v27, %v174_v30 }
  0xf4   :  { %v234_v34 = vadd.f32 %v7105_v32, %v7102_v31 }
  0xf6   :  { %v235_v36 = vadd.f32 %v234_v34, %v7108_v33  ;;  %v6443_v37 = vpop.f32.mrb[4].mxu0  ;;  %v6569_v34 = vld [vmem:[#allocation4 + $0x28] sm:$0xff]  }
  0xf7   :  { %v187_v38 = vpop.f32.mrb[5].mxu0  ;;  %v7125_v48 = vadd.f32 %v6443_v37, %v7099_v27  ;;  %v8948_v37 = vmov 0.0   ;;  %5637 = vmatpush3.bf16.msra.mxu1 %v6569_v34 }
  0xf8   :  { %v7117_v39 = vadd.f32 %v7099_v27, %v187_v38  ;;  %v236_v40 = vadd.f32 %v235_v36, %v7113_v35  ;;  %v6444_v41 = vpop.f32.mrb[6].mxu0  ;;  %v7164_v36 = vld [vmem:[#allocation4 + $0xe8] sm:$0xff]   ;;  %487 = vst [vmem:[#allocation2] sm:$0xff] %v8948_v37  ;;  %488 = vst [vmem:[#allocation2 + $0x8] sm:$0xf] %v8948_v37 }
  0xf9   :  { %v190_v42 = vpop.f32.mrb[7].mxu0  ;;  %v7129_v52 = vadd.f32 %v6444_v41, %v7099_v27  ;;  %489 = vst [vmem:[#allocation2 + $0x10] sm:$0xff] %v8948_v37  ;;  %490 = vst [vmem:[#allocation2 + $0x18] sm:$0xf] %v8948_v37  ;;  %v6571_v38 = vld [vmem:[#allocation4 + $0xa8] sm:$0xff]   ;;  %5700 = vmatprep.subr.bf16.mxu0 %v7164_v36 }
  0xfa   :  { %v237_v44 = vadd.f32 %v236_v40, %v7117_v39  ;;  %v7122_v45 = vadd.f32 %v7099_v27, %v190_v42  ;;  %491 = vst [vmem:[#allocation2 + $0xc0] sm:$0xff] %v8948_v37  ;;  %492 = vst [vmem:[#allocation2 + $0xc8] sm:$0xf] %v8948_v37  ;;  %v6572_v40 = vld [vmem:[#allocation4 + $0x70] sm:$0xff]   ;;  %5701 = vmatpush3.bf16.msra.mxu0 %v6571_v38 }
  0xfb   :  { %493 = vst [vmem:[#allocation2 + $0xd0] sm:$0xff] %v8948_v37  ;;  %494 = vst [vmem:[#allocation2 + $0xd8] sm:$0xf] %v8948_v37  ;;  %v6573_v42 = vld [vmem:[#allocation4 + $0x30] sm:$0xff]   ;;  %5638 = vmatprep.subr.bf16.mxu1 %v6572_v40  ;;  %5702 = vmatprep.subr.bf16.mxu0 %v6574_v43  ;;  %v6591_v43 = vld [vmem:[#allocation4 + $0x180] sm:$0xff]  }
  0xfc   :  { %v238_v49 = vadd.f32 %v237_v44, %v7122_v45  ;;  %496 = vst [vmem:[#allocation2 + $0xa0] sm:$0xff] %v8948_v37  ;;  %497 = vst [vmem:[#allocation2 + $0xa8] sm:$0xf] %v8948_v37  ;;  %5639 = vmatpush3.bf16.msra.mxu1 %v6573_v42  ;;  %v6590_v42 = vld [vmem:[#allocation4 + $0x120] sm:$0xff]  }
  0xfd   :  { %498 = vst [vmem:[#allocation2 + $0xb0] sm:$0xff] %v8948_v37  ;;  %499 = vst [vmem:[#allocation2 + $0xb8] sm:$0xf] %v8948_v37  ;;  %5640 = vmatprep.subr.bf16.mxu1 %v6576_v47 }
  0xfe   :  { %v239_v53 = vadd.f32 %v238_v49, %v7125_v48  ;;  %v6447_v54 = vpop.f32.mrb[8].mxu0  ;;  %500 = vst [vmem:[#allocation2 + $0x160] sm:$0xff] %v8948_v37  ;;  %501 = vst [vmem:[#allocation2 + $0x168] sm:$0xf] %v8948_v37  ;;  %5703 = vmatpush3.bf16.msra.mxu0 %v6575_v46  ;;  %v6594_v46 = vld [vmem:[#allocation4 + $0x168] sm:$0xff]  }
  0xff   :  { %v203_v56 = vpop.f32.mrb[9].mxu0  ;;  %v7141_v4 = vadd.f32 %v6447_v54, %v7099_v27  ;;  %502 = vst [vmem:[#allocation2 + $0x170] sm:$0xff] %v8948_v37  ;;  %503 = vst [vmem:[#allocation2 + $0x178] sm:$0xf] %v8948_v37  ;;  %5704 = vmatprep.subr.bf16.mxu0 %v6578_v51  ;;  %v633_v3 = vld [vmem:[#allocation2 + $0x2] sm:$0xff] }
 0x100   :  { %v7133_v58 = vadd.f32 %v7099_v27, %v203_v56  ;;  %v240_v59 = vadd.f32 %v239_v53, %v7129_v52  ;;  %v6448_v60 = vpop.f32.mrb[10].mxu0  ;;  %506 = vst [vmem:[#allocation2 + $0x20] sm:$0x3] %v8948_v37  ;;  %507 = vst [vmem:[#allocation2 + $0x30] sm:$0x3] %v8948_v37  ;;  %5641 = vmatpush3.bf16.msra.mxu1 %v6577_v50  ;;  %v6593_v50 = vld [vmem:[#allocation4 + $0x188] sm:$0xff]  }
 0x101   :  { %v206_v62 = vpop.f32.mrb[11].mxu0  ;;  %v7145_v8 = vadd.f32 %v6448_v60, %v7099_v27  ;;  %508 = vst [vmem:[#allocation2 + $0x40] sm:$0x3] %v8948_v37  ;;  %509 = vst [vmem:[#allocation2 + $0x50] sm:$0x3] %v8948_v37  ;;  %5754 = vmatprep.subr.bf16.mxu1 %v6580_v7  ;;  %v6599_v7 = vld [vmem:[#allocation4 + $0x198] sm:$0xff]  }
 0x102   :  { %v241_v0 = vadd.f32 %v240_v59, %v7133_v58  ;;  %v7138_v1 = vadd.f32 %v7099_v27, %v206_v62  ;;  %510 = vst [vmem:[#allocation2 + $0x60] sm:$0x3] %v8948_v37  ;;  %511 = vst [vmem:[#allocation2 + $0x70] sm:$0x3] %v8948_v37  ;;  %5705 = vmatpush3.bf16.msra.mxu0 %v6579_v57 }
 0x103   :  { %512 = vst [vmem:[#allocation2 + $0x80] sm:$0x3] %v8948_v37  ;;  %513 = vst [vmem:[#allocation2 + $0x90] sm:$0x3] %v8948_v37 }
 0x104   :  { %v242_v5 = vadd.f32 %v241_v0, %v7138_v1  ;;  %518 = vst [vmem:[#allocation2 + $0xe0] sm:$0x3] %v8948_v37  ;;  %519 = vst [vmem:[#allocation2 + $0xf0] sm:$0x3] %v8948_v37 }
 0x105   :  { %520 = vst [vmem:[#allocation2 + $0x100] sm:$0x3] %v8948_v37  ;;  %521 = vst [vmem:[#allocation2 + $0x110] sm:$0x3] %v8948_v37 }
 0x106   :  { %v243_v9 = vadd.f32 %v242_v5, %v7141_v4  ;;  %v6451_v10 = vpop.f32.mrb[12].mxu0  ;;  %522 = vst [vmem:[#allocation2 + $0x120] sm:$0x3] %v8948_v37  ;;  %523 = vst [vmem:[#allocation2 + $0x130] sm:$0x3] %v8948_v37  ;;  %v7238_v5 = vld [vmem:[#allocation2 + $0x12] sm:$0xff] }
 0x107   :  { %v219_v12 = vpop.f32.mrb[13].mxu0  ;;  %v7157_v24 = vadd.f32 %v6451_v10, %v7099_v27  ;;  %524 = vst [vmem:[#allocation2 + $0x140] sm:$0x3] %v8948_v37  ;;  %525 = vst [vmem:[#allocation2 + $0x150] sm:$0x3] %v8948_v37  ;;  %v649_v6 = vpack.c.bf16 %v7238_v5, %v633_v3  ;;  %v6582_v10 = vld [vmem:[#allocation4 + $0x148] sm:$0xff]  }
 0x108   :  { %v7149_v14 = vadd.f32 %v7099_v27, %v219_v12  ;;  %v244_v15 = vadd.f32 %v243_v9, %v7145_v8  ;;  %v6452_v16 = vpop.f32.mrb[14].mxu0  ;;  %530 = vst [vmem:[#allocation2 + $0x2a] sm:$0x3] %v8948_v37  ;;  %531 = vst [vmem:[#allocation2 + $0x3a] sm:$0x3] %v8948_v37  ;;  %v6581_v9 = vld [vmem:[#allocation4 + $0x100] sm:$0xff]  }
 0x109   :  { %v222_v18 = vpop.f32.mrb[15].mxu0  ;;  %v7161_v29 = vadd.f32 %v6452_v16, %v7099_v27  ;;  %532 = vst [vmem:[#allocation2 + $0x4a] sm:$0x3] %v8948_v37  ;;  %533 = vst [vmem:[#allocation2 + $0x5a] sm:$0x3] %v8948_v37 }
 0x10a   :  { %v245_v20 = vadd.f32 %v244_v15, %v7149_v14  ;;  %v7154_v21 = vadd.f32 %v7099_v27, %v222_v18  ;;  %534 = vst [vmem:[#allocation2 + $0x6a] sm:$0x3] %v8948_v37  ;;  %535 = vst [vmem:[#allocation2 + $0x7a] sm:$0x3] %v8948_v37  ;;  %v6584_v15 = vld [vmem:[#allocation4 + $0x150] sm:$0xff]  }
 0x10b   :  { %536 = vst [vmem:[#allocation2 + $0x8a] sm:$0x3] %v8948_v37  ;;  %537 = vst [vmem:[#allocation2 + $0x9a] sm:$0x3] %v8948_v37 }
 0x10c   :  { %v246_v25 = vadd.f32 %v245_v20, %v7154_v21  ;;  %542 = vst [vmem:[#allocation2 + $0xea] sm:$0x3] %v8948_v37  ;;  %543 = vst [vmem:[#allocation2 + $0xfa] sm:$0x3] %v8948_v37 }
 0x10d   :  { %544 = vst [vmem:[#allocation2 + $0x10a] sm:$0x3] %v8948_v37  ;;  %545 = vst [vmem:[#allocation2 + $0x11a] sm:$0x3] %v8948_v37 }
 0x10e   :  { %v247_v30 = vadd.f32 %v246_v25, %v7157_v24  ;;  %546 = vst [vmem:[#allocation2 + $0x12a] sm:$0x3] %v8948_v37  ;;  %547 = vst [vmem:[#allocation2 + $0x13a] sm:$0x3] %v8948_v37 }
 0x10f   :  { %548 = vst [vmem:[#allocation2 + $0x14a] sm:$0x3] %v8948_v37  ;;  %549 = vst [vmem:[#allocation2 + $0x15a] sm:$0x3] %v8948_v37 }
 0x110   :  { %v248_v27 = vadd.f32 %v247_v30, %v7161_v29  ;;  %504 = vst [vmem:[#allocation2] sm:$0x3] %v8948_v37  ;;  %505 = vst [vmem:[#allocation2 + $0x10] sm:$0x3] %v8948_v37  ;;  %v6589_v30 = vld [vmem:[#allocation4 + $0x1c0] sm:$0xff]  }
 0x111   :  { %528 = vst [vmem:[#allocation2 + $0xa] sm:$0x3] %v8948_v37  ;;  %529 = vst [vmem:[#allocation2 + $0x1a] sm:$0x3] %v8948_v37  ;;  %5818 = vmatprep.subr.bf16.mxu0 %v6589_v30 }
 0x112   :  { %514 = vst [vmem:[#allocation2 + $0xa0] sm:$0x3] %v8948_v37  ;;  %515 = vst [vmem:[#allocation2 + $0xb0] sm:$0x3] %v8948_v37  ;;  %v249_v41 = vrot.slane %v248_v27, 4 }
 0x113   :  { %516 = vst [vmem:[#allocation2 + $0xc0] sm:$0x3] %v8948_v37  ;;  %517 = vst [vmem:[#allocation2 + $0xd0] sm:$0x3] %v8948_v37 }
 0x114   :  { %526 = vst [vmem:[#allocation2 + $0x160] sm:$0x3] %v8948_v37  ;;  %527 = vst [vmem:[#allocation2 + $0x170] sm:$0x3] %v8948_v37  ;;  %v250_v44 = vadd.f32 %v249_v41, %v248_v27 }
 0x115   :  { %538 = vst [vmem:[#allocation2 + $0xaa] sm:$0x3] %v8948_v37  ;;  %539 = vst [vmem:[#allocation2 + $0xba] sm:$0x3] %v8948_v37 }
 0x116   :  { %540 = vst [vmem:[#allocation2 + $0xca] sm:$0x3] %v8948_v37  ;;  %541 = vst [vmem:[#allocation2 + $0xda] sm:$0x3] %v8948_v37  ;;  %v251_v49 = vrot.slane %v250_v44, 2 }
 0x117   :  { %550 = vst [vmem:[#allocation2 + $0x16a] sm:$0x3] %v8948_v37  ;;  %551 = vst [vmem:[#allocation2 + $0x17a] sm:$0x3] %v8948_v37  ;;  %v601_v53 = vld [vmem:[#allocation2 + $0x1] sm:$0xff]  ;;  %v7232_v54 = vld [vmem:[#allocation2 + $0x11] sm:$0xff] }
 0x118   :  { %v252_v55 = vadd.f32 %v251_v49, %v250_v44  ;;  %v617_v56 = vpack.c.bf16 %v7232_v54, %v601_v53  ;;  %v569_v59 = vld [vmem:[#allocation2] sm:$0xff]  ;;  %v7235_v60 = vld [vmem:[#allocation2 + $0x10] sm:$0xff]  ;;  %v6592_v44 = vld [vmem:[#allocation4 + $0x1c8] sm:$0xff]  }
 0x119   :  { %v585_v61 = vpack.c.bf16 %v7235_v60, %v569_v59  ;;  %v665_v62 = vld [vmem:[#allocation2 + $0x3] sm:$0xff]  ;;  %v666_v63 = vld [vmem:[#allocation2 + $0x13] sm:$0xff] }
 0x11a   :  { %v253_v0 = vrot.slane %v252_v55, 1  ;;  %3211 = vmatprep.mubr.bf16.mxu1 %v617_v56  ;;  %v681_v2 = vpack.c.bf16 %v666_v63, %v665_v62  ;;  %v6596_v62 = vld [vmem:[#allocation4 + $0x1d0] sm:$0xff]  }
 0x11b   :  { %3212 = vmatmul.mubr.bf16.vlgmr.msra.gmra.mrb[0].mxu1 %v585_v61  ;;  %v6595_v61 = vld [vmem:[#allocation4 + $0x128] sm:$0xff]   ;;  %v6597_v63 = vld [vmem:[#allocation4 + $0x190] sm:$0xff]  }
 0x11c   :  { %v254_v11 = vadd.f32 %v253_v0, %v252_v55  ;;  %3308 = vmatprep.mubr.bf16.mxu0 %v681_v2  ;;  %5755 = vmatpush3.bf16.msra.mxu1 %v6581_v9  ;;  %v6598_v0 = vld [vmem:[#allocation4 + $0x1d8] sm:$0xff]  }
 0x11d   :  { %3309 = vmatmul.mubr.bf16.vlgmr.msra.gmra.mrb[16].mxu0 %v649_v6  ;;  %5756 = vmatprep.subr.bf16.mxu1 %v6582_v10  ;;  %v6600_v6 = vld [vmem:[#allocation4 + $0x170] sm:$0xff]  }
 0x11e   :  { %v256_v12 = vmul.f32 0.0078125, %v254_v11  ;;  %5819 = vmatpush3.bf16.msra.mxu0 %v6591_v43 }
 0x11f   :  { %5820 = vmatprep.subr.bf16.mxu0 %v6592_v44 }
 0x120   :  { %v7242_v16 = vsub.f32 %v7102_v31, %v256_v12  ;;  %v7245_v17 = vsub.f32 %v7105_v32, %v256_v12  ;;  %v7248_v18 = vsub.f32 %v7108_v33, %v256_v12  ;;  %v7251_v19 = vsub.f32 %v7113_v35, %v256_v12  ;;  %5757 = vmatpush3.bf16.msra.mxu1 %v6583_v13 }
 0x121   :  { %v7254_v20 = vsub.f32 %v7117_v39, %v256_v12  ;;  %v7257_v22 = vsub.f32 %v7122_v45, %v256_v12  ;;  %v7260_v23 = vsub.f32 %v7125_v48, %v256_v12  ;;  %v7263_v31 = vsub.f32 %v7129_v52, %v256_v12  ;;  %v6585_v45 = vld [vmem:[#allocation4 + $0x110] sm:$0xff]   ;;  %5758 = vmatprep.subr.bf16.mxu1 %v6584_v15 }
 0x122   :  { %v7266_v32 = vsub.f32 %v7133_v58, %v256_v12  ;;  %v7269_v33 = vsub.f32 %v7138_v1, %v256_v12  ;;  %v7272_v35 = vsub.f32 %v7141_v4, %v256_v12  ;;  %v7275_v39 = vsub.f32 %v7145_v8, %v256_v12  ;;  %v6586_v4 = vld [vmem:[#allocation4 + $0x158] sm:$0xff]   ;;  %5821 = vmatpush3.bf16.msra.mxu0 %v6593_v50 }
 0x123   :  { %v7278_v48 = vsub.f32 %v7149_v14, %v256_v12  ;;  %v7281_v52 = vsub.f32 %v7154_v21, %v256_v12  ;;  %v7284_v58 = vsub.f32 %v7157_v24, %v256_v12  ;;  %v7287_v1 = vsub.f32 %v7161_v29, %v256_v12  ;;  %v6588_v24 = vld [vmem:[#allocation4 + $0x160] sm:$0xff]   ;;  %5822 = vmatprep.subr.bf16.mxu0 %v6596_v62 }
 0x124   :  { %v273_v8 = vmul.f32 %v7242_v16, %v7242_v16  ;;  %v274_v25 = vmul.f32 %v7245_v17, %v7245_v17  ;;  %5759 = vmatpush3.bf16.msra.mxu1 %v6585_v45  ;;  %v275_v14 = vmul.f32 %v7248_v18, %v7248_v18  ;;  %v276_v28 = vmul.f32 %v7251_v19, %v7251_v19  ;;  %v6601_v45 = vld [vmem:[#allocation4 + $0x130] sm:$0xff]  }
 0x125   :  { %5760 = vmatprep.subr.bf16.mxu1 %v6586_v4  ;;  %v277_v34 = vmul.f32 %v7254_v20, %v7254_v20  ;;  %v278_v27 = vmul.f32 %v7257_v22, %v7257_v22  ;;  %v279_v40 = vmul.f32 %v7260_v23, %v7260_v23  ;;  %v280_v47 = vmul.f32 %v7263_v31, %v7263_v31  ;;  %v6602_v4 = vld [vmem:[#allocation4 + $0x1e0] sm:$0xff]  }
 0x126   :  { %v289_v21 = vadd.f32 %v274_v25, %v273_v8  ;;  %v281_v51 = vmul.f32 %v7266_v32, %v7266_v32  ;;  %v282_v55 = vmul.f32 %v7269_v33, %v7269_v33  ;;  %v283_v57 = vmul.f32 %v7272_v35, %v7272_v35  ;;  %5823 = vmatpush3.bf16.msra.mxu0 %v6597_v63  ;;  %v6603_v8 = vld [vmem:[#allocation4 + $0x1a0] sm:$0xff]   ;;  %v6604_v25 = vld [vmem:[#allocation4 + $0x1e8] sm:$0xff]  }
 0x127   :  { %v284_v2 = vmul.f32 %v7275_v39, %v7275_v39  ;;  %v285_v9 = vmul.f32 %v7278_v48, %v7278_v48  ;;  %5824 = vmatprep.subr.bf16.mxu0 %v6598_v0  ;;  %v286_v11 = vmul.f32 %v7281_v52, %v7281_v52  ;;  %v287_v13 = vmul.f32 %v7284_v58, %v7284_v58  ;;  %v5364_v63 = vld [vmem:[%s8935_s3] ss:$0 sm:$0xff] }
 0x128   :  { %v290_v29 = vadd.f32 %v289_v21, %v275_v14  ;;  %5761 = vmatpush3.bf16.msra.mxu1 %v6587_v26  ;;  %v288_v14 = vmul.f32 %v7287_v1, %v7287_v1  ;;  %v6606_v26 = vld [vmem:[#allocation4 + $0x178] sm:$0xff]  }
 0x129   :  { %5762 = vmatprep.subr.bf16.mxu1 %v6588_v24  ;;  %v6605_v24 = vld [vmem:[#allocation4 + $0x1a8] sm:$0xff]  }
 0x12a   :  { %v291_v36 = vadd.f32 %v290_v29, %v276_v28  ;;  %5825 = vmatpush3.bf16.msra.mxu0 %v6599_v7 }
 0x12b   :  { %5826 = vmatprep.subr.bf16.mxu0 %v6602_v4 }
 0x12c   :  { %v292_v38 = vadd.f32 %v291_v36, %v277_v34  ;;  %5763 = vmatpush3.bf16.msra.mxu1 %v6590_v42  ;;  %v6607_v34 = vld [vmem:[#allocation4 + $0x138] sm:$0xff]   ;;  %v6608_v36 = vld [vmem:[#allocation4 + $0x1f0] sm:$0xff]  }
 0x12d   :  { %5764 = vmatprep.subr.bf16.mxu1 %v6594_v46  ;;  %v6611_v42 = vld [vmem:[#allocation4 + $0x1b8] sm:$0xff]  }
 0x12e   :  { %v293_v41 = vadd.f32 %v292_v38, %v278_v27  ;;  %5827 = vmatpush3.bf16.msra.mxu0 %v6603_v8  ;;  %v6609_v27 = vld [vmem:[#allocation4 + $0x1b0] sm:$0xff]   ;;  %v6610_v38 = vld [vmem:[#allocation4 + $0x1f8] sm:$0xff]  }
 0x12f   :  { %5828 = vmatprep.subr.bf16.mxu0 %v6604_v25 }
 0x130   :  { %v294_v49 = vadd.f32 %v293_v41, %v279_v40  ;;  %5765 = vmatpush3.bf16.msra.mxu1 %v6595_v61  ;;  %v6612_v41 = vld [vmem:[#allocation4 + $0x240] sm:$0xff]  }
 0x131   :  { %5766 = vmatprep.subr.bf16.mxu1 %v6600_v6 }
 0x132   :  { %v295_v53 = vadd.f32 %v294_v49, %v280_v47  ;;  %5829 = vmatpush3.bf16.msra.mxu0 %v6605_v24 }
 0x133   :  { %5830 = vmatprep.subr.bf16.mxu0 %v6608_v36 }
 0x134   :  { %v296_v56 = vadd.f32 %v295_v53, %v281_v51  ;;  %5767 = vmatpush3.bf16.msra.mxu1 %v6601_v45 }
 0x135   :  { %5768 = vmatprep.subr.bf16.mxu1 %v6606_v26 }
 0x136   :  { %v297_v59 = vadd.f32 %v296_v56, %v282_v55  ;;  %5831 = vmatpush3.bf16.msra.mxu0 %v6609_v27 }
 0x137   :  { %5832 = vmatprep.subr.bf16.mxu0 %v6610_v38 }
 0x138   :  { %v298_v3 = vadd.f32 %v297_v59, %v283_v57  ;;  %5769 = vmatpush3.bf16.msra.mxu1 %v6607_v34 }
 0x139   :  { %5882 = vmatprep.subr.bf16.mxu1 %v6612_v41 }
 0x13a   :  { %v299_v10 = vadd.f32 %v298_v3, %v284_v2  ;;  %5833 = vmatpush3.bf16.msra.mxu0 %v6611_v42 }
 0x13c   :  { %v300_v12 = vadd.f32 %v299_v10, %v285_v9 }
 0x13e   :  { %v301_v15 = vadd.f32 %v300_v12, %v286_v11 }
 0x140   :  { %v302_v21 = vadd.f32 %v301_v15, %v287_v13 }
 0x142   :  { %v303_v28 = vadd.f32 %v302_v21, %v288_v14 }
 0x144   :  { %v304_v29 = vrot.slane %v303_v28, 4 }
 0x146   :  { %v305_v30 = vadd.f32 %v304_v29, %v303_v28 }
 0x148   :  { %v306_v40 = vrot.slane %v305_v30, 2 }
 0x14a   :  { %v307_v43 = vadd.f32 %v306_v40, %v305_v30 }
 0x14c   :  { %v308_v44 = vrot.slane %v307_v43, 1 }
 0x14e   :  { %v309_v46 = vadd.f32 %v308_v44, %v307_v43 }
 0x150   :  { %v310_v47 = vmul.f32 0.0078125, %v309_v46 }
 0x152   :  { %v311_v49 = vadd.f32 1e-05, %v310_v47 }
 0x154   :  { %6756 = vrsqrt.f32 %v311_v49 }
 0x15e   :  { %v6757_v50 = vpop.eup %6756 }
 0x15f   :  { %v313_v51 = vmul.f32 %v6757_v50, %v7242_v16  ;;  %v314_v53 = vmul.f32 %v6757_v50, %v7245_v17  ;;  %v315_v55 = vmul.f32 %v6757_v50, %v7248_v18  ;;  %v316_v56 = vmul.f32 %v6757_v50, %v7251_v19 }
 0x160   :  { %v317_v57 = vmul.f32 %v6757_v50, %v7254_v20  ;;  %v318_v59 = vmul.f32 %v6757_v50, %v7257_v22  ;;  %v319_v61 = vmul.f32 %v6757_v50, %v7260_v23  ;;  %v320_v62 = vmul.f32 %v6757_v50, %v7263_v31 }
 0x161   :  { %v321_v16 = vmul.f32 %v6757_v50, %v7266_v32  ;;  %v322_v17 = vmul.f32 %v6757_v50, %v7269_v33  ;;  %v323_v18 = vmul.f32 %v6757_v50, %v7272_v35  ;;  %v324_v19 = vmul.f32 %v6757_v50, %v7275_v39  ;;  %v5365_v32 = vld [vmem:[%s8936_s4] ss:$0 sm:$0xff] }
 0x162   :  { %v325_v20 = vmul.f32 %v6757_v50, %v7278_v48  ;;  %v326_v22 = vmul.f32 %v6757_v50, %v7281_v52  ;;  %v327_v23 = vmul.f32 %v6757_v50, %v7284_v58  ;;  %v328_v31 = vmul.f32 %v6757_v50, %v7287_v1  ;;  %v6621_v58 = vld [vmem:[#allocation4 + $0x2c0] sm:$0xff]  }
 0x163   :  { %v336_v0 = vmul.f32 %v5364_v63, %v313_v51  ;;  %v337_v2 = vmul.f32 %v5364_v63, %v314_v53  ;;  %v338_v3 = vmul.f32 %v5364_v63, %v315_v55  ;;  %v339_v6 = vmul.f32 %v5364_v63, %v316_v56  ;;  %5946 = vmatprep.subr.bf16.mxu0 %v6621_v58 }
 0x164   :  { %v340_v33 = vmul.f32 %v5364_v63, %v317_v57  ;;  %v341_v35 = vmul.f32 %v5364_v63, %v318_v59  ;;  %v342_v7 = vmul.f32 %v5364_v63, %v319_v61  ;;  %v343_v9 = vmul.f32 %v5364_v63, %v320_v62 }
 0x165   :  { %v7343_v39 = vadd.f32 %v5365_v32, %v336_v0  ;;  %v7345_v48 = vadd.f32 %v5365_v32, %v337_v2  ;;  %v7347_v52 = vadd.f32 %v5365_v32, %v338_v3  ;;  %v7349_v1 = vadd.f32 %v5365_v32, %v339_v6 }
 0x166   :  { %v344_v10 = vmul.f32 %v5364_v63, %v321_v16  ;;  %v7351_v11 = vadd.f32 %v5365_v32, %v340_v33  ;;  %v345_v12 = vmul.f32 %v5364_v63, %v322_v17  ;;  %v346_v13 = vmul.f32 %v5364_v63, %v323_v18 }
 0x167   :  { %v7353_v15 = vadd.f32 %v5365_v32, %v341_v35  ;;  %v7355_v45 = vadd.f32 %v5365_v32, %v342_v7  ;;  %v5366_v4 = vmul.f32 -1.442695, %v7343_v39  ;;  %v5367_v8 = vmul.f32 -1.442695, %v7345_v48 }
 0x168   :  { %v5368_v25 = vmul.f32 -1.442695, %v7347_v52  ;;  %v347_v14 = vmul.f32 %v5364_v63, %v324_v19  ;;  %v7360_v21 = vadd.f32 %v5365_v32, %v343_v9  ;;  %v5369_v26 = vmul.f32 -1.442695, %v7349_v1 }
 0x169   :  { %v348_v24 = vmul.f32 %v5364_v63, %v325_v20  ;;  %v7363_v28 = vadd.f32 %v5365_v32, %v344_v10  ;;  %6758 = vpow2.f32 %v5366_v4  ;;  %v5370_v29 = vmul.f32 -1.442695, %v7351_v11 }
 0x16a   :  { %v349_v30 = vmul.f32 %v5364_v63, %v326_v22  ;;  %v7366_v34 = vadd.f32 %v5365_v32, %v345_v12  ;;  %6760 = vpow2.f32 %v5367_v8  ;;  %v5371_v36 = vmul.f32 -1.442695, %v7353_v15 }
 0x16b   :  { %v350_v27 = vmul.f32 %v5364_v63, %v327_v23  ;;  %v7369_v38 = vadd.f32 %v5365_v32, %v346_v13  ;;  %6762 = vpow2.f32 %v5368_v25  ;;  %v5372_v40 = vmul.f32 -1.442695, %v7355_v45 }
 0x16c   :  { %v351_v41 = vmul.f32 %v5364_v63, %v328_v31  ;;  %v7372_v42 = vadd.f32 %v5365_v32, %v347_v14  ;;  %6764 = vpow2.f32 %v5369_v26  ;;  %v5373_v43 = vmul.f32 -1.442695, %v7360_v21 }
 0x16d   :  { %v7375_v44 = vadd.f32 %v5365_v32, %v348_v24  ;;  %6766 = vpow2.f32 %v5370_v29  ;;  %v5374_v46 = vmul.f32 -1.442695, %v7363_v28  ;;  %v7378_v47 = vadd.f32 %v5365_v32, %v349_v30 }
 0x16e   :  { %6768 = vpow2.f32 %v5371_v36  ;;  %v5375_v49 = vmul.f32 -1.442695, %v7366_v34  ;;  %v7381_v50 = vadd.f32 %v5365_v32, %v350_v27  ;;  %v5376_v51 = vmul.f32 -1.442695, %v7369_v38 }
 0x16f   :  { %6770 = vpow2.f32 %v5372_v40  ;;  %v7384_v53 = vadd.f32 %v5365_v32, %v351_v41  ;;  %v5377_v55 = vmul.f32 -1.442695, %v7372_v42  ;;  %v5378_v56 = vmul.f32 -1.442695, %v7375_v44 }
 0x170   :  { %6772 = vpow2.f32 %v5373_v43  ;;  %v5379_v57 = vmul.f32 -1.442695, %v7378_v47  ;;  %v5380_v61 = vmul.f32 -1.442695, %v7381_v50 }
 0x171   :  { %6774 = vpow2.f32 %v5374_v46  ;;  %v5381_v63 = vmul.f32 -1.442695, %v7384_v53 }
 0x172   :  { %6776 = vpow2.f32 %v5375_v49 }
 0x173   :  { %v6759_v59 = vpop.eup %6758  ;;  %6778 = vpow2.f32 %v5376_v51 }
 0x174   :  { %v6761_v62 = vpop.eup %6760  ;;  %6780 = vpow2.f32 %v5377_v55  ;;  %v423_v17 = vadd.f32 1.0, %v6759_v59 }
 0x175   :  { %v6763_v16 = vpop.eup %6762  ;;  %6782 = vpow2.f32 %v5378_v56  ;;  %v424_v19 = vadd.f32 1.0, %v6761_v62 }
 0x176   :  { %v6765_v18 = vpop.eup %6764  ;;  %6784 = vpow2.f32 %v5379_v57  ;;  %v425_v22 = vadd.f32 1.0, %v6763_v16 }
 0x177   :  { %v6767_v20 = vpop.eup %6766  ;;  %6786 = vpow2.f32 %v5380_v61  ;;  %v426_v31 = vadd.f32 1.0, %v6765_v18 }
 0x178   :  { %v6769_v23 = vpop.eup %6768  ;;  %6788 = vpow2.f32 %v5381_v63  ;;  %v427_v2 = vadd.f32 1.0, %v6767_v20 }
 0x179   :  { %v6771_v0 = vpop.eup %6770  ;;  %6790 = vrcp.f32 %v423_v17  ;;  %v428_v6 = vadd.f32 1.0, %v6769_v23 }
 0x17a   :  { %v6773_v3 = vpop.eup %6772  ;;  %6792 = vrcp.f32 %v424_v19  ;;  %v429_v33 = vadd.f32 1.0, %v6771_v0 }
 0x17b   :  { %v6775_v32 = vpop.eup %6774  ;;  %6794 = vrcp.f32 %v425_v22  ;;  %v430_v7 = vadd.f32 1.0, %v6773_v3 }
 0x17c   :  { %v6777_v35 = vpop.eup %6776  ;;  %6796 = vrcp.f32 %v426_v31  ;;  %v431_v9 = vadd.f32 1.0, %v6775_v32 }
 0x17d   :  { %v6779_v58 = vpop.eup %6778  ;;  %6798 = vrcp.f32 %v427_v2  ;;  %v432_v12 = vadd.f32 1.0, %v6777_v35 }
 0x17e   :  { %v6781_v10 = vpop.eup %6780  ;;  %6800 = vrcp.f32 %v428_v6  ;;  %v433_v4 = vadd.f32 1.0, %v6779_v58 }
 0x17f   :  { %v6783_v13 = vpop.eup %6782  ;;  %6802 = vrcp.f32 %v429_v33  ;;  %v434_v25 = vadd.f32 1.0, %v6781_v10 }
 0x180   :  { %v6785_v8 = vpop.eup %6784  ;;  %6804 = vrcp.f32 %v430_v7  ;;  %v435_v26 = vadd.f32 1.0, %v6783_v13 }
 0x181   :  { %v6787_v14 = vpop.eup %6786  ;;  %6806 = vrcp.f32 %v431_v9  ;;  %v436_v29 = vadd.f32 1.0, %v6785_v8 }
 0x182   :  { %v6789_v24 = vpop.eup %6788  ;;  %6808 = vrcp.f32 %v432_v12  ;;  %v437_v36 = vadd.f32 1.0, %v6787_v14 }
 0x183   :  { %v6791_v30 = vpop.eup %6790  ;;  %6810 = vrcp.f32 %v433_v4  ;;  %v438_v40 = vadd.f32 1.0, %v6789_v24 }
 0x184   :  { %v6793_v27 = vpop.eup %6792  ;;  %6812 = vrcp.f32 %v434_v25  ;;  %v7392_v41 = vmul.f32 %v6791_v30, %v7343_v39 }
 0x185   :  { %v6795_v43 = vpop.eup %6794  ;;  %6814 = vrcp.f32 %v435_v26  ;;  %v7395_v46 = vmul.f32 %v6793_v27, %v7345_v48 }
 0x186   :  { %v6797_v49 = vpop.eup %6796  ;;  %6816 = vrcp.f32 %v436_v29  ;;  %553 = vst [vmem:[#allocation2 + $0x22] sm:$0xff] %v7392_v41  ;;  %v7399_v51 = vmul.f32 %v6795_v43, %v7347_v52  ;;  %v810_v37 = vpack.c.bf16 %v7392_v41, %v7238_v5 }
 0x187   :  { %v6799_v55 = vpop.eup %6798  ;;  %6818 = vrcp.f32 %v437_v36  ;;  %v7402_v56 = vmul.f32 %v6797_v49, %v7349_v1  ;;  %554 = vst [vmem:[#allocation2 + $0x32] sm:$0xff] %v7395_v46  ;;  %v650_v39 = vpack.c.bf16 %v7395_v46, %v7392_v41  ;;  %v6623_v41 = vld [vmem:[#allocation4 + $0x280] sm:$0xff]  }
 0x188   :  { %v6801_v57 = vpop.eup %6800  ;;  %6820 = vrcp.f32 %v438_v40  ;;  %v7408_v48 = vmul.f32 %v6799_v55, %v7351_v11  ;;  %555 = vst [vmem:[#allocation2 + $0x42] sm:$0xff] %v7399_v51  ;;  %v811_v52 = vpack.c.bf16 %v7399_v51, %v7395_v46  ;;  %v609_v55 = vld [vmem:[#allocation2 + $0xc1] sm:$0xff]  ;;  %v6617_v46 = vld [vmem:[#allocation4 + $0x210] sm:$0xff]  }
 0x189   :  { %v6803_v59 = vpop.eup %6802  ;;  %v7414_v61 = vmul.f32 %v6801_v57, %v7353_v15  ;;  %556 = vst [vmem:[#allocation2 + $0x52] sm:$0xff] %v7402_v56  ;;  %v651_v1 = vpack.c.bf16 %v7402_v56, %v7399_v51  ;;  %v674_v57 = vld [vmem:[#allocation2 + $0xd3] sm:$0xff] }
 0x18a   :  { %v6805_v62 = vpop.eup %6804  ;;  %v477_v63 = vmul.f32 %v6803_v59, %v7355_v45  ;;  %557 = vst [vmem:[#allocation2 + $0x62] sm:$0xff] %v7408_v48  ;;  %v812_v11 = vpack.c.bf16 %v7408_v48, %v7402_v56  ;;  %v6628_v51 = vld [vmem:[#allocation4 + $0x2d0] sm:$0xff]  }
 0x18b   :  { %v6807_v16 = vpop.eup %6806  ;;  %v478_v17 = vmul.f32 %v6805_v62, %v7360_v21  ;;  %558 = vst [vmem:[#allocation2 + $0x72] sm:$0xff] %v7414_v61  ;;  %v652_v15 = vpack.c.bf16 %v7414_v61, %v7408_v48 }
 0x18c   :  { %v6809_v18 = vpop.eup %6808  ;;  %v7428_v19 = vmul.f32 %v6807_v16, %v7363_v28  ;;  %559 = vst [vmem:[#allocation2 + $0x82] sm:$0xff] %v477_v63  ;;  %v7520_v63 = vld [vmem:[#allocation2 + $0xd1] sm:$0xff] }
 0x18d   :  { %v6811_v20 = vpop.eup %6810  ;;  %v7431_v45 = vmul.f32 %v6809_v18, %v7366_v34  ;;  %560 = vst [vmem:[#allocation2 + $0x92] sm:$0xff] %v478_v17  ;;  %v7433_v22 = vld [vmem:[#allocation2 + $0x21] sm:$0xff]  ;;  %v621_v16 = vpack.c.bf16 %v7520_v63, %v609_v55 }
 0x18e   :  { %v7435_v23 = vld [vmem:[#allocation2 + $0x23] sm:$0xff]  ;;  %v6813_v31 = vpop.eup %6812  ;;  %v7440_v0 = vmul.f32 %v6811_v20, %v7369_v38  ;;  %561 = vst [vmem:[#allocation2 + $0xe2] sm:$0xff] %v7428_v19  ;;  %v7443_v28 = vld [vmem:[#allocation2 + $0x31] sm:$0xff] }
 0x18f   :  { %v7437_v21 = vld [vmem:[#allocation2 + $0x20] sm:$0xff]  ;;  %v668_v2 = vld [vmem:[#allocation2 + $0x33] sm:$0xff]  ;;  %v6815_v34 = vpop.eup %6814  ;;  %v7448_v6 = vmul.f32 %v6813_v31, %v7372_v42  ;;  %562 = vst [vmem:[#allocation2 + $0xf2] sm:$0xff] %v7431_v45  ;;  %v7453_v32 = vpack.c.bf16 %v7443_v28, %v7433_v22  ;;  %v654_v12 = vpack.c.bf16 %v7431_v45, %v7428_v19 }
 0x190   :  { %v7445_v3 = vld [vmem:[#allocation2 + $0x30] sm:$0xff]  ;;  %v682_v38 = vpack.c.bf16 %v668_v2, %v7435_v23  ;;  %v7460_v35 = vld [vmem:[#allocation2 + $0x41] sm:$0xff]  ;;  %v6817_v58 = vpop.eup %6816  ;;  %v7465_v42 = vmul.f32 %v6815_v34, %v7375_v44  ;;  %563 = vst [vmem:[#allocation2 + $0x102] sm:$0xff] %v7440_v0 }
 0x191   :  { %v7458_v33 = vpack.c.bf16 %v7445_v3, %v7437_v21  ;;  %v7462_v7 = vld [vmem:[#allocation2 + $0x43] sm:$0xff]  ;;  %v7468_v9 = vld [vmem:[#allocation2 + $0x51] sm:$0xff]  ;;  %v6819_v13 = vpop.eup %6818  ;;  %v7473_v4 = vmul.f32 %v6817_v58, %v7378_v47  ;;  %564 = vst [vmem:[#allocation2 + $0x112] sm:$0xff] %v7448_v6  ;;  %3219 = vmatprep.mubr.bf16.mxu1 %v7453_v32  ;;  %v655_v47 = vpack.c.bf16 %v7448_v6, %v7440_v0 }
 0x192   :  { %v670_v10 = vld [vmem:[#allocation2 + $0x53] sm:$0xff]  ;;  %3316 = vmatprep.mubr.bf16.mxu0 %v682_v38  ;;  %v7479_v44 = vpack.c.bf16 %v7468_v9, %v7460_v35  ;;  %v6821_v25 = vpop.eup %6820  ;;  %v485_v14 = vmul.f32 %v6819_v13, %v7381_v50  ;;  %565 = vst [vmem:[#allocation2 + $0x122] sm:$0xff] %v7465_v42  ;;  %v7492_v50 = vld [vmem:[#allocation2 + $0x40] sm:$0xff] }
 0x193   :  { %v683_v8 = vpack.c.bf16 %v670_v10, %v7462_v7  ;;  %3220 = vmatmul.mubr.bf16.gmra.mrb[4].mxu1 %v7458_v33  ;;  %3317 = vmatmul.mubr.bf16.gmra.mrb[20].mxu0 %v650_v39  ;;  %v486_v26 = vmul.f32 %v6821_v25, %v7384_v53  ;;  %566 = vst [vmem:[#allocation2 + $0x132] sm:$0xff] %v7473_v4  ;;  %v7494_v29 = vld [vmem:[#allocation2 + $0x50] sm:$0xff]  ;;  %v7496_v30 = vld [vmem:[#allocation2 + $0x61] sm:$0xff] }
 0x194   :  { %3227 = vmatprep.mubr.bf16.mxu1 %v7479_v44  ;;  %567 = vst [vmem:[#allocation2 + $0x142] sm:$0xff] %v485_v14  ;;  %v656_v24 = vpack.c.bf16 %v7473_v4, %v7465_v42  ;;  %v7498_v36 = vld [vmem:[#allocation2 + $0x71] sm:$0xff]  ;;  %v7500_v27 = vld [vmem:[#allocation2 + $0x63] sm:$0xff]  ;;  %v7504_v40 = vpack.c.bf16 %v7494_v29, %v7492_v50  ;;  %v747_v5 = vpack.c.bf16 %v7492_v50, %v7445_v3 }
 0x195   :  { %3324 = vmatprep.mubr.bf16.mxu0 %v683_v8  ;;  %568 = vst [vmem:[#allocation2 + $0x152] sm:$0xff] %v486_v26  ;;  %v672_v53 = vld [vmem:[#allocation2 + $0x73] sm:$0xff]  ;;  %v7508_v43 = vpack.c.bf16 %v7498_v36, %v7496_v30  ;;  %v673_v39 = vld [vmem:[#allocation2 + $0xc3] sm:$0xff]  ;;  %v779_v50 = vpack.c.bf16 %v7460_v35, %v7443_v28  ;;  %v780_v48 = vpack.c.bf16 %v7496_v30, %v7468_v9 }
 0x196   :  { %v684_v49 = vpack.c.bf16 %v672_v53, %v7500_v27  ;;  %v7516_v59 = vld [vmem:[#allocation2 + $0x60] sm:$0xff]  ;;  %v7518_v62 = vld [vmem:[#allocation2 + $0x70] sm:$0xff]  ;;  %v685_v17 = vpack.c.bf16 %v674_v57, %v673_v39  ;;  %v6624_v42 = vld [vmem:[#allocation4 + $0x2c8] sm:$0xff]  }
 0x197   :  { %v7525_v18 = vpack.c.bf16 %v7518_v62, %v7516_v59  ;;  %v641_v20 = vld [vmem:[#allocation2 + $0xc2] sm:$0xff]  ;;  %v7531_v31 = vld [vmem:[#allocation2 + $0xd0] sm:$0xff]  ;;  %v6619_v28 = vld [vmem:[#allocation4 + $0x218] sm:$0xff]  }
 0x198   :  { %v7533_v2 = vld [vmem:[#allocation2 + $0xd2] sm:$0xff]  ;;  %v7535_v34 = vld [vmem:[#allocation2 + $0xe1] sm:$0xff] }
 0x199   :  { %v653_v58 = vpack.c.bf16 %v7533_v2, %v641_v20  ;;  %v7539_v10 = vld [vmem:[#allocation2 + $0xf1] sm:$0xff]  ;;  %v7541_v13 = vld [vmem:[#allocation2 + $0xe3] sm:$0xff] }
 0x19a   :  { %v676_v61 = vld [vmem:[#allocation2 + $0xf3] sm:$0xff]  ;;  %v7549_v25 = vld [vmem:[#allocation2 + $0xe0] sm:$0xff]  ;;  %v6627_v9 = vld [vmem:[#allocation4 + $0x228] sm:$0xff]  }
 0x19b   :  { %3228 = vmatmul.mubr.bf16.gmra.mrb[8].mxu1 %v7504_v40  ;;  %3325 = vmatmul.mubr.bf16.gmra.mrb[24].mxu0 %v651_v1  ;;  %v577_v1 = vld [vmem:[#allocation2 + $0xc0] sm:$0xff]  ;;  %v686_v8 = vpack.c.bf16 %v676_v61, %v7541_v13  ;;  %v7551_v14 = vld [vmem:[#allocation2 + $0xf0] sm:$0xff] }
 0x19c   :  { %3235 = vmatprep.mubr.bf16.mxu1 %v7508_v43  ;;  %3332 = vmatprep.mubr.bf16.mxu0 %v684_v49  ;;  %v589_v38 = vpack.c.bf16 %v7531_v31, %v577_v1  ;;  %v7553_v26 = vld [vmem:[#allocation2 + $0x101] sm:$0xff]  ;;  %v7555_v53 = vld [vmem:[#allocation2 + $0x111] sm:$0xff]  ;;  %v7561_v39 = vpack.c.bf16 %v7551_v14, %v7549_v25 }
 0x19d   :  { %v7557_v49 = vld [vmem:[#allocation2 + $0x103] sm:$0xff]  ;;  %v678_v55 = vld [vmem:[#allocation2 + $0x113] sm:$0xff]  ;;  %v7565_v57 = vpack.c.bf16 %v7555_v53, %v7553_v26 }
 0x19e   :  { %v7575_v1 = vld [vmem:[#allocation2 + $0x110] sm:$0xff]  ;;  %v7577_v20 = vld [vmem:[#allocation2 + $0x121] sm:$0xff] }
 0x19f   :  { %v680_v61 = vld [vmem:[#allocation2 + $0x133] sm:$0xff]  ;;  %v697_v0 = vld [vmem:[#allocation2 + $0x4] sm:$0xff] }
 0x1a0   :  { %v7613_v6 = vld [vmem:[#allocation2 + $0x14] sm:$0xff]  ;;  %v6620_v35 = vld [vmem:[#allocation4 + $0x260] sm:$0xff]  }
 0x1a1   :  { %v6616_v4 = vld [vmem:[#allocation4 + $0x250] sm:$0xff]  }
 0x1a2   :  { %v6632_v30 = vld [vmem:[#allocation4 + $0x270] sm:$0xff]  }
 0x1a3   :  { %3236 = vmatmul.mubr.bf16.gmra.mrb[12].mxu1 %v7525_v18  ;;  %3333 = vmatmul.mubr.bf16.gmra.mrb[28].mxu0 %v652_v15  ;;  %v7545_v15 = vpack.c.bf16 %v7539_v10, %v7535_v34 }
 0x1a4   :  { %3243 = vmatprep.mubr.bf16.mxu1 %v621_v16  ;;  %3340 = vmatprep.mubr.bf16.mxu0 %v685_v17  ;;  %v687_v16 = vpack.c.bf16 %v678_v55, %v7557_v49  ;;  %v7573_v17 = vld [vmem:[#allocation2 + $0x100] sm:$0xff]  ;;  %v7599_v55 = vld [vmem:[#allocation2 + $0x130] sm:$0xff] }
 0x1ab   :  { %3244 = vmatmul.mubr.bf16.gmra.mrb[16].mxu1 %v589_v38  ;;  %3341 = vmatmul.mubr.bf16.gmra.mrb[32].mxu0 %v653_v58  ;;  %v7579_v38 = vld [vmem:[#allocation2 + $0x131] sm:$0xff]  ;;  %v7581_v58 = vld [vmem:[#allocation2 + $0x123] sm:$0xff] }
 0x1ac   :  { %3251 = vmatprep.mubr.bf16.mxu1 %v7545_v15  ;;  %3348 = vmatprep.mubr.bf16.mxu0 %v686_v8  ;;  %v7585_v8 = vpack.c.bf16 %v7575_v1, %v7573_v17  ;;  %v7589_v19 = vpack.c.bf16 %v7579_v38, %v7577_v20  ;;  %v688_v45 = vpack.c.bf16 %v680_v61, %v7581_v58 }
 0x1ad   :  { %v746_v61 = vpack.c.bf16 %v7437_v21, %v7235_v60  ;;  %v778_v60 = vpack.c.bf16 %v7433_v22, %v7232_v54  ;;  %v6614_v21 = vld [vmem:[#allocation4 + $0x248] sm:$0xff]   ;;  %v7625_v54 = vld [vmem:[#allocation2 + $0x34] sm:$0xff] }
 0x1ae   :  { %v6625_v22 = vld [vmem:[#allocation4 + $0x288] sm:$0xff]  }
 0x1b3   :  { %3252 = vmatmul.mubr.bf16.gmra.mrb[20].mxu1 %v7561_v39  ;;  %3349 = vmatmul.mubr.bf16.gmra.mrb[36].mxu0 %v654_v12  ;;  %v7597_v12 = vld [vmem:[#allocation2 + $0x120] sm:$0xff] }
 0x1b4   :  { %3259 = vmatprep.mubr.bf16.mxu1 %v7565_v57  ;;  %3356 = vmatprep.mubr.bf16.mxu0 %v687_v16  ;;  %v7603_v16 = vpack.c.bf16 %v7599_v55, %v7597_v12 }
 0x1bb   :  { %3260 = vmatmul.mubr.bf16.gmra.mrb[24].mxu1 %v7585_v8  ;;  %3357 = vmatmul.mubr.bf16.gmra.mrb[40].mxu0 %v655_v47  ;;  %v713_v47 = vpack.c.bf16 %v7613_v6, %v697_v0  ;;  %v6629_v0 = vld [vmem:[#allocation4 + $0x290] sm:$0xff]  }
 0x1bc   :  { %3267 = vmatprep.mubr.bf16.mxu1 %v7589_v19  ;;  %3364 = vmatprep.mubr.bf16.mxu0 %v688_v45  ;;  %v6613_v45 = vld [vmem:[#allocation4 + $0x200] sm:$0xff]  }
 0x1c3   :  { %3268 = vmatmul.mubr.bf16.gmra.mrb[28].mxu1 %v7603_v16  ;;  %3365 = vmatmul.mubr.bf16.gmra.mrb[44].mxu0 %v656_v24  ;;  %v7623_v24 = vld [vmem:[#allocation2 + $0x24] sm:$0xff] }
 0x1c4   :  { %3405 = vmatprep.mubr.bf16.mxu1 %v746_v61  ;;  %3502 = vmatprep.mubr.bf16.mxu0 %v810_v37  ;;  %v6615_v37 = vld [vmem:[#allocation4 + $0x208] sm:$0xff]   ;;  %v7629_v3 = vpack.c.bf16 %v7625_v54, %v7623_v24  ;;  %v6618_v61 = vld [vmem:[#allocation4 + $0x258] sm:$0xff]  }
 0x1cb   :  { %3406 = vmatmul.mubr.bf16.vlgmr.msra.gmra.mrb[32].mxu1 %v713_v47  ;;  %3503 = vmatmul.mubr.bf16.vlgmr.msra.gmra.mrb[48].mxu0 %v778_v60  ;;  %v6630_v47 = vld [vmem:[#allocation4 + $0x2d8] sm:$0xff]  }
 0x1cc   :  { %5883 = vmatpush3.bf16.msra.mxu1 %v6613_v45  ;;  %3413 = vmatprep.mubr.bf16.mxu1 %v747_v5  ;;  %v7639_v45 = vld [vmem:[#allocation2 + $0x44] sm:$0xff]  ;;  %v7641_v60 = vld [vmem:[#allocation2 + $0x54] sm:$0xff] }
 0x1cd   :  { %3510 = vmatprep.mubr.bf16.mxu0 %v811_v52  ;;  %5884 = vmatprep.subr.bf16.mxu1 %v6614_v21  ;;  %v748_v52 = vpack.c.bf16 %v7516_v59, %v7494_v29  ;;  %v6631_v29 = vld [vmem:[#allocation4 + $0x298] sm:$0xff]   ;;  %v7643_v59 = vld [vmem:[#allocation2 + $0x80] sm:$0xff]  ;;  %v7649_v56 = vpack.c.bf16 %v7641_v60, %v7639_v45 }
 0x1ce   :  { %5947 = vmatpush3.bf16.msra.mxu0 %v6623_v41  ;;  %v7645_v21 = vld [vmem:[#allocation2 + $0x72] sm:$0xff]  ;;  %v801_v5 = vld [vmem:[#allocation2 + $0x82] sm:$0xff] }
 0x1cf   :  { %5948 = vmatprep.subr.bf16.mxu0 %v6624_v42  ;;  %v6634_v41 = vld [vmem:[#allocation4 + $0x2e0] sm:$0xff]   ;;  %v749_v42 = vpack.c.bf16 %v7643_v59, %v7518_v62  ;;  %v7659_v62 = vld [vmem:[#allocation2 + $0x74] sm:$0xff] }
 0x1d0   :  { %5885 = vmatpush3.bf16.msra.mxu1 %v6615_v37  ;;  %v813_v37 = vpack.c.bf16 %v801_v5, %v7645_v21 }
 0x1d1   :  { %5886 = vmatprep.subr.bf16.mxu1 %v6616_v4  ;;  %v6626_v4 = vld [vmem:[#allocation4 + $0x268] sm:$0xff]  }
 0x1d2   :  { %5949 = vmatpush3.bf16.msra.mxu0 %v6625_v22  ;;  %v6635_v22 = vld [vmem:[#allocation4 + $0x2a0] sm:$0xff]  }
 0x1d3   :  { %3414 = vmatmul.mubr.bf16.gmra.mrb[36].mxu1 %v7629_v3  ;;  %3511 = vmatmul.mubr.bf16.gmra.mrb[52].mxu0 %v779_v50  ;;  %v6636_v50 = vld [vmem:[#allocation4 + $0x2e8] sm:$0xff]  }
 0x1d4   :  { %3421 = vmatprep.mubr.bf16.mxu1 %v748_v52  ;;  %3518 = vmatprep.mubr.bf16.mxu0 %v812_v11  ;;  %v6622_v11 = vld [vmem:[#allocation4 + $0x220] sm:$0xff]  }
 0x1d5   :  { %5887 = vmatpush3.bf16.msra.mxu1 %v6617_v46  ;;  %5950 = vmatprep.subr.bf16.mxu0 %v6628_v51  ;;  %v6637_v46 = vld [vmem:[#allocation4 + $0x2a8] sm:$0xff]  }
 0x1d6   :  { %5888 = vmatprep.subr.bf16.mxu1 %v6618_v61  ;;  %5951 = vmatpush3.bf16.msra.mxu0 %v6629_v0  ;;  %v7657_v51 = vld [vmem:[#allocation2 + $0x64] sm:$0xff] }
 0x1d7   :  { %5952 = vmatprep.subr.bf16.mxu0 %v6630_v47  ;;  %v7661_v52 = vld [vmem:[#allocation2 + $0x81] sm:$0xff]  ;;  %v7665_v0 = vpack.c.bf16 %v7659_v62, %v7657_v51 }
 0x1d8   :  { %v803_v61 = vld [vmem:[#allocation2 + $0xe2] sm:$0xff]  ;;  %v781_v47 = vpack.c.bf16 %v7661_v52, %v7498_v36  ;;  %v6639_v36 = vld [vmem:[#allocation4 + $0x238] sm:$0xff]  }
 0x1d9   :  { %5889 = vmatpush3.bf16.msra.mxu1 %v6619_v28  ;;  %v6633_v28 = vld [vmem:[#allocation4 + $0x230] sm:$0xff]   ;;  %v814_v5 = vpack.c.bf16 %v803_v61, %v7533_v2  ;;  %v6644_v2 = vld [vmem:[#allocation4 + $0x340] sm:$0xff]  }
 0x1da   :  { %5890 = vmatprep.subr.bf16.mxu1 %v6620_v35  ;;  %5953 = vmatpush3.bf16.msra.mxu0 %v6631_v29  ;;  %v6640_v35 = vld [vmem:[#allocation4 + $0x2f0] sm:$0xff]   ;;  %v750_v29 = vpack.c.bf16 %v7549_v25, %v7531_v31  ;;  %v6643_v31 = vld [vmem:[#allocation4 + $0x2b8] sm:$0xff]  }
 0x1db   :  { %3422 = vmatmul.mubr.bf16.gmra.mrb[40].mxu1 %v7649_v56  ;;  %3519 = vmatmul.mubr.bf16.gmra.mrb[56].mxu0 %v780_v48  ;;  %v6638_v48 = vld [vmem:[#allocation4 + $0x278] sm:$0xff]  }
 0x1dc   :  { %3429 = vmatprep.mubr.bf16.mxu1 %v749_v42  ;;  %3526 = vmatprep.mubr.bf16.mxu0 %v813_v37  ;;  %v705_v42 = vld [vmem:[#allocation2 + $0xc4] sm:$0xff]  ;;  %v7673_v37 = vld [vmem:[#allocation2 + $0xd4] sm:$0xff] }
 0x1dd   :  { %5891 = vmatpush3.bf16.msra.mxu1 %v6622_v11  ;;  %5954 = vmatprep.subr.bf16.mxu0 %v6634_v41  ;;  %v6641_v11 = vld [vmem:[#allocation4 + $0x2b0] sm:$0xff]   ;;  %v6642_v41 = vld [vmem:[#allocation4 + $0x2f8] sm:$0xff]   ;;  %v717_v25 = vpack.c.bf16 %v7673_v37, %v705_v42 }
 0x1de   :  { %5892 = vmatprep.subr.bf16.mxu1 %v6626_v4  ;;  %5955 = vmatpush3.bf16.msra.mxu0 %v6635_v22  ;;  %v804_v4 = vld [vmem:[#allocation2 + $0xf2] sm:$0xff]  ;;  %v805_v22 = vld [vmem:[#allocation2 + $0x102] sm:$0xff] }
 0x1df   :  { %5956 = vmatprep.subr.bf16.mxu0 %v6636_v50  ;;  %v782_v50 = vpack.c.bf16 %v7535_v34, %v7520_v63  ;;  %v815_v61 = vpack.c.bf16 %v805_v22, %v804_v4  ;;  %v7688_v42 = vld [vmem:[#allocation2 + $0xf4] sm:$0xff] }
 0x1e1   :  { %5893 = vmatpush3.bf16.msra.mxu1 %v6627_v9  ;;  %v6653_v9 = vld [vmem:[#allocation4 + $0x3c0] sm:$0xff]  }
 0x1e2   :  { %5894 = vmatprep.subr.bf16.mxu1 %v6632_v30  ;;  %5957 = vmatpush3.bf16.msra.mxu0 %v6637_v46  ;;  %v751_v46 = vpack.c.bf16 %v7573_v17, %v7551_v14 }
 0x1e3   :  { %3430 = vmatmul.mubr.bf16.gmra.mrb[44].mxu1 %v7665_v0  ;;  %3527 = vmatmul.mubr.bf16.gmra.mrb[60].mxu0 %v781_v47  ;;  %v7683_v47 = vld [vmem:[%s8938_s6] ss:$0 sm:$0xff] }
 0x1e4   :  { %3437 = vmatprep.mubr.bf16.mxu1 %v750_v29  ;;  %3534 = vmatprep.mubr.bf16.mxu0 %v814_v5 }
 0x1e5   :  { %5895 = vmatpush3.bf16.msra.mxu1 %v6633_v28  ;;  %5958 = vmatprep.subr.bf16.mxu0 %v6640_v35 }
 0x1e6   :  { %5896 = vmatprep.subr.bf16.mxu1 %v6638_v48  ;;  %5959 = vmatpush3.bf16.msra.mxu0 %v6641_v11 }
 0x1e7   :  { %5960 = vmatprep.subr.bf16.mxu0 %v6642_v41  ;;  %v7686_v41 = vld [vmem:[#allocation2 + $0xe4] sm:$0xff] }
 0x1e9   :  { %5897 = vmatpush3.bf16.msra.mxu1 %v6639_v36 }
 0x1ea   :  { %5961 = vmatpush3.bf16.msra.mxu0 %v6643_v31  ;;  %6010 = vmatprep.subr.bf16.mxu1 %v6644_v2  ;;  %v806_v31 = vld [vmem:[#allocation2 + $0x112] sm:$0xff]  ;;  %v807_v2 = vld [vmem:[#allocation2 + $0x122] sm:$0xff] }
 0x1eb   :  { %3438 = vmatmul.mubr.bf16.gmra.mrb[48].mxu1 %v717_v25  ;;  %3535 = vmatmul.mubr.bf16.gmra.mrb[64].mxu0 %v782_v50  ;;  %v718_v50 = vpack.c.bf16 %v7688_v42, %v7686_v41 }
 0x1ec   :  { %3445 = vmatprep.mubr.bf16.mxu1 %v751_v46  ;;  %3542 = vmatprep.mubr.bf16.mxu0 %v815_v61  ;;  %v752_v46 = vpack.c.bf16 %v7597_v12, %v7575_v1  ;;  %v816_v61 = vpack.c.bf16 %v807_v2, %v806_v31  ;;  %v6646_v31 = vld [vmem:[#allocation4 + $0x348] sm:$0xff]   ;;  %v875_v2 = vpack.c.bf16 %v7639_v45, %v7625_v54  ;;  %v6649_v45 = vld [vmem:[#allocation4 + $0x310] sm:$0xff]  }
 0x1ed   :  { %6074 = vmatprep.subr.bf16.mxu0 %v6653_v9  ;;  %v783_v9 = vpack.c.bf16 %v7553_v26, %v7539_v10  ;;  %v784_v26 = vpack.c.bf16 %v7577_v20, %v7555_v53  ;;  %v874_v20 = vpack.c.bf16 %v7623_v24, %v7613_v6  ;;  %v6647_v6 = vld [vmem:[#allocation4 + $0x308] sm:$0xff]   ;;  %v7731_v24 = vld [vmem:[#allocation2 + $0x33] sm:$0xff] }
 0x1ee   :  { %v5642_v30 = vpop.f32.mrb[0].mxu1  ;;  %v843_v54 = vpack.c.bf16 %v7462_v7, %v7731_v24  ;;  %v7739_v7 = vld [vmem:[#allocation2 + $0x53] sm:$0xff] }
 0x1ef   :  { %v5643_v28 = vpop.f32.mrb[1].mxu1 }
 0x1f0   :  { %v5644_v35 = vadd.f32 %v5643_v28, %v5642_v30  ;;  %v5645_v29 = vpop.f32.mrb[2].mxu1  ;;  %v5706_v63 = vpop.f32.mrb[16].mxu0  ;;  %v7701_v28 = vld [vmem:[#allocation2 + $0x104] sm:$0xff] }
 0x1f1   :  { %v5646_v34 = vpop.f32.mrb[3].mxu1  ;;  %v5707_v5 = vpop.f32.mrb[17].mxu0 }
 0x1f2   :  { %v3214_v14 = vadd.f32 %v5644_v35, %v7683_v47  ;;  %v5647_v17 = vadd.f32 %v5646_v34, %v5645_v29  ;;  %v5708_v48 = vadd.f32 %v5707_v5, %v5706_v63  ;;  %v5709_v11 = vpop.f32.mrb[18].mxu0  ;;  %v7703_v35 = vld [vmem:[#allocation2 + $0x114] sm:$0xff]  ;;  %v7705_v29 = vld [vmem:[#allocation2 + $0x140] sm:$0xff] }
 0x1f3   :  { %v5710_v36 = vpop.f32.mrb[19].mxu0  ;;  %3446 = vmatmul.mubr.bf16.gmra.mrb[52].mxu1 %v718_v50  ;;  %3543 = vmatmul.mubr.bf16.gmra.mrb[68].mxu0 %v783_v9  ;;  %v808_v63 = vld [vmem:[#allocation2 + $0x132] sm:$0xff]  ;;  %v809_v34 = vld [vmem:[#allocation2 + $0x142] sm:$0xff]  ;;  %v719_v10 = vpack.c.bf16 %v7703_v35, %v7701_v28  ;;  %v753_v1 = vpack.c.bf16 %v7705_v29, %v7599_v55 }
 0x1f4   :  { %v3217_v25 = vadd.f32 %v5647_v17, %v7683_v47  ;;  %v7691_v4 = vadd.f32 %v5708_v48, %v3214_v14  ;;  %v5711_v22 = vadd.f32 %v5710_v36, %v5709_v11  ;;  %3453 = vmatprep.mubr.bf16.mxu1 %v752_v46  ;;  %3550 = vmatprep.mubr.bf16.mxu0 %v816_v61  ;;  %v7713_v5 = vld [vmem:[#allocation2 + $0x124] sm:$0xff]  ;;  %v7715_v14 = vld [vmem:[#allocation2 + $0x134] sm:$0xff] }
 0x1f5   :  { %v817_v12 = vpack.c.bf16 %v809_v34, %v808_v63  ;;  %v7717_v17 = vld [vmem:[#allocation2 + $0x141] sm:$0xff]  ;;  %v720_v48 = vpack.c.bf16 %v7715_v14, %v7713_v5  ;;  %v826_v55 = vld [vmem:[#allocation2 + $0x13] sm:$0xff] }
 0x1f6   :  { %v7697_v30 = vadd.f32 %v5711_v22, %v3217_v25  ;;  %v785_v53 = vpack.c.bf16 %v7717_v17, %v7579_v38  ;;  %v6645_v11 = vld [vmem:[#allocation4 + $0x300] sm:$0xff]   ;;  %v842_v36 = vpack.c.bf16 %v7435_v23, %v826_v55  ;;  %v6656_v38 = vld [vmem:[#allocation4 + $0x3c8] sm:$0xff]   ;;  %v876_v22 = vpack.c.bf16 %v7657_v51, %v7641_v60  ;;  %v6650_v50 = vld [vmem:[#allocation4 + $0x358] sm:$0xff]  }
 0x1f7   :  { %v6655_v25 = vld [vmem:[#allocation4 + $0x380] sm:$0xff]   ;;  %v6657_v23 = vld [vmem:[#allocation4 + $0x388] sm:$0xff]   ;;  %v6662_v9 = vld [vmem:[#allocation4 + $0x3d8] sm:$0xff]  }
 0x1f8   :  { %v6651_v46 = vld [vmem:[#allocation4 + $0x318] sm:$0xff]   ;;  %v6652_v61 = vld [vmem:[#allocation4 + $0x360] sm:$0xff]   ;;  %v6669_v55 = vld [vmem:[#allocation4 + $0x3a8] sm:$0xff]  }
 0x1f9   :  { %v6663_v63 = vld [vmem:[#allocation4 + $0x398] sm:$0xff]   ;;  %v7741_v60 = vld [vmem:[#allocation2 + $0x84] sm:$0xff] }
 0x1fa   :  { %v929_v51 = vld [vmem:[#allocation2 + $0x91] sm:$0xff]  ;;  %v6654_v34 = vld [vmem:[#allocation4 + $0x320] sm:$0xff]  }
 0x1fb   :  { %3454 = vmatmul.mubr.bf16.gmra.mrb[56].mxu1 %v719_v10  ;;  %3551 = vmatmul.mubr.bf16.gmra.mrb[72].mxu0 %v784_v26  ;;  %v6666_v10 = vld [vmem:[#allocation4 + $0x3e0] sm:$0xff]   ;;  %v941_v26 = vpack.c.bf16 %v929_v51, %v7661_v52  ;;  %v6664_v52 = vld [vmem:[#allocation4 + $0x370] sm:$0xff]  }
 0x1fc   :  { %3461 = vmatprep.mubr.bf16.mxu1 %v753_v1  ;;  %3558 = vmatprep.mubr.bf16.mxu0 %v817_v12  ;;  %v6658_v1 = vld [vmem:[#allocation4 + $0x368] sm:$0xff]   ;;  %v6667_v12 = vld [vmem:[#allocation4 + $0x3a0] sm:$0xff]  }
 0x1fd   :  { %v6677_v51 = vld [vmem:[#allocation4 + $0x400] sm:$0xff]  }
 0x203   :  { %3462 = vmatmul.mubr.bf16.gmra.mrb[60].mxu1 %v720_v48  ;;  %3559 = vmatmul.mubr.bf16.gmra.mrb[76].mxu0 %v785_v53  ;;  %v6668_v48 = vld [vmem:[#allocation4 + $0x3e8] sm:$0xff]   ;;  %v7749_v53 = vld [vmem:[#allocation2 + $0x73] sm:$0xff] }
 0x204   :  { %3599 = vmatprep.mubr.bf16.mxu1 %v874_v20  ;;  %3696 = vmatprep.mubr.bf16.mxu0 %v7453_v32  ;;  %v6648_v32 = vld [vmem:[#allocation4 + $0x350] sm:$0xff]   ;;  %v6659_v20 = vld [vmem:[#allocation4 + $0x328] sm:$0xff]  }
 0x20b   :  { %3600 = vmatmul.mubr.bf16.vlgmr.msra.gmra.mrb[64].mxu1 %v842_v36  ;;  %3697 = vmatmul.mubr.bf16.vlgmr.msra.gmra.mrb[80].mxu0 %v7458_v33  ;;  %v6660_v33 = vld [vmem:[#allocation4 + $0x3d0] sm:$0xff]  }
 0x20c   :  { %6011 = vmatpush3.bf16.msra.mxu1 %v6645_v11  ;;  %3607 = vmatprep.mubr.bf16.mxu1 %v875_v2  ;;  %v6665_v36 = vld [vmem:[#allocation4 + $0x330] sm:$0xff]   ;;  %v878_v2 = vpack.c.bf16 %v7686_v41, %v7673_v37  ;;  %v6685_v41 = vld [vmem:[#allocation4 + $0x4c0] sm:$0xff]  }
 0x20d   :  { %3704 = vmatprep.mubr.bf16.mxu0 %v7479_v44  ;;  %6012 = vmatprep.subr.bf16.mxu1 %v6646_v31  ;;  %v6661_v44 = vld [vmem:[#allocation4 + $0x390] sm:$0xff]  }
 0x20e   :  { %6075 = vmatpush3.bf16.msra.mxu0 %v6655_v25  ;;  %v6672_v31 = vld [vmem:[#allocation4 + $0x3f0] sm:$0xff]   ;;  %v6670_v25 = vld [vmem:[#allocation4 + $0x378] sm:$0xff]  }
 0x20f   :  { %6076 = vmatprep.subr.bf16.mxu0 %v6656_v38  ;;  %v6673_v38 = vld [vmem:[#allocation4 + $0x3b0] sm:$0xff]  }
 0x210   :  { %6013 = vmatpush3.bf16.msra.mxu1 %v6647_v6  ;;  %v6674_v6 = vld [vmem:[#allocation4 + $0x3f8] sm:$0xff]  }
 0x211   :  { %6014 = vmatprep.subr.bf16.mxu1 %v6648_v32  ;;  %v6671_v32 = vld [vmem:[#allocation4 + $0x338] sm:$0xff]  }
 0x212   :  { %6077 = vmatpush3.bf16.msra.mxu0 %v6657_v23  ;;  %v834_v23 = vld [vmem:[#allocation2 + $0xd3] sm:$0xff] }
 0x213   :  { %3608 = vmatmul.mubr.bf16.gmra.mrb[68].mxu1 %v843_v54  ;;  %3705 = vmatmul.mubr.bf16.gmra.mrb[84].mxu0 %v7504_v40  ;;  %v844_v40 = vpack.c.bf16 %v7500_v27, %v7739_v7  ;;  %v7751_v27 = vld [vmem:[#allocation2 + $0x83] sm:$0xff]  ;;  %v6675_v54 = vld [vmem:[#allocation4 + $0x3b8] sm:$0xff]   ;;  %v846_v37 = vpack.c.bf16 %v7541_v13, %v834_v23  ;;  %v880_v13 = vpack.c.bf16 %v7713_v5, %v7703_v35  ;;  %v7789_v35 = vld [vmem:[#allocation2 + $0x150] sm:$0xff] }
 0x214   :  { %3615 = vmatprep.mubr.bf16.mxu1 %v876_v22  ;;  %3712 = vmatprep.mubr.bf16.mxu0 %v7508_v43  ;;  %v877_v43 = vpack.c.bf16 %v7741_v60, %v7659_v62  ;;  %v7753_v62 = vld [vmem:[#allocation2 + $0x90] sm:$0xff]  ;;  %v986_v5 = vld [vmem:[#allocation2 + $0x23] sm:$0xff] }
 0x215   :  { %6015 = vmatpush3.bf16.msra.mxu1 %v6649_v45  ;;  %6078 = vmatprep.subr.bf16.mxu0 %v6660_v33  ;;  %v909_v11 = vpack.c.bf16 %v7753_v62, %v7643_v59  ;;  %v6676_v45 = vld [vmem:[#allocation4 + $0x440] sm:$0xff]   ;;  %v879_v33 = vpack.c.bf16 %v7701_v28, %v7688_v42  ;;  %v7775_v42 = vld [vmem:[#allocation2 + $0x113] sm:$0xff] }
 0x216   :  { %6016 = vmatprep.subr.bf16.mxu1 %v6650_v50  ;;  %6079 = vmatpush3.bf16.msra.mxu0 %v6661_v44  ;;  %v848_v28 = vpack.c.bf16 %v7581_v58, %v7775_v42  ;;  %v1051_v44 = vld [vmem:[#allocation2 + $0x30] sm:$0xff]  ;;  %v7816_v23 = vld [vmem:[#allocation2 + $0x62] sm:$0xff] }
 0x217   :  { %6080 = vmatprep.subr.bf16.mxu0 %v6662_v9  ;;  %v1052_v9 = vld [vmem:[#allocation2 + $0x40] sm:$0xff] }
 0x219   :  { %6017 = vmatpush3.bf16.msra.mxu1 %v6651_v46  ;;  %v954_v46 = vld [vmem:[#allocation2 + $0x22] sm:$0xff] }
 0x21a   :  { %6018 = vmatprep.subr.bf16.mxu1 %v6652_v61  ;;  %6081 = vmatpush3.bf16.msra.mxu0 %v6663_v63  ;;  %v7796_v61 = vld [vmem:[#allocation2 + $0x32] sm:$0xff]  ;;  %v7798_v63 = vld [vmem:[#allocation2 + $0x43] sm:$0xff] }
 0x21b   :  { %3616 = vmatmul.mubr.bf16.gmra.mrb[72].mxu1 %v844_v40  ;;  %3713 = vmatmul.mubr.bf16.gmra.mrb[88].mxu0 %v7525_v18  ;;  %v845_v18 = vpack.c.bf16 %v7751_v27, %v7749_v53  ;;  %v1053_v40 = vld [vmem:[#allocation2 + $0x50] sm:$0xff] }
 0x21c   :  { %3623 = vmatprep.mubr.bf16.mxu1 %v877_v43  ;;  %3720 = vmatprep.mubr.bf16.mxu0 %v941_v26  ;;  %v6678_v43 = vld [vmem:[#allocation4 + $0x448] sm:$0xff]  }
 0x21d   :  { %6019 = vmatpush3.bf16.msra.mxu1 %v6654_v34  ;;  %6082 = vmatprep.subr.bf16.mxu0 %v6666_v10  ;;  %v1054_v34 = vld [vmem:[#allocation2 + $0x60] sm:$0xff]  ;;  %v970_v10 = vpack.c.bf16 %v7796_v61, %v954_v46 }
 0x21e   :  { %6020 = vmatprep.subr.bf16.mxu1 %v6658_v1  ;;  %6083 = vmatpush3.bf16.msra.mxu0 %v6667_v12  ;;  %v1068_v26 = vpack.c.bf16 %v1054_v34, %v1053_v40  ;;  %v6688_v1 = vld [vmem:[#allocation4 + $0x4c8] sm:$0xff]   ;;  %v6702_v40 = vld [vmem:[#allocation4 + $0x478] sm:$0xff]   ;;  %v6705_v34 = vld [vmem:[#allocation4 + $0x4b0] sm:$0xff]  }
 0x21f   :  { %6084 = vmatprep.subr.bf16.mxu0 %v6668_v48  ;;  %v6679_v12 = vld [vmem:[#allocation4 + $0x408] sm:$0xff]   ;;  %v6680_v48 = vld [vmem:[#allocation4 + $0x450] sm:$0xff]  }
 0x221   :  { %6021 = vmatpush3.bf16.msra.mxu1 %v6659_v20  ;;  %v7804_v20 = vld [vmem:[#allocation2 + $0x42] sm:$0xff] }
 0x222   :  { %6022 = vmatprep.subr.bf16.mxu1 %v6664_v52  ;;  %6085 = vmatpush3.bf16.msra.mxu0 %v6669_v55  ;;  %v7806_v52 = vld [vmem:[#allocation2 + $0x52] sm:$0xff]  ;;  %v6689_v55 = vld [vmem:[#allocation4 + $0x488] sm:$0xff]  }
 0x223   :  { %3624 = vmatmul.mubr.bf16.gmra.mrb[76].mxu1 %v845_v18  ;;  %3721 = vmatmul.mubr.bf16.gmra.mrb[92].mxu0 %v909_v11  ;;  %v7808_v18 = vld [vmem:[#allocation2 + $0x63] sm:$0xff]  ;;  %v6681_v11 = vld [vmem:[#allocation4 + $0x410] sm:$0xff]  }
 0x224   :  { %3631 = vmatprep.mubr.bf16.mxu1 %v878_v2  ;;  %3728 = vmatprep.mubr.bf16.mxu0 %v7545_v15  ;;  %v7767_v15 = vld [vmem:[#allocation2 + $0xf3] sm:$0xff] }
 0x225   :  { %6023 = vmatpush3.bf16.msra.mxu1 %v6665_v36  ;;  %6086 = vmatprep.subr.bf16.mxu0 %v6672_v31  ;;  %v847_v22 = vpack.c.bf16 %v7557_v49, %v7767_v15  ;;  %v6692_v36 = vld [vmem:[#allocation4 + $0x4d0] sm:$0xff]   ;;  %v1004_v31 = vpack.c.bf16 %v7749_v53, %v7808_v18  ;;  %v6695_v53 = vld [vmem:[#allocation4 + $0x498] sm:$0xff]  }
 0x226   :  { %6024 = vmatprep.subr.bf16.mxu1 %v6670_v25  ;;  %6087 = vmatpush3.bf16.msra.mxu0 %v6673_v38  ;;  %v6682_v25 = vld [vmem:[#allocation4 + $0x458] sm:$0xff]   ;;  %v6693_v38 = vld [vmem:[#allocation4 + $0x490] sm:$0xff]  }
 0x227   :  { %6088 = vmatprep.subr.bf16.mxu0 %v6674_v6  ;;  %v6694_v6 = vld [vmem:[#allocation4 + $0x4d8] sm:$0xff]  }
 0x229   :  { %6025 = vmatpush3.bf16.msra.mxu1 %v6671_v32  ;;  %v6683_v32 = vld [vmem:[#allocation4 + $0x418] sm:$0xff]  }
 0x22a   :  { %6089 = vmatpush3.bf16.msra.mxu0 %v6675_v54  ;;  %6138 = vmatprep.subr.bf16.mxu1 %v6676_v45  ;;  %v6684_v54 = vld [vmem:[#allocation4 + $0x460] sm:$0xff]   ;;  %v7818_v45 = vld [vmem:[#allocation2 + $0x93] sm:$0xff] }
 0x22b   :  { %3632 = vmatmul.mubr.bf16.gmra.mrb[80].mxu1 %v846_v37  ;;  %3729 = vmatmul.mubr.bf16.gmra.mrb[96].mxu0 %v7561_v39  ;;  %v7777_v39 = vld [vmem:[#allocation2 + $0x144] sm:$0xff]  ;;  %v972_v37 = vpack.c.bf16 %v7645_v21, %v7816_v23  ;;  %v7828_v21 = vld [vmem:[#allocation2 + $0x92] sm:$0xff] }
 0x22c   :  { %3639 = vmatprep.mubr.bf16.mxu1 %v879_v33  ;;  %3736 = vmatprep.mubr.bf16.mxu0 %v7565_v57  ;;  %v937_v57 = vld [vmem:[#allocation2 + $0x151] sm:$0xff]  ;;  %v881_v49 = vpack.c.bf16 %v7777_v39, %v7715_v14  ;;  %v913_v14 = vpack.c.bf16 %v7789_v35, %v7705_v29  ;;  %v1003_v29 = vpack.c.bf16 %v7739_v7, %v7798_v63 }
 0x22d   :  { %6202 = vmatprep.subr.bf16.mxu0 %v6685_v41  ;;  %v945_v50 = vpack.c.bf16 %v937_v57, %v7717_v17  ;;  %v1002_v17 = vpack.c.bf16 %v7731_v24, %v986_v5  ;;  %v6687_v24 = vld [vmem:[#allocation4 + $0x480] sm:$0xff]   ;;  %v1055_v7 = vld [vmem:[#allocation2 + $0x70] sm:$0xff]  ;;  %v1005_v33 = vpack.c.bf16 %v7818_v45, %v7751_v27  ;;  %v6701_v5 = vld [vmem:[#allocation4 + $0x4a8] sm:$0xff]  }
 0x22e   :  { %v1069_v2 = vpack.c.bf16 %v7643_v59, %v1055_v7  ;;  %v1058_v59 = vld [vmem:[#allocation2 + $0xa0] sm:$0xff]  ;;  %v7830_v27 = vld [vmem:[#allocation2 + $0x94] sm:$0xff] }
 0x22f   :  { %v6698_v41 = vld [vmem:[#allocation4 + $0x4e0] sm:$0xff]   ;;  %v6707_v7 = vld [vmem:[#allocation4 + $0x4b8] sm:$0xff]  }
 0x230   :  { %v6699_v57 = vld [vmem:[#allocation4 + $0x4a0] sm:$0xff]  }
 0x233   :  { %3640 = vmatmul.mubr.bf16.gmra.mrb[84].mxu1 %v847_v22  ;;  %3737 = vmatmul.mubr.bf16.gmra.mrb[100].mxu0 %v7585_v8  ;;  %v7785_v8 = vld [vmem:[#allocation2 + $0x133] sm:$0xff]  ;;  %v1070_v22 = vpack.c.bf16 %v1058_v59, %v7753_v62 }
 0x234   :  { %3647 = vmatprep.mubr.bf16.mxu1 %v880_v13  ;;  %3744 = vmatprep.mubr.bf16.mxu0 %v7589_v19  ;;  %v7787_v19 = vld [vmem:[#allocation2 + $0x143] sm:$0xff]  ;;  %v6696_v62 = vld [vmem:[#allocation4 + $0x470] sm:$0xff]  }
 0x235   :  { %v849_v58 = vpack.c.bf16 %v7787_v19, %v7785_v8  ;;  %v6690_v13 = vld [vmem:[#allocation4 + $0x468] sm:$0xff]  }
 0x23b   :  { %3648 = vmatmul.mubr.bf16.gmra.mrb[88].mxu1 %v848_v28  ;;  %3745 = vmatmul.mubr.bf16.gmra.mrb[104].mxu0 %v7603_v16  ;;  %v1067_v16 = vpack.c.bf16 %v1052_v9, %v1051_v44  ;;  %v6700_v28 = vld [vmem:[#allocation4 + $0x4e8] sm:$0xff]   ;;  %v1059_v9 = vld [vmem:[#allocation2 + $0xf0] sm:$0xff] }
 0x23c   :  { %3655 = vmatprep.mubr.bf16.mxu1 %v881_v49  ;;  %3752 = vmatprep.mubr.bf16.mxu0 %v945_v50  ;;  %v7826_v49 = vld [vmem:[#allocation2 + $0x82] sm:$0xff] }
 0x23d   :  { %v6691_v50 = vld [vmem:[#allocation4 + $0x428] sm:$0xff]  }
 0x23e   :  { %v994_v44 = vld [vmem:[#allocation2 + $0xe3] sm:$0xff] }
 0x23f   :  { %v1006_v46 = vpack.c.bf16 %v7767_v15, %v994_v44  ;;  %v6703_v15 = vld [vmem:[#allocation4 + $0x438] sm:$0xff]   ;;  %v7857_v44 = vld [vmem:[#allocation2 + $0x104] sm:$0xff] }
 0x243   :  { %3656 = vmatmul.mubr.bf16.gmra.mrb[92].mxu1 %v849_v58  ;;  %3753 = vmatmul.mubr.bf16.gmra.mrb[108].mxu0 %v913_v14  ;;  %v1060_v58 = vld [vmem:[#allocation2 + $0x100] sm:$0xff]  ;;  %v1037_v14 = vpack.c.bf16 %v7830_v27, %v7741_v60  ;;  %v7839_v60 = vld [vmem:[#allocation2 + $0xf4] sm:$0xff] }
 0x244   :  { %3793 = vmatprep.mubr.bf16.mxu1 %v1002_v17  ;;  %3890 = vmatprep.mubr.bf16.mxu0 %v1067_v16  ;;  %v6697_v17 = vld [vmem:[#allocation4 + $0x430] sm:$0xff]  }
 0x245   :  { %v6704_v16 = vld [vmem:[#allocation4 + $0x4f0] sm:$0xff]  }
 0x24b   :  { %3794 = vmatmul.mubr.bf16.vlgmr.msra.gmra.mrb[96].mxu1 %v970_v10  ;;  %3891 = vmatmul.mubr.bf16.vlgmr.msra.gmra.mrb[112].mxu0 %v7629_v3  ;;  %v971_v3 = vpack.c.bf16 %v7806_v52, %v7804_v20  ;;  %v6706_v10 = vld [vmem:[#allocation4 + $0x4f8] sm:$0xff]  }
 0x24c   :  { %6139 = vmatpush3.bf16.msra.mxu1 %v6677_v51  ;;  %3801 = vmatprep.mubr.bf16.mxu1 %v1003_v29  ;;  %v1071_v51 = vpack.c.bf16 %v1060_v58, %v1059_v9  ;;  %v7837_v29 = vld [vmem:[#allocation2 + $0xf2] sm:$0xff]  ;;  %v7861_v58 = vld [vmem:[#allocation2 + $0x123] sm:$0xff] }
 0x24d   :  { %3898 = vmatprep.mubr.bf16.mxu0 %v1068_v26  ;;  %6140 = vmatprep.subr.bf16.mxu1 %v6678_v43  ;;  %v962_v43 = vld [vmem:[#allocation2 + $0xe2] sm:$0xff]  ;;  %v7859_v9 = vld [vmem:[#allocation2 + $0x114] sm:$0xff] }
 0x24e   :  { %6203 = vmatpush3.bf16.msra.mxu0 %v6687_v24  ;;  %v1026_v24 = vld [vmem:[#allocation2 + $0xe4] sm:$0xff] }
 0x24f   :  { %6204 = vmatprep.subr.bf16.mxu0 %v6688_v1  ;;  %v7841_v26 = vld [vmem:[#allocation2 + $0x103] sm:$0xff]  ;;  %v1061_v1 = vld [vmem:[#allocation2 + $0x110] sm:$0xff] }
 0x250   :  { %6141 = vmatpush3.bf16.msra.mxu1 %v6679_v12  ;;  %v1007_v59 = vpack.c.bf16 %v7775_v42, %v7841_v26  ;;  %v7853_v42 = vld [vmem:[#allocation2 + $0x112] sm:$0xff] }
 0x251   :  { %6142 = vmatprep.subr.bf16.mxu1 %v6680_v48 }
 0x252   :  { %6205 = vmatpush3.bf16.msra.mxu0 %v6689_v55  ;;  %v1062_v55 = vld [vmem:[#allocation2 + $0x120] sm:$0xff] }
 0x253   :  { %3802 = vmatmul.mubr.bf16.gmra.mrb[100].mxu1 %v971_v3  ;;  %3899 = vmatmul.mubr.bf16.gmra.mrb[116].mxu0 %v7649_v56  ;;  %v6686_v56 = vld [vmem:[#allocation4 + $0x420] sm:$0xff]  }
 0x254   :  { %3809 = vmatprep.mubr.bf16.mxu1 %v1004_v31  ;;  %3906 = vmatprep.mubr.bf16.mxu0 %v1069_v2  ;;  %v6708_v3 = vld [vmem:[#allocation4 + $0x540] sm:$0xff]  }
 0x255   :  { %6143 = vmatpush3.bf16.msra.mxu1 %v6681_v11  ;;  %6206 = vmatprep.subr.bf16.mxu0 %v6692_v36 }
 0x256   :  { %6144 = vmatprep.subr.bf16.mxu1 %v6682_v25  ;;  %6207 = vmatpush3.bf16.msra.mxu0 %v6693_v38 }
 0x257   :  { %6208 = vmatprep.subr.bf16.mxu0 %v6694_v6 }
 0x259   :  { %6145 = vmatpush3.bf16.msra.mxu1 %v6683_v32 }
 0x25a   :  { %6146 = vmatprep.subr.bf16.mxu1 %v6684_v54  ;;  %6209 = vmatpush3.bf16.msra.mxu0 %v6695_v53  ;;  %v974_v54 = vpack.c.bf16 %v7837_v29, %v962_v43  ;;  %v1038_v53 = vpack.c.bf16 %v7839_v60, %v1026_v24 }
 0x25b   :  { %3810 = vmatmul.mubr.bf16.gmra.mrb[104].mxu1 %v972_v37  ;;  %3907 = vmatmul.mubr.bf16.gmra.mrb[120].mxu0 %v7665_v0  ;;  %v973_v0 = vpack.c.bf16 %v7828_v21, %v7826_v49  ;;  %v1072_v37 = vpack.c.bf16 %v1062_v55, %v1061_v1  ;;  %v1039_v1 = vpack.c.bf16 %v7859_v9, %v7857_v44 }
 0x25c   :  { %3817 = vmatprep.mubr.bf16.mxu1 %v1005_v33  ;;  %3914 = vmatprep.mubr.bf16.mxu0 %v1070_v22 }
 0x25d   :  { %6147 = vmatpush3.bf16.msra.mxu1 %v6686_v56  ;;  %6210 = vmatprep.subr.bf16.mxu0 %v6698_v41  ;;  %v6717_v56 = vld [vmem:[#allocation4 + $0x5c0] sm:$0xff]  }
 0x25e   :  { %6148 = vmatprep.subr.bf16.mxu1 %v6690_v13  ;;  %6211 = vmatpush3.bf16.msra.mxu0 %v6699_v57 }
 0x25f   :  { %6212 = vmatprep.subr.bf16.mxu0 %v6700_v28  ;;  %v7851_v28 = vld [vmem:[#allocation2 + $0x102] sm:$0xff] }
 0x260   :  { %v975_v24 = vpack.c.bf16 %v7853_v42, %v7851_v28 }
 0x261   :  { %6149 = vmatpush3.bf16.msra.mxu1 %v6691_v50 }
 0x262   :  { %6150 = vmatprep.subr.bf16.mxu1 %v6696_v62  ;;  %6213 = vmatpush3.bf16.msra.mxu0 %v6701_v5 }
 0x263   :  { %3818 = vmatmul.mubr.bf16.gmra.mrb[108].mxu1 %v973_v0  ;;  %3915 = vmatmul.mubr.bf16.gmra.mrb[124].mxu0 %v1037_v14 }
 0x264   :  { %3825 = vmatprep.mubr.bf16.mxu1 %v1006_v46  ;;  %3922 = vmatprep.mubr.bf16.mxu0 %v1071_v51 }
 0x265   :  { %6151 = vmatpush3.bf16.msra.mxu1 %v6697_v17  ;;  %6214 = vmatprep.subr.bf16.mxu0 %v6704_v16  ;;  %v1063_v17 = vld [vmem:[#allocation2 + $0x130] sm:$0xff]  ;;  %v1064_v16 = vld [vmem:[#allocation2 + $0x140] sm:$0xff] }
 0x266   :  { %v5648_v12 = vpop.f32.mrb[4].mxu1  ;;  %v5712_v48 = vpop.f32.mrb[20].mxu0  ;;  %6152 = vmatprep.subr.bf16.mxu1 %v6702_v40  ;;  %6215 = vmatpush3.bf16.msra.mxu0 %v6705_v34 }
 0x267   :  { %v5649_v11 = vpop.f32.mrb[5].mxu1  ;;  %v5713_v36 = vpop.f32.mrb[21].mxu0  ;;  %6216 = vmatprep.subr.bf16.mxu0 %v6706_v10 }
 0x268   :  { %v5650_v31 = vadd.f32 %v5649_v11, %v5648_v12  ;;  %v5714_v2 = vadd.f32 %v5713_v36, %v5712_v48  ;;  %v5651_v25 = vpop.f32.mrb[6].mxu1  ;;  %v5715_v38 = vpop.f32.mrb[22].mxu0  ;;  %v7873_v36 = vld [vmem:[#allocation2 + $0x122] sm:$0xff] }
 0x269   :  { %v5652_v6 = vpop.f32.mrb[7].mxu1  ;;  %v5716_v32 = vpop.f32.mrb[23].mxu0  ;;  %6153 = vmatpush3.bf16.msra.mxu1 %v6703_v15  ;;  %v1008_v15 = vpack.c.bf16 %v7785_v8, %v7861_v58 }
 0x26a   :  { %v3222_v41 = vadd.f32 %v5650_v31, %v7683_v47  ;;  %v5653_v33 = vadd.f32 %v5652_v6, %v5651_v25  ;;  %v5717_v22 = vadd.f32 %v5716_v32, %v5715_v38  ;;  %6217 = vmatpush3.bf16.msra.mxu0 %v6707_v7  ;;  %6266 = vmatprep.subr.bf16.mxu1 %v6708_v3  ;;  %v1066_v31 = vld [vmem:[#allocation2 + $0x160] sm:$0xff]  ;;  %v7877_v38 = vld [vmem:[#allocation2 + $0x132] sm:$0xff] }
 0x26b   :  { %3826 = vmatmul.mubr.bf16.gmra.mrb[112].mxu1 %v974_v54  ;;  %3923 = vmatmul.mubr.bf16.gmra.mrb[128].mxu0 %v1038_v53  ;;  %v1073_v7 = vpack.c.bf16 %v1064_v16, %v1063_v17  ;;  %v7879_v6 = vld [vmem:[#allocation2 + $0x124] sm:$0xff]  ;;  %v7881_v32 = vld [vmem:[#allocation2 + $0x134] sm:$0xff] }
 0x26c   :  { %v7848_v13 = vadd.f32 %v5714_v2, %v3222_v41  ;;  %v3225_v57 = vadd.f32 %v5653_v33, %v7683_v47  ;;  %3833 = vmatprep.mubr.bf16.mxu1 %v1007_v59  ;;  %3930 = vmatprep.mubr.bf16.mxu0 %v1072_v37  ;;  %v7883_v59 = vld [vmem:[#allocation2 + $0x153] sm:$0xff] }
 0x26d   :  { %6330 = vmatprep.subr.bf16.mxu0 %v6717_v56 }
 0x26e   :  { %v7855_v50 = vadd.f32 %v5717_v22, %v3225_v57  ;;  %v5654_v62 = vpop.f32.mrb[8].mxu1  ;;  %v5718_v5 = vpop.f32.mrb[24].mxu0 }
 0x26f   :  { %v5655_v0 = vpop.f32.mrb[9].mxu1  ;;  %v5719_v14 = vpop.f32.mrb[25].mxu0 }
 0x270   :  { %v5656_v46 = vadd.f32 %v5655_v0, %v5654_v62  ;;  %v5720_v51 = vadd.f32 %v5719_v14, %v5718_v5  ;;  %v5657_v40 = vpop.f32.mrb[10].mxu1  ;;  %v5721_v34 = vpop.f32.mrb[26].mxu0  ;;  %v976_v62 = vpack.c.bf16 %v7877_v38, %v7873_v36  ;;  %v1040_v5 = vpack.c.bf16 %v7881_v32, %v7879_v6 }
 0x271   :  { %v5658_v10 = vpop.f32.mrb[11].mxu1  ;;  %v5722_v43 = vpop.f32.mrb[27].mxu0  ;;  %v1074_v0 = vpack.c.bf16 %v1066_v31, %v7789_v35  ;;  %v7898_v35 = vld [vmem:[#allocation2 + $0x142] sm:$0xff] }
 0x272   :  { %v3230_v12 = vadd.f32 %v5656_v46, %v7683_v47  ;;  %v5659_v48 = vadd.f32 %v5658_v10, %v5657_v40  ;;  %v5723_v55 = vadd.f32 %v5722_v43, %v5721_v34  ;;  %v1009_v46 = vpack.c.bf16 %v7883_v59, %v7787_v19 }
 0x273   :  { %3834 = vmatmul.mubr.bf16.gmra.mrb[116].mxu1 %v975_v24  ;;  %3931 = vmatmul.mubr.bf16.gmra.mrb[132].mxu0 %v1039_v1  ;;  %v7900_v24 = vld [vmem:[#allocation2 + $0x152] sm:$0xff] }
 0x274   :  { %v7870_v3 = vadd.f32 %v5720_v51, %v3230_v12  ;;  %v3233_v11 = vadd.f32 %v5659_v48, %v7683_v47  ;;  %3841 = vmatprep.mubr.bf16.mxu1 %v1008_v15  ;;  %3938 = vmatprep.mubr.bf16.mxu0 %v1073_v7  ;;  %v7902_v1 = vld [vmem:[#allocation2 + $0x154] sm:$0xff]  ;;  %v1180_v48 = vld [vmem:[#allocation2 + $0x44] sm:$0xff] }
 0x275   :  { %v1179_v12 = vld [vmem:[#allocation2 + $0x34] sm:$0xff] }
 0x276   :  { %v7875_v2 = vadd.f32 %v5723_v55, %v3233_v11  ;;  %v5660_v25 = vpop.f32.mrb[12].mxu1  ;;  %v5724_v8 = vpop.f32.mrb[28].mxu0 }
 0x277   :  { %v5661_v54 = vpop.f32.mrb[13].mxu1  ;;  %v5725_v53 = vpop.f32.mrb[29].mxu0 }
 0x278   :  { %v5662_v37 = vadd.f32 %v5661_v54, %v5660_v25  ;;  %v5726_v56 = vadd.f32 %v5725_v53, %v5724_v8  ;;  %v5663_v41 = vpop.f32.mrb[14].mxu1  ;;  %v5727_v33 = vpop.f32.mrb[30].mxu0  ;;  %v977_v54 = vpack.c.bf16 %v7900_v24, %v7898_v35  ;;  %v1041_v53 = vpack.c.bf16 %v7902_v1, %v7777_v39 }
 0x279   :  { %v5664_v22 = vpop.f32.mrb[15].mxu1  ;;  %v5728_v57 = vpop.f32.mrb[31].mxu0 }
 0x27a   :  { %v3238_v14 = vadd.f32 %v5662_v37, %v7683_v47  ;;  %v5665_v17 = vadd.f32 %v5664_v22, %v5663_v41  ;;  %v5729_v16 = vadd.f32 %v5728_v57, %v5727_v33  ;;  %v1131_v37 = vpack.c.bf16 %v7804_v20, %v7796_v61  ;;  %v1147_v61 = vld [vmem:[#allocation2 + $0x33] sm:$0xff] }
 0x27b   :  { %3842 = vmatmul.mubr.bf16.gmra.mrb[120].mxu1 %v976_v62  ;;  %3939 = vmatmul.mubr.bf16.gmra.mrb[136].mxu0 %v1040_v5  ;;  %v1195_v22 = vpack.c.bf16 %v1180_v48, %v1179_v12  ;;  %v1182_v12 = vld [vmem:[#allocation2 + $0x64] sm:$0xff] }
 0x27c   :  { %v7893_v51 = vadd.f32 %v5726_v56, %v3238_v14  ;;  %v3241_v40 = vadd.f32 %v5665_v17, %v7683_v47  ;;  %3849 = vmatprep.mubr.bf16.mxu1 %v1009_v46  ;;  %3946 = vmatprep.mubr.bf16.mxu0 %v1074_v0  ;;  %v1083_v14 = vld [vmem:[#allocation2 + $0x31] sm:$0xff]  ;;  %v7916_v17 = vld [vmem:[#allocation2 + $0x41] sm:$0xff] }
 0x27e   :  { %v7896_v34 = vadd.f32 %v5729_v16, %v3241_v40  ;;  %v5666_v10 = vpop.f32.mrb[16].mxu1  ;;  %v5730_v43 = vpop.f32.mrb[32].mxu0 }
 0x27f   :  { %v5667_v15 = vpop.f32.mrb[17].mxu1  ;;  %v5731_v19 = vpop.f32.mrb[33].mxu0 }
 0x280   :  { %v5668_v55 = vadd.f32 %v5667_v15, %v5666_v10  ;;  %v5669_v7 = vpop.f32.mrb[18].mxu1  ;;  %v5732_v11 = vadd.f32 %v5731_v19, %v5730_v43  ;;  %v5733_v31 = vpop.f32.mrb[34].mxu0  ;;  %v6709_v15 = vld [vmem:[#allocation4 + $0x500] sm:$0xff]   ;;  %v1181_v19 = vld [vmem:[#allocation2 + $0x54] sm:$0xff] }
 0x281   :  { %v5670_v25 = vpop.f32.mrb[19].mxu1  ;;  %v5734_v8 = vpop.f32.mrb[35].mxu0 }
 0x282   :  { %v3246_v56 = vadd.f32 %v5668_v55, %v7683_v47  ;;  %v5671_v41 = vadd.f32 %v5670_v25, %v5669_v7  ;;  %v5735_v33 = vadd.f32 %v5734_v8, %v5733_v31  ;;  %v1099_v7 = vpack.c.bf16 %v7916_v17, %v1083_v14  ;;  %v6710_v31 = vld [vmem:[#allocation4 + $0x548] sm:$0xff]  }
 0x283   :  { %3850 = vmatmul.mubr.bf16.gmra.mrb[124].mxu1 %v977_v54  ;;  %3947 = vmatmul.mubr.bf16.gmra.mrb[140].mxu0 %v1041_v53  ;;  %v1132_v53 = vpack.c.bf16 %v7816_v23, %v7806_v52 }
 0x284   :  { %v3249_v57 = vadd.f32 %v5671_v41, %v7683_v47  ;;  %v7912_v62 = vadd.f32 %v5732_v11, %v3246_v56  ;;  %3987 = vmatprep.mubr.bf16.mxu1 %v1131_v37  ;;  %4084 = vmatprep.mubr.bf16.mxu0 %v1195_v22  ;;  %v1163_v11 = vpack.c.bf16 %v7798_v63, %v1147_v61  ;;  %v6719_v37 = vld [vmem:[#allocation4 + $0x580] sm:$0xff]   ;;  %v6720_v41 = vld [vmem:[#allocation4 + $0x5c8] sm:$0xff]   ;;  %v7932_v61 = vld [vmem:[#allocation2 + $0x53] sm:$0xff] }
 0x285   :  { %v1196_v56 = vpack.c.bf16 %v1182_v12, %v1181_v19  ;;  %v6711_v63 = vld [vmem:[#allocation4 + $0x508] sm:$0xff]  }
 0x286   :  { %v7914_v5 = vadd.f32 %v5735_v33, %v3249_v57  ;;  %v5672_v0 = vpop.f32.mrb[20].mxu1  ;;  %v5736_v39 = vpop.f32.mrb[36].mxu0  ;;  %v7926_v57 = vld [vmem:[#allocation2 + $0x51] sm:$0xff] }
 0x287   :  { %v5673_v20 = vpop.f32.mrb[21].mxu1  ;;  %v5737_v16 = vpop.f32.mrb[37].mxu0 }
 0x288   :  { %v5674_v46 = vadd.f32 %v5673_v20, %v5672_v0  ;;  %v5738_v40 = vadd.f32 %v5737_v16, %v5736_v39  ;;  %v5675_v10 = vpop.f32.mrb[22].mxu1  ;;  %v5739_v43 = vpop.f32.mrb[38].mxu0  ;;  %v7928_v0 = vld [vmem:[#allocation2 + $0x61] sm:$0xff]  ;;  %v6712_v39 = vld [vmem:[#allocation4 + $0x550] sm:$0xff]  }
 0x289   :  { %v5676_v48 = vpop.f32.mrb[23].mxu1  ;;  %v5740_v55 = vpop.f32.mrb[39].mxu0  ;;  %v7934_v20 = vld [vmem:[#allocation2 + $0x72] sm:$0xff]  ;;  %v6721_v16 = vld [vmem:[#allocation4 + $0x588] sm:$0xff]  }
 0x28a   :  { %v3254_v25 = vadd.f32 %v5674_v46, %v7683_v47  ;;  %v5677_v8 = vadd.f32 %v5676_v48, %v5675_v10  ;;  %v5741_v54 = vadd.f32 %v5740_v55, %v5739_v43  ;;  %v1183_v10 = vld [vmem:[#allocation2 + $0x74] sm:$0xff]  ;;  %v1184_v43 = vld [vmem:[#allocation2 + $0x84] sm:$0xff] }
 0x28b   :  { %3988 = vmatmul.mubr.bf16.vlgmr.msra.gmra.mrb[128].mxu1 %v1099_v7  ;;  %4085 = vmatmul.mubr.bf16.vlgmr.msra.gmra.mrb[144].mxu0 %v1163_v11  ;;  %v1100_v11 = vpack.c.bf16 %v7928_v0, %v7926_v57 }
 0x28c   :  { %v7923_v33 = vadd.f32 %v5738_v40, %v3254_v25  ;;  %v3257_v22 = vadd.f32 %v5677_v8, %v7683_v47  ;;  %6267 = vmatpush3.bf16.msra.mxu1 %v6709_v15  ;;  %3995 = vmatprep.mubr.bf16.mxu1 %v1132_v53  ;;  %v1133_v25 = vpack.c.bf16 %v7826_v49, %v7934_v20  ;;  %v6713_v8 = vld [vmem:[#allocation4 + $0x510] sm:$0xff]  }
 0x28d   :  { %4092 = vmatprep.mubr.bf16.mxu0 %v1196_v56  ;;  %6268 = vmatprep.subr.bf16.mxu1 %v6710_v31  ;;  %v1164_v31 = vpack.c.bf16 %v7808_v18, %v7932_v61  ;;  %v7946_v49 = vld [vmem:[#allocation2 + $0x71] sm:$0xff] }
 0x28e   :  { %v7930_v52 = vadd.f32 %v5741_v54, %v3257_v22  ;;  %v5678_v23 = vpop.f32.mrb[24].mxu1  ;;  %v5742_v14 = vpop.f32.mrb[40].mxu0  ;;  %6331 = vmatpush3.bf16.msra.mxu0 %v6719_v37  ;;  %v6724_v54 = vld [vmem:[#allocation4 + $0x5d0] sm:$0xff]   ;;  %v6714_v22 = vld [vmem:[#allocation4 + $0x558] sm:$0xff]  }
 0x28f   :  { %v5679_v46 = vpop.f32.mrb[25].mxu1  ;;  %v5743_v40 = vpop.f32.mrb[41].mxu0  ;;  %6332 = vmatprep.subr.bf16.mxu0 %v6720_v41  ;;  %v1197_v41 = vpack.c.bf16 %v1184_v43, %v1183_v10  ;;  %v7952_v10 = vld [vmem:[#allocation2 + $0x73] sm:$0xff] }
 0x290   :  { %v5680_v15 = vadd.f32 %v5679_v46, %v5678_v23  ;;  %v5744_v19 = vadd.f32 %v5743_v40, %v5742_v14  ;;  %v5681_v12 = vpop.f32.mrb[26].mxu1  ;;  %v5745_v48 = vpop.f32.mrb[42].mxu0  ;;  %6269 = vmatpush3.bf16.msra.mxu1 %v6711_v63  ;;  %v6725_v63 = vld [vmem:[#allocation4 + $0x590] sm:$0xff]   ;;  %v6726_v23 = vld [vmem:[#allocation4 + $0x5d8] sm:$0xff]   ;;  %v1186_v46 = vld [vmem:[#allocation2 + $0xa4] sm:$0xff] }
 0x291   :  { %v5682_v55 = vpop.f32.mrb[27].mxu1  ;;  %v5746_v7 = vpop.f32.mrb[43].mxu0  ;;  %6270 = vmatprep.subr.bf16.mxu1 %v6712_v39  ;;  %v7948_v39 = vld [vmem:[#allocation2 + $0xa2] sm:$0xff] }
 0x292   :  { %v3262_v53 = vadd.f32 %v5680_v15, %v7683_v47  ;;  %v5683_v37 = vadd.f32 %v5682_v55, %v5681_v12  ;;  %v5747_v56 = vadd.f32 %v5746_v7, %v5745_v48  ;;  %6333 = vmatpush3.bf16.msra.mxu0 %v6721_v16  ;;  %8952 = vst [vmem:[#allocation7_spill] sm:$0xff] %v7948_v39  ;;  %v7950_v40 = vld [vmem:[#allocation2 + $0x81] sm:$0xff]  ;;  %v6715_v16 = vld [vmem:[#allocation4 + $0x518] sm:$0xff]  }
 0x293   :  { %3996 = vmatmul.mubr.bf16.gmra.mrb[132].mxu1 %v1100_v11  ;;  %4093 = vmatmul.mubr.bf16.gmra.mrb[148].mxu0 %v1164_v31  ;;  %v7956_v12 = vld [vmem:[#allocation2 + $0x83] sm:$0xff]  ;;  %v6727_v48 = vld [vmem:[#allocation4 + $0x598] sm:$0xff]  }
 0x294   :  { %v7943_v14 = vadd.f32 %v5744_v19, %v3262_v53  ;;  %v3265_v18 = vadd.f32 %v5683_v37, %v7683_v47  ;;  %4003 = vmatprep.mubr.bf16.mxu1 %v1133_v25  ;;  %4100 = vmatprep.mubr.bf16.mxu0 %v1197_v41  ;;  %8954 = vst [vmem:[#allocation9_spill] sm:$0xff] %v7956_v12  ;;  %v6716_v47 = vld [vmem:[#allocation4 + $0x560] sm:$0xff]  }
 0x295   :  { %6271 = vmatpush3.bf16.msra.mxu1 %v6713_v8  ;;  %6334 = vmatprep.subr.bf16.mxu0 %v6724_v54  ;;  %v1101_v54 = vpack.c.bf16 %v7950_v40, %v7946_v49  ;;  %v1134_v41 = vpack.c.bf16 %v7948_v39, %v7828_v21 }
 0x296   :  { %v7954_v43 = vadd.f32 %v5747_v56, %v3265_v18  ;;  %v5684_v15 = vpop.f32.mrb[28].mxu1  ;;  %v5748_v19 = vpop.f32.mrb[44].mxu0  ;;  %6272 = vmatprep.subr.bf16.mxu1 %v6714_v22  ;;  %6335 = vmatpush3.bf16.msra.mxu0 %v6725_v63  ;;  %v1165_v56 = vpack.c.bf16 %v7956_v12, %v7952_v10  ;;  %v1198_v22 = vpack.c.bf16 %v1186_v46, %v7830_v27  ;;  %v6718_v63 = vld [vmem:[#allocation4 + $0x520] sm:$0xff]   ;;  %v6732_v12 = vld [vmem:[#allocation4 + $0x5e8] sm:$0xff]  }
 0x297   :  { %v5685_v55 = vpop.f32.mrb[29].mxu1  ;;  %v5749_v7 = vpop.f32.mrb[45].mxu0  ;;  %6336 = vmatprep.subr.bf16.mxu0 %v6726_v23  ;;  %v6730_v23 = vld [vmem:[#allocation4 + $0x5e0] sm:$0xff]  }
 0x298   :  { %8953 = vst [vmem:[#allocation8_spill] sm:$0xff] %v7954_v43  ;;  %v5686_v11 = vadd.f32 %v5685_v55, %v5684_v15  ;;  %v5750_v31 = vadd.f32 %v5749_v7, %v5748_v19  ;;  %v5687_v25 = vpop.f32.mrb[30].mxu1  ;;  %v5751_v53 = vpop.f32.mrb[46].mxu0  ;;  %v6894_v18 = vld [vmem:[%s8938_s6] ss:$0 sm:$0xff]  ;;  %v6722_v7 = vld [vmem:[#allocation4 + $0x568] sm:$0xff]  }
 0x299   :  { %v5688_v8 = vpop.f32.mrb[31].mxu1  ;;  %v5752_v37 = vpop.f32.mrb[47].mxu0  ;;  %6273 = vmatpush3.bf16.msra.mxu1 %v6715_v16  ;;  %v6731_v43 = vld [vmem:[#allocation4 + $0x5a0] sm:$0xff]  }
 0x29a   :  { %v3270_v15 = vadd.f32 %v6894_v18, %v5686_v11  ;;  %v5689_v19 = vadd.f32 %v5688_v8, %v5687_v25  ;;  %v5753_v55 = vadd.f32 %v5752_v37, %v5751_v53  ;;  %6274 = vmatprep.subr.bf16.mxu1 %v6716_v47  ;;  %6337 = vmatpush3.bf16.msra.mxu0 %v6727_v48  ;;  %v7970_v46 = vld [vmem:[#allocation2 + $0xa1] sm:$0xff]  ;;  %v7976_v53 = vld [vmem:[#allocation2 + $0x91] sm:$0xff] }
 0x29b   :  { %4004 = vmatmul.mubr.bf16.gmra.mrb[136].mxu1 %v1101_v54  ;;  %4101 = vmatmul.mubr.bf16.gmra.mrb[152].mxu0 %v1165_v56  ;;  %v7972_v16 = vld [vmem:[#allocation2 + $0xa3] sm:$0xff]  ;;  %v6728_v8 = vld [vmem:[#allocation4 + $0x570] sm:$0xff]  }
 0x29c   :  { %v7968_v21 = vadd.f32 %v5750_v31, %v3270_v15  ;;  %v3273_v27 = vadd.f32 %v6894_v18, %v5689_v19  ;;  %4011 = vmatprep.mubr.bf16.mxu1 %v1134_v41  ;;  %4108 = vmatprep.mubr.bf16.mxu0 %v1198_v22  ;;  %v6723_v11 = vld [vmem:[#allocation4 + $0x528] sm:$0xff]   ;;  %v1166_v19 = vpack.c.bf16 %v7972_v16, %v7818_v45  ;;  %v6738_v45 = vld [vmem:[#allocation4 + $0x5f8] sm:$0xff]  }
 0x29d   :  { %6275 = vmatpush3.bf16.msra.mxu1 %v6718_v63  ;;  %6338 = vmatprep.subr.bf16.mxu0 %v6730_v23  ;;  %v6733_v31 = vld [vmem:[#allocation4 + $0x5a8] sm:$0xff]   ;;  %v1102_v23 = vpack.c.bf16 %v7970_v46, %v7976_v53 }
 0x29e   :  { %v7974_v25 = vadd.f32 %v5753_v55, %v3273_v27  ;;  %v5770_v47 = vpop.f32.mrb[32].mxu1  ;;  %v5834_v48 = vpop.f32.mrb[48].mxu0  ;;  %6276 = vmatprep.subr.bf16.mxu1 %v6722_v7  ;;  %6339 = vmatpush3.bf16.msra.mxu0 %v6731_v43  ;;  %v1135_v55 = vpack.c.bf16 %v7851_v28, %v7837_v29  ;;  %v1199_v43 = vpack.c.bf16 %v7857_v44, %v7839_v60  ;;  %v6736_v7 = vld [vmem:[#allocation4 + $0x5f0] sm:$0xff]   ;;  %v7990_v28 = vld [vmem:[#allocation2 + $0x101] sm:$0xff] }
 0x29f   :  { %v5771_v37 = vpop.f32.mrb[33].mxu1  ;;  %v5835_v54 = vpop.f32.mrb[49].mxu0  ;;  %6340 = vmatprep.subr.bf16.mxu0 %v6732_v12  ;;  %v6729_v12 = vld [vmem:[#allocation4 + $0x530] sm:$0xff]  }
 0x2a0   :  { %v5772_v56 = vadd.f32 %v5771_v37, %v5770_v47  ;;  %v5836_v41 = vadd.f32 %v5835_v54, %v5834_v48  ;;  %v5773_v22 = vpop.f32.mrb[34].mxu1  ;;  %v5837_v18 = vpop.f32.mrb[50].mxu0  ;;  %v6734_v37 = vld [vmem:[#allocation4 + $0x578] sm:$0xff]   ;;  %v6737_v54 = vld [vmem:[#allocation4 + $0x5b0] sm:$0xff]  }
 0x2a1   :  { %v5774_v63 = vpop.f32.mrb[35].mxu1  ;;  %v5838_v15 = vpop.f32.mrb[51].mxu0  ;;  %6277 = vmatpush3.bf16.msra.mxu1 %v6723_v11  ;;  %v1091_v60 = vld [vmem:[#allocation2 + $0xf1] sm:$0xff] }
 0x2a2   :  { %v3408_v27 = vadd.f32 %v5772_v56, %v7691_v4  ;;  %v5775_v47 = vadd.f32 %v5774_v63, %v5773_v22  ;;  %v5839_v48 = vadd.f32 %v5838_v15, %v5837_v18  ;;  %6278 = vmatprep.subr.bf16.mxu1 %v6728_v8  ;;  %6341 = vmatpush3.bf16.msra.mxu0 %v6733_v31  ;;  %v6735_v4 = vld [vmem:[#allocation4 + $0x538] sm:$0xff]  }
 0x2a3   :  { %4012 = vmatmul.mubr.bf16.gmra.mrb[140].mxu1 %v1102_v23  ;;  %4109 = vmatmul.mubr.bf16.gmra.mrb[156].mxu0 %v1166_v19  ;;  %v1155_v31 = vld [vmem:[#allocation2 + $0xf3] sm:$0xff] }
 0x2a4   :  { %v7987_v39 = vadd.f32 %v5836_v41, %v3408_v27  ;;  %v3411_v29 = vadd.f32 %v5775_v47, %v7697_v30  ;;  %4019 = vmatprep.mubr.bf16.mxu1 %v1135_v55  ;;  %4116 = vmatprep.mubr.bf16.mxu0 %v1199_v43  ;;  %v6739_v56 = vld [vmem:[#allocation4 + $0x5b8] sm:$0xff]   ;;  %v7994_v41 = vld [vmem:[#allocation4 + $0x600] sm:$0xff]   ;;  %v1103_v43 = vpack.c.bf16 %v7990_v28, %v1091_v60 }
 0x2a5   :  { %6279 = vmatpush3.bf16.msra.mxu1 %v6729_v12  ;;  %6342 = vmatprep.subr.bf16.mxu0 %v6736_v7  ;;  %v1167_v12 = vpack.c.bf16 %v7841_v26, %v1155_v31  ;;  %v1136_v7 = vpack.c.bf16 %v7873_v36, %v7853_v42  ;;  %v1200_v27 = vpack.c.bf16 %v7879_v6, %v7859_v9  ;;  %v8009_v6 = vld [vmem:[#allocation2 + $0x111] sm:$0xff] }
 0x2a6   :  { %v7992_v44 = vadd.f32 %v5839_v48, %v3411_v29  ;;  %v5776_v11 = vpop.f32.mrb[36].mxu1  ;;  %v5840_v8 = vpop.f32.mrb[52].mxu0  ;;  %6280 = vmatprep.subr.bf16.mxu1 %v6734_v37  ;;  %6343 = vmatpush3.bf16.msra.mxu0 %v6737_v54 }
 0x2a7   :  { %v5777_v22 = vpop.f32.mrb[37].mxu1  ;;  %v5841_v30 = vpop.f32.mrb[53].mxu0  ;;  %6344 = vmatprep.subr.bf16.mxu0 %v6738_v45  ;;  %v8013_v45 = vld [vmem:[#allocation2 + $0x113] sm:$0xff] }
 0x2a8   :  { %v5778_v18 = vadd.f32 %v5777_v22, %v5776_v11  ;;  %v5842_v63 = vadd.f32 %v5841_v30, %v5840_v8  ;;  %v5779_v15 = vpop.f32.mrb[38].mxu1  ;;  %v5843_v23 = vpop.f32.mrb[54].mxu0 }
 0x2a9   :  { %v5780_v19 = vpop.f32.mrb[39].mxu1  ;;  %v5844_v55 = vpop.f32.mrb[55].mxu0  ;;  %6281 = vmatpush3.bf16.msra.mxu1 %v6735_v4  ;;  %v8015_v4 = vld [vmem:[#allocation2 + $0x144] sm:$0xff] }
 0x2aa   :  { %v3416_v47 = vadd.f32 %v5778_v18, %v7848_v13  ;;  %v5781_v48 = vadd.f32 %v5780_v19, %v5779_v15  ;;  %v5845_v37 = vadd.f32 %v5844_v55, %v5843_v23  ;;  %6345 = vmatpush3.bf16.msra.mxu0 %v6739_v56  ;;  %6453 = vmatprep.subr.bf16.mxu1 %v7994_v41  ;;  %v8011_v13 = vld [vmem:[#allocation2 + $0x121] sm:$0xff] }
 0x2ab   :  { %4020 = vmatmul.mubr.bf16.gmra.mrb[144].mxu1 %v1103_v43  ;;  %4117 = vmatmul.mubr.bf16.gmra.mrb[160].mxu0 %v1167_v12  ;;  %v1104_v30 = vpack.c.bf16 %v8011_v13, %v8009_v6  ;;  %v1168_v18 = vpack.c.bf16 %v7861_v58, %v8013_v45  ;;  %v1201_v55 = vpack.c.bf16 %v8015_v4, %v7881_v32  ;;  %v8031_v58 = vld [vmem:[#allocation2 + $0x162] sm:$0xff] }
 0x2ac   :  { %v8004_v54 = vadd.f32 %v5842_v63, %v3416_v47  ;;  %v3419_v26 = vadd.f32 %v5781_v48, %v7855_v50  ;;  %4027 = vmatprep.mubr.bf16.mxu1 %v1136_v7  ;;  %4124 = vmatprep.mubr.bf16.mxu0 %v1200_v27  ;;  %v1137_v63 = vpack.c.bf16 %v7898_v35, %v7877_v38  ;;  %v8029_v7 = vld [vmem:[#allocation2 + $0x131] sm:$0xff]  ;;  %v8035_v27 = vld [vmem:[#allocation2 + $0x141] sm:$0xff] }
 0x2ad   :  { %v8037_v47 = vld [vmem:[#allocation2 + $0x133] sm:$0xff]  ;;  %v8039_v32 = vld [vmem:[#allocation2 + $0x143] sm:$0xff] }
 0x2ae   :  { %v8007_v42 = vadd.f32 %v5845_v37, %v3419_v26  ;;  %v5782_v36 = vpop.f32.mrb[40].mxu1  ;;  %v5846_v9 = vpop.f32.mrb[56].mxu0  ;;  %v8041_v26 = vld [vmem:[#allocation2 + $0x164] sm:$0xff] }
 0x2af   :  { %v5783_v29 = vpop.f32.mrb[41].mxu1  ;;  %v5847_v60 = vpop.f32.mrb[57].mxu0 }
 0x2b0   :  { %v5784_v11 = vadd.f32 %v5783_v29, %v5782_v36  ;;  %v5848_v8 = vadd.f32 %v5847_v60, %v5846_v9  ;;  %v5785_v31 = vpop.f32.mrb[42].mxu1  ;;  %v5849_v50 = vpop.f32.mrb[58].mxu0 }
 0x2b1   :  { %v5786_v56 = vpop.f32.mrb[43].mxu1  ;;  %v5850_v22 = vpop.f32.mrb[59].mxu0 }
 0x2b2   :  { %v3424_v15 = vadd.f32 %v5784_v11, %v7870_v3  ;;  %v5787_v23 = vadd.f32 %v5786_v56, %v5785_v31  ;;  %v5851_v19 = vadd.f32 %v5850_v22, %v5849_v50  ;;  %v1169_v31 = vpack.c.bf16 %v8039_v32, %v8037_v47 }
 0x2b3   :  { %4028 = vmatmul.mubr.bf16.gmra.mrb[148].mxu1 %v1104_v30  ;;  %4125 = vmatmul.mubr.bf16.gmra.mrb[164].mxu0 %v1168_v18  ;;  %v1138_v50 = vpack.c.bf16 %v8031_v58, %v7900_v24  ;;  %v1202_v18 = vpack.c.bf16 %v8041_v26, %v7902_v1  ;;  %v8057_v24 = vld [vmem:[#allocation2 + $0x151] sm:$0xff] }
 0x2b4   :  { %v8026_v43 = vadd.f32 %v5848_v8, %v3424_v15  ;;  %v3427_v12 = vadd.f32 %v5787_v23, %v7875_v2  ;;  %4035 = vmatprep.mubr.bf16.mxu1 %v1137_v63  ;;  %4132 = vmatprep.mubr.bf16.mxu0 %v1201_v55  ;;  %v1105_v8 = vpack.c.bf16 %v8035_v27, %v8029_v7 }
 0x2b6   :  { %v8033_v38 = vadd.f32 %v5851_v19, %v3427_v12  ;;  %v5788_v3 = vpop.f32.mrb[44].mxu1  ;;  %v5852_v35 = vpop.f32.mrb[60].mxu0  ;;  %v8061_v12 = vld [vmem:[#allocation2 + $0x163] sm:$0xff] }
 0x2b7   :  { %v5789_v48 = vpop.f32.mrb[45].mxu1  ;;  %v5853_v37 = vpop.f32.mrb[61].mxu0 }
 0x2b8   :  { %v5790_v2 = vadd.f32 %v5789_v48, %v5788_v3  ;;  %v5854_v36 = vadd.f32 %v5853_v37, %v5852_v35  ;;  %v5791_v9 = vpop.f32.mrb[46].mxu1  ;;  %v5855_v29 = vpop.f32.mrb[62].mxu0  ;;  %v1308_v35 = vld [vmem:[#allocation2 + $0x43] sm:$0xff] }
 0x2b9   :  { %v5792_v60 = vpop.f32.mrb[47].mxu1  ;;  %v5856_v11 = vpop.f32.mrb[63].mxu0 }
 0x2ba   :  { %v3432_v56 = vadd.f32 %v5790_v2, %v7893_v51  ;;  %v5793_v22 = vadd.f32 %v5792_v60, %v5791_v9  ;;  %v5857_v30 = vadd.f32 %v5856_v11, %v5855_v29  ;;  %v8059_v51 = vld [vmem:[#allocation2 + $0x161] sm:$0xff]  ;;  %v1170_v60 = vpack.c.bf16 %v8061_v12, %v7883_v59 }
 0x2bb   :  { %4036 = vmatmul.mubr.bf16.gmra.mrb[152].mxu1 %v1105_v8  ;;  %4133 = vmatmul.mubr.bf16.gmra.mrb[168].mxu0 %v1169_v31  ;;  %v1106_v29 = vpack.c.bf16 %v8059_v51, %v8057_v24  ;;  %v1260_v11 = vpack.c.bf16 %v7926_v57, %v7916_v17  ;;  %v1213_v17 = vld [vmem:[#allocation2 + $0x50] sm:$0xff]  ;;  %v1276_v57 = vld [vmem:[#allocation2 + $0x42] sm:$0xff] }
 0x2bc   :  { %v8052_v63 = vadd.f32 %v5854_v36, %v3432_v56  ;;  %v3435_v15 = vadd.f32 %v5793_v22, %v7896_v34  ;;  %4043 = vmatprep.mubr.bf16.mxu1 %v1138_v50  ;;  %4140 = vmatprep.mubr.bf16.mxu0 %v1202_v18  ;;  %v1324_v56 = vpack.c.bf16 %v7932_v61, %v1308_v35  ;;  %v1212_v18 = vld [vmem:[#allocation2 + $0x40] sm:$0xff] }
 0x2be   :  { %v8055_v23 = vadd.f32 %v5857_v30, %v3435_v15  ;;  %v5794_v19 = vpop.f32.mrb[48].mxu1  ;;  %v5858_v55 = vpop.f32.mrb[64].mxu0 }
 0x2bf   :  { %v5795_v3 = vpop.f32.mrb[49].mxu1  ;;  %v5859_v1 = vpop.f32.mrb[65].mxu0 }
 0x2c0   :  { %v5796_v48 = vadd.f32 %v5795_v3, %v5794_v19  ;;  %v5860_v37 = vadd.f32 %v5859_v1, %v5858_v55  ;;  %v5797_v2 = vpop.f32.mrb[50].mxu1  ;;  %v5861_v36 = vpop.f32.mrb[66].mxu0 }
 0x2c1   :  { %v5798_v34 = vpop.f32.mrb[51].mxu1  ;;  %v5862_v9 = vpop.f32.mrb[67].mxu0 }
 0x2c2   :  { %v3440_v8 = vadd.f32 %v5796_v48, %v7912_v62  ;;  %v5799_v31 = vadd.f32 %v5798_v34, %v5797_v2  ;;  %v5863_v50 = vadd.f32 %v5862_v9, %v5861_v36  ;;  %v1277_v62 = vld [vmem:[#allocation2 + $0x52] sm:$0xff]  ;;  %v6741_v9 = vld [vmem:[#allocation4 + $0x608] sm:$0xff]  }
 0x2c3   :  { %4044 = vmatmul.mubr.bf16.gmra.mrb[156].mxu1 %v1106_v29  ;;  %4141 = vmatmul.mubr.bf16.gmra.mrb[172].mxu0 %v1170_v60  ;;  %v1292_v34 = vpack.c.bf16 %v1277_v62, %v1276_v57 }
 0x2c4   :  { %v8071_v22 = vadd.f32 %v5860_v37, %v3440_v8  ;;  %v3443_v30 = vadd.f32 %v5799_v31, %v7914_v5  ;;  %4181 = vmatprep.mubr.bf16.mxu1 %v1260_v11  ;;  %4278 = vmatprep.mubr.bf16.mxu0 %v1324_v56  ;;  %v1310_v37 = vld [vmem:[#allocation2 + $0x63] sm:$0xff]  ;;  %v1228_v5 = vpack.c.bf16 %v1213_v17, %v1212_v18 }
 0x2c5   :  { %v1261_v8 = vpack.c.bf16 %v7946_v49, %v7928_v0  ;;  %v1325_v31 = vpack.c.bf16 %v7952_v10, %v1310_v37  ;;  %v1215_v0 = vld [vmem:[#allocation2 + $0x70] sm:$0xff]  ;;  %v1278_v49 = vld [vmem:[#allocation2 + $0x62] sm:$0xff] }
 0x2c6   :  { %v8074_v15 = vadd.f32 %v5863_v50, %v3443_v30  ;;  %v5800_v59 = vpop.f32.mrb[52].mxu1  ;;  %v5864_v19 = vpop.f32.mrb[68].mxu0  ;;  %v6742_v30 = vld [vmem:[#allocation4 + $0x610] sm:$0xff]  }
 0x2c7   :  { %v5801_v55 = vpop.f32.mrb[53].mxu1  ;;  %v5865_v3 = vpop.f32.mrb[69].mxu0  ;;  %v1313_v10 = vld [vmem:[#allocation2 + $0x93] sm:$0xff] }
 0x2c8   :  { %v5802_v1 = vadd.f32 %v5801_v55, %v5800_v59  ;;  %v5866_v61 = vadd.f32 %v5865_v3, %v5864_v19  ;;  %v5803_v35 = vpop.f32.mrb[54].mxu1  ;;  %v5867_v48 = vpop.f32.mrb[70].mxu0  ;;  %v1214_v19 = vld [vmem:[#allocation2 + $0x60] sm:$0xff] }
 0x2c9   :  { %v5804_v2 = vpop.f32.mrb[55].mxu1  ;;  %v5868_v36 = vpop.f32.mrb[71].mxu0 }
 0x2ca   :  { %v3448_v29 = vadd.f32 %v5802_v1, %v7923_v33  ;;  %v5805_v60 = vadd.f32 %v5804_v2, %v5803_v35  ;;  %v5869_v11 = vadd.f32 %v5868_v36, %v5867_v48  ;;  %v1293_v35 = vpack.c.bf16 %v7934_v20, %v1278_v49  ;;  %v1216_v20 = vld [vmem:[#allocation2 + $0x80] sm:$0xff] }
 0x2cb   :  { %4182 = vmatmul.mubr.bf16.vlgmr.msra.gmra.mrb[160].mxu1 %v1228_v5  ;;  %4279 = vmatmul.mubr.bf16.vlgmr.msra.gmra.mrb[176].mxu0 %v1292_v34  ;;  %v1262_v48 = vpack.c.bf16 %v7976_v53, %v7950_v40  ;;  %v8955_v5 = vld [vmem:[#allocation9_spill] sm:$0xff] }
 0x2cc   :  { %v8080_v50 = vadd.f32 %v5866_v61, %v3448_v29  ;;  %v3451_v56 = vadd.f32 %v5805_v60, %v7930_v52  ;;  %6454 = vmatpush3.bf16.msra.mxu1 %v7994_v41  ;;  %4189 = vmatprep.mubr.bf16.mxu1 %v1261_v8  ;;  %v1229_v61 = vpack.c.bf16 %v1215_v0, %v1214_v19  ;;  %v6743_v29 = vld [vmem:[#allocation4 + $0x618] sm:$0xff]   ;;  %v1217_v8 = vld [vmem:[#allocation2 + $0x90] sm:$0xff]  ;;  %v6744_v19 = vld [vmem:[#allocation4 + $0x620] sm:$0xff]  }
 0x2cd   :  { %4286 = vmatprep.mubr.bf16.mxu0 %v1325_v31  ;;  %6455 = vmatprep.subr.bf16.mxu1 %v6741_v9  ;;  %v1326_v34 = vpack.c.bf16 %v1313_v10, %v8955_v5  ;;  %v1251_v40 = vld [vmem:[#allocation2 + $0xb1] sm:$0xff] }
 0x2ce   :  { %v8084_v33 = vadd.f32 %v5869_v11, %v3451_v56  ;;  %v5806_v18 = vpop.f32.mrb[56].mxu1  ;;  %v5870_v59 = vpop.f32.mrb[72].mxu0  ;;  %v1315_v53 = vld [vmem:[#allocation2 + $0xb3] sm:$0xff] }
 0x2cf   :  { %v5807_v17 = vpop.f32.mrb[57].mxu1  ;;  %v5871_v57 = vpop.f32.mrb[73].mxu0  ;;  %v1283_v5 = vld [vmem:[#allocation2 + $0xb2] sm:$0xff] }
 0x2d0   :  { %v5808_v62 = vadd.f32 %v5807_v17, %v5806_v18  ;;  %v5872_v55 = vadd.f32 %v5871_v57, %v5870_v59  ;;  %v5809_v3 = vpop.f32.mrb[58].mxu1  ;;  %v5873_v52 = vpop.f32.mrb[74].mxu0  ;;  %6456 = vmatpush3.bf16.msra.mxu1 %v6741_v9  ;;  %v8956_v9 = vld [vmem:[#allocation8_spill] sm:$0xff]  ;;  %v1281_v59 = vld [vmem:[#allocation2 + $0x92] sm:$0xff] }
 0x2d1   :  { %v5810_v41 = vpop.f32.mrb[59].mxu1  ;;  %v5874_v1 = vpop.f32.mrb[75].mxu0  ;;  %6457 = vmatprep.subr.bf16.mxu1 %v6742_v30  ;;  %v1280_v18 = vld [vmem:[#allocation2 + $0x82] sm:$0xff] }
 0x2d2   :  { %v3456_v37 = vadd.f32 %v5808_v62, %v7943_v14  ;;  %v5811_v2 = vadd.f32 %v5810_v41, %v5809_v3  ;;  %v5875_v36 = vadd.f32 %v5874_v1, %v5873_v52  ;;  %v1230_v41 = vpack.c.bf16 %v1217_v8, %v1216_v20 }
 0x2d3   :  { %4190 = vmatmul.mubr.bf16.gmra.mrb[164].mxu1 %v1229_v61  ;;  %4287 = vmatmul.mubr.bf16.gmra.mrb[180].mxu0 %v1293_v35  ;;  %v1294_v1 = vpack.c.bf16 %v1281_v59, %v1280_v18 }
 0x2d4   :  { %v8091_v60 = vadd.f32 %v5872_v55, %v3456_v37  ;;  %v3459_v11 = vadd.f32 %v5811_v2, %v8956_v9  ;;  %4197 = vmatprep.mubr.bf16.mxu1 %v1262_v48  ;;  %4294 = vmatprep.mubr.bf16.mxu0 %v1326_v34  ;;  %v1263_v55 = vpack.c.bf16 %v1251_v40, %v7970_v46  ;;  %v6745_v37 = vld [vmem:[#allocation4 + $0x628] sm:$0xff]   ;;  %v1218_v46 = vld [vmem:[#allocation2 + $0xa0] sm:$0xff]  ;;  %v6746_v9 = vld [vmem:[#allocation4 + $0x630] sm:$0xff]  }
 0x2d5   :  { %6458 = vmatpush3.bf16.msra.mxu1 %v6742_v30  ;;  %v1327_v30 = vpack.c.bf16 %v1315_v53, %v7972_v16  ;;  %v1219_v16 = vld [vmem:[#allocation2 + $0xb0] sm:$0xff]  ;;  %v8957_v40 = vld [vmem:[#allocation7_spill] sm:$0xff] }
 0x2d6   :  { %v8094_v31 = vadd.f32 %v5875_v36, %v3459_v11  ;;  %v5812_v14 = vpop.f32.mrb[60].mxu1  ;;  %v5876_v56 = vpop.f32.mrb[76].mxu0  ;;  %6459 = vmatprep.subr.bf16.mxu1 %v6743_v29  ;;  %v1231_v8 = vpack.c.bf16 %v1219_v16, %v1218_v46  ;;  %v1295_v53 = vpack.c.bf16 %v1283_v5, %v8957_v40 }
 0x2d7   :  { %v5813_v0 = vpop.f32.mrb[61].mxu1  ;;  %v5877_v49 = vpop.f32.mrb[77].mxu0 }
 0x2d8   :  { %v5814_v17 = vadd.f32 %v5813_v0, %v5812_v14  ;;  %v5878_v57 = vadd.f32 %v5877_v49, %v5876_v56  ;;  %v5815_v10 = vpop.f32.mrb[62].mxu1  ;;  %v5879_v62 = vpop.f32.mrb[78].mxu0  ;;  %v1316_v14 = vld [vmem:[#allocation2 + $0x103] sm:$0xff] }
 0x2d9   :  { %v5816_v3 = vpop.f32.mrb[63].mxu1  ;;  %v5880_v52 = vpop.f32.mrb[79].mxu0  ;;  %6460 = vmatpush3.bf16.msra.mxu1 %v6743_v29 }
 0x2da   :  { %v3464_v61 = vadd.f32 %v5814_v17, %v7968_v21  ;;  %v5817_v35 = vadd.f32 %v5816_v3, %v5815_v10  ;;  %v5881_v48 = vadd.f32 %v5880_v52, %v5879_v62  ;;  %6461 = vmatprep.subr.bf16.mxu1 %v6744_v19  ;;  %v1328_v62 = vpack.c.bf16 %v8013_v45, %v1316_v14  ;;  %v1220_v52 = vld [vmem:[#allocation2 + $0x100] sm:$0xff] }
 0x2db   :  { %4198 = vmatmul.mubr.bf16.gmra.mrb[168].mxu1 %v1230_v41  ;;  %4295 = vmatmul.mubr.bf16.gmra.mrb[184].mxu0 %v1294_v1  ;;  %v1221_v41 = vld [vmem:[#allocation2 + $0x110] sm:$0xff]  ;;  %v1284_v1 = vld [vmem:[#allocation2 + $0x102] sm:$0xff] }
 0x2dc   :  { %v8099_v2 = vadd.f32 %v5878_v57, %v3464_v61  ;;  %v3467_v36 = vadd.f32 %v5817_v35, %v7974_v25  ;;  %4205 = vmatprep.mubr.bf16.mxu1 %v1263_v55  ;;  %4302 = vmatprep.mubr.bf16.mxu0 %v1327_v30  ;;  %v6747_v55 = vld [vmem:[#allocation4 + $0x638] sm:$0xff]  }
 0x2dd   :  { %6462 = vmatpush3.bf16.msra.mxu1 %v6744_v19  ;;  %v1264_v19 = vpack.c.bf16 %v8009_v6, %v7990_v28  ;;  %v1285_v61 = vld [vmem:[#allocation2 + $0x112] sm:$0xff] }
 0x2de   :  { %v8102_v34 = vadd.f32 %v5881_v48, %v3467_v36  ;;  %v5898_v29 = vpop.f32.mrb[64].mxu1  ;;  %v5962_v21 = vpop.f32.mrb[80].mxu0  ;;  %6463 = vmatprep.subr.bf16.mxu1 %v6745_v37  ;;  %v1318_v48 = vld [vmem:[#allocation2 + $0x123] sm:$0xff] }
 0x2df   :  { %v5899_v11 = vpop.f32.mrb[65].mxu1  ;;  %v5963_v20 = vpop.f32.mrb[81].mxu0  ;;  %v1329_v40 = vpack.c.bf16 %v8037_v47, %v1318_v48  ;;  %v1259_v48 = vld [vmem:[#allocation2 + $0x171] sm:$0xff] }
 0x2e0   :  { %v5900_v56 = vadd.f32 %v5899_v11, %v5898_v29  ;;  %v5964_v25 = vadd.f32 %v5963_v20, %v5962_v21  ;;  %v5901_v18 = vpop.f32.mrb[66].mxu1  ;;  %v5965_v59 = vpop.f32.mrb[82].mxu0  ;;  %v1232_v29 = vpack.c.bf16 %v1221_v41, %v1220_v52  ;;  %v1296_v21 = vpack.c.bf16 %v1285_v61, %v1284_v1 }
 0x2e1   :  { %v5902_v0 = vpop.f32.mrb[67].mxu1  ;;  %v5966_v49 = vpop.f32.mrb[83].mxu0  ;;  %6464 = vmatpush3.bf16.msra.mxu1 %v6745_v37  ;;  %v1266_v52 = vpack.c.bf16 %v8057_v24, %v8035_v27 }
 0x2e2   :  { %v3602_v17 = vadd.f32 %v5900_v56, %v7987_v39  ;;  %v5903_v57 = vadd.f32 %v5902_v0, %v5901_v18  ;;  %v5967_v10 = vadd.f32 %v5966_v49, %v5965_v59  ;;  %6465 = vmatprep.subr.bf16.mxu1 %v6746_v9  ;;  %v1222_v56 = vld [vmem:[#allocation2 + $0x120] sm:$0xff] }
 0x2e3   :  { %4206 = vmatmul.mubr.bf16.gmra.mrb[172].mxu1 %v1231_v8  ;;  %4303 = vmatmul.mubr.bf16.gmra.mrb[188].mxu0 %v1295_v53  ;;  %v1286_v59 = vld [vmem:[#allocation2 + $0x122] sm:$0xff] }
 0x2e4   :  { %v8109_v30 = vadd.f32 %v5964_v25, %v3602_v17  ;;  %v3605_v3 = vadd.f32 %v5903_v57, %v7992_v44  ;;  %4213 = vmatprep.mubr.bf16.mxu1 %v1264_v19  ;;  %4310 = vmatprep.mubr.bf16.mxu0 %v1328_v62  ;;  %v1321_v19 = vld [vmem:[#allocation2 + $0x153] sm:$0xff] }
 0x2e5   :  { %6466 = vmatpush3.bf16.msra.mxu1 %v6746_v9  ;;  %v1265_v9 = vpack.c.bf16 %v8029_v7, %v8011_v13  ;;  %v1223_v7 = vld [vmem:[#allocation2 + $0x130] sm:$0xff]  ;;  %v1330_v1 = vpack.c.bf16 %v1321_v19, %v8039_v32 }
 0x2e6   :  { %v8112_v28 = vadd.f32 %v5967_v10, %v3605_v3  ;;  %v5904_v6 = vpop.f32.mrb[68].mxu1  ;;  %v5968_v39 = vpop.f32.mrb[84].mxu0  ;;  %6467 = vmatprep.subr.bf16.mxu1 %v6747_v55 }
 0x2e7   :  { %v5905_v45 = vpop.f32.mrb[69].mxu1  ;;  %v5969_v35 = vpop.f32.mrb[85].mxu0 }
 0x2e8   :  { %v5906_v37 = vadd.f32 %v5905_v45, %v5904_v6  ;;  %v5970_v36 = vadd.f32 %v5969_v35, %v5968_v39  ;;  %v5907_v46 = vpop.f32.mrb[70].mxu1  ;;  %v5971_v16 = vpop.f32.mrb[86].mxu0  ;;  %v1224_v35 = vld [vmem:[#allocation2 + $0x140] sm:$0xff] }
 0x2e9   :  { %v5908_v44 = vpop.f32.mrb[71].mxu1  ;;  %v5972_v5 = vpop.f32.mrb[87].mxu0  ;;  %6468 = vmatpush3.bf16.msra.mxu1 %v6747_v55 }
 0x2ea   :  { %v3610_v11 = vadd.f32 %v5906_v37, %v8004_v54  ;;  %v5909_v20 = vadd.f32 %v5908_v44, %v5907_v46  ;;  %v5973_v8 = vadd.f32 %v5972_v5, %v5971_v16  ;;  %v1287_v54 = vld [vmem:[#allocation2 + $0x132] sm:$0xff]  ;;  %v1288_v46 = vld [vmem:[#allocation2 + $0x142] sm:$0xff] }
 0x2eb   :  { %4214 = vmatmul.mubr.bf16.gmra.mrb[176].mxu1 %v1232_v29  ;;  %4311 = vmatmul.mubr.bf16.gmra.mrb[192].mxu0 %v1296_v21  ;;  %v1297_v3 = vpack.c.bf16 %v1287_v54, %v1286_v59  ;;  %v1323_v37 = vld [vmem:[#allocation2 + $0x173] sm:$0xff]  ;;  %v1226_v54 = vld [vmem:[#allocation2 + $0x160] sm:$0xff] }
 0x2ec   :  { %v8118_v53 = vadd.f32 %v5970_v36, %v3610_v11  ;;  %v3613_v14 = vadd.f32 %v5909_v20, %v8007_v42  ;;  %4221 = vmatprep.mubr.bf16.mxu1 %v1265_v9  ;;  %4318 = vmatprep.mubr.bf16.mxu0 %v1329_v40  ;;  %v1233_v42 = vpack.c.bf16 %v1223_v7, %v1222_v56  ;;  %v1289_v16 = vld [vmem:[#allocation2 + $0x152] sm:$0xff] }
 0x2ed   :  { %v1331_v11 = vpack.c.bf16 %v1323_v37, %v8061_v12 }
 0x2ee   :  { %v8121_v25 = vadd.f32 %v5973_v8, %v3613_v14  ;;  %v5910_v18 = vpop.f32.mrb[72].mxu1  ;;  %v5974_v13 = vpop.f32.mrb[88].mxu0  ;;  %v1298_v14 = vpack.c.bf16 %v1289_v16, %v1288_v46 }
 0x2ef   :  { %v5911_v0 = vpop.f32.mrb[73].mxu1  ;;  %v5975_v49 = vpop.f32.mrb[89].mxu0 }
 0x2f0   :  { %v5912_v47 = vadd.f32 %v5911_v0, %v5910_v18  ;;  %v5976_v17 = vadd.f32 %v5975_v49, %v5974_v13  ;;  %v5913_v57 = vpop.f32.mrb[74].mxu1  ;;  %v5977_v10 = vpop.f32.mrb[90].mxu0  ;;  %v1227_v0 = vld [vmem:[#allocation2 + $0x170] sm:$0xff] }
 0x2f1   :  { %v5914_v62 = vpop.f32.mrb[75].mxu1  ;;  %v5978_v55 = vpop.f32.mrb[91].mxu0 }
 0x2f2   :  { %v3618_v6 = vadd.f32 %v5912_v47, %v8026_v43  ;;  %v5915_v39 = vadd.f32 %v5914_v62, %v5913_v57  ;;  %v5979_v41 = vadd.f32 %v5978_v55, %v5977_v10  ;;  %v1225_v43 = vld [vmem:[#allocation2 + $0x150] sm:$0xff]  ;;  %v1340_v57 = vld [vmem:[#allocation2 + $0x44] sm:$0xff] }
 0x2f3   :  { %4222 = vmatmul.mubr.bf16.gmra.mrb[180].mxu1 %v1233_v42  ;;  %4319 = vmatmul.mubr.bf16.gmra.mrb[196].mxu0 %v1297_v3  ;;  %v1234_v40 = vpack.c.bf16 %v1225_v43, %v1224_v35  ;;  %v1341_v10 = vld [vmem:[#allocation2 + $0x54] sm:$0xff] }
 0x2f4   :  { %v8127_v61 = vadd.f32 %v5976_v17, %v3618_v6  ;;  %v3621_v45 = vadd.f32 %v5915_v39, %v8033_v38  ;;  %4229 = vmatprep.mubr.bf16.mxu1 %v1266_v52  ;;  %4326 = vmatprep.mubr.bf16.mxu0 %v1330_v1  ;;  %v1267_v38 = vpack.c.bf16 %v1259_v48, %v8059_v51  ;;  %v1291_v51 = vld [vmem:[#allocation2 + $0x172] sm:$0xff] }
 0x2f5   :  { %v1299_v62 = vpack.c.bf16 %v1291_v51, %v8031_v58  ;;  %v1343_v43 = vld [vmem:[#allocation2 + $0x74] sm:$0xff] }
 0x2f6   :  { %v8130_v36 = vadd.f32 %v5979_v41, %v3621_v45  ;;  %v5916_v27 = vpop.f32.mrb[76].mxu1  ;;  %v5980_v24 = vpop.f32.mrb[92].mxu0  ;;  %v1356_v45 = vpack.c.bf16 %v1341_v10, %v1340_v57 }
 0x2f7   :  { %v5917_v44 = vpop.f32.mrb[77].mxu1  ;;  %v5981_v32 = vpop.f32.mrb[93].mxu0 }
 0x2f8   :  { %v5918_v5 = vadd.f32 %v5917_v44, %v5916_v27  ;;  %v5982_v29 = vadd.f32 %v5981_v32, %v5980_v24  ;;  %v5919_v21 = vpop.f32.mrb[78].mxu1  ;;  %v5983_v9 = vpop.f32.mrb[94].mxu0  ;;  %v1342_v24 = vld [vmem:[#allocation2 + $0x64] sm:$0xff] }
 0x2f9   :  { %v5920_v20 = vpop.f32.mrb[79].mxu1  ;;  %v5984_v8 = vpop.f32.mrb[95].mxu0  ;;  %v1344_v44 = vld [vmem:[#allocation2 + $0x84] sm:$0xff] }
 0x2fa   :  { %v3626_v56 = vadd.f32 %v5918_v5, %v8052_v63  ;;  %v5921_v18 = vadd.f32 %v5920_v20, %v5919_v21  ;;  %v5985_v13 = vadd.f32 %v5984_v8, %v5983_v9  ;;  %v1235_v63 = vpack.c.bf16 %v1227_v0, %v1226_v54 }
 0x2fb   :  { %4230 = vmatmul.mubr.bf16.gmra.mrb[184].mxu1 %v1234_v40  ;;  %4327 = vmatmul.mubr.bf16.gmra.mrb[200].mxu0 %v1298_v14 }
 0x2fc   :  { %v8135_v7 = vadd.f32 %v5982_v29, %v3626_v56  ;;  %v3629_v59 = vadd.f32 %v5921_v18, %v8055_v23  ;;  %4237 = vmatprep.mubr.bf16.mxu1 %v1267_v38  ;;  %4334 = vmatprep.mubr.bf16.mxu0 %v1331_v11  ;;  %v1357_v11 = vpack.c.bf16 %v1343_v43, %v1342_v24  ;;  %v1346_v18 = vld [vmem:[#allocation2 + $0xa4] sm:$0xff]  ;;  %v1353_v24 = vld [vmem:[#allocation2 + $0x154] sm:$0xff] }
 0x2fe   :  { %v8138_v12 = vadd.f32 %v5985_v13, %v3629_v59  ;;  %v5922_v49 = vpop.f32.mrb[80].mxu1  ;;  %v5986_v19 = vpop.f32.mrb[96].mxu0  ;;  %v1347_v13 = vld [vmem:[#allocation2 + $0xb4] sm:$0xff] }
 0x2ff   :  { %v5923_v47 = vpop.f32.mrb[81].mxu1  ;;  %v5987_v17 = vpop.f32.mrb[97].mxu0 }
 0x300   :  { %v5924_v55 = vadd.f32 %v5923_v47, %v5922_v49  ;;  %v5988_v42 = vadd.f32 %v5987_v17, %v5986_v19  ;;  %v5925_v3 = vpop.f32.mrb[82].mxu1  ;;  %v5989_v23 = vpop.f32.mrb[98].mxu0  ;;  %v1359_v19 = vpack.c.bf16 %v1347_v13, %v1346_v18  ;;  %v1348_v47 = vld [vmem:[#allocation2 + $0x104] sm:$0xff] }
 0x301   :  { %v5926_v52 = vpop.f32.mrb[83].mxu1  ;;  %v5990_v6 = vpop.f32.mrb[99].mxu0 }
 0x302   :  { %v3634_v39 = vadd.f32 %v5924_v55, %v8071_v22  ;;  %v5927_v41 = vadd.f32 %v5926_v52, %v5925_v3  ;;  %v5991_v1 = vadd.f32 %v5990_v6, %v5989_v23  ;;  %v1345_v22 = vld [vmem:[#allocation2 + $0x94] sm:$0xff] }
 0x303   :  { %4238 = vmatmul.mubr.bf16.gmra.mrb[188].mxu1 %v1235_v63  ;;  %4335 = vmatmul.mubr.bf16.gmra.mrb[204].mxu0 %v1299_v62  ;;  %v1358_v40 = vpack.c.bf16 %v1345_v22, %v1344_v44 }
 0x304   :  { %v8142_v35 = vadd.f32 %v5988_v42, %v3634_v39  ;;  %v3637_v48 = vadd.f32 %v5927_v41, %v8074_v15  ;;  %6469 = vmatprep.mubr.bf16.mxu1 %v1356_v45  ;;  %v1350_v45 = vld [vmem:[#allocation2 + $0x124] sm:$0xff] }
 0x306   :  { %v8145_v37 = vadd.f32 %v5991_v1, %v3637_v48  ;;  %v5928_v58 = vpop.f32.mrb[84].mxu1  ;;  %v5992_v27 = vpop.f32.mrb[100].mxu0  ;;  %v1351_v48 = vld [vmem:[#allocation2 + $0x134] sm:$0xff] }
 0x307   :  { %v5929_v46 = vpop.f32.mrb[85].mxu1  ;;  %v5993_v16 = vpop.f32.mrb[101].mxu0 }
 0x308   :  { %v5930_v32 = vadd.f32 %v5929_v46, %v5928_v58  ;;  %v5994_v5 = vadd.f32 %v5993_v16, %v5992_v27  ;;  %v5931_v29 = vpop.f32.mrb[86].mxu1  ;;  %v5995_v21 = vpop.f32.mrb[102].mxu0 }
 0x309   :  { %v5932_v9 = vpop.f32.mrb[87].mxu1  ;;  %v5996_v38 = vpop.f32.mrb[103].mxu0 }
 0x30a   :  { %v3642_v15 = vadd.f32 %v5930_v32, %v8080_v50  ;;  %v5933_v20 = vadd.f32 %v5932_v9, %v5931_v29  ;;  %v5997_v8 = vadd.f32 %v5996_v38, %v5995_v21  ;;  %v1349_v50 = vld [vmem:[#allocation2 + $0x114] sm:$0xff]  ;;  %v1361_v32 = vpack.c.bf16 %v1351_v48, %v1350_v45 }
 0x30b   :  { %6470 = vmatmul.mubr.bf16.vlgmr.msra.gmra.mrb[192].mxu1 %v1357_v11  ;;  %v1360_v23 = vpack.c.bf16 %v1349_v50, %v1348_v47  ;;  %v1362_v21 = vpack.c.bf16 %v1353_v24, %v8015_v4  ;;  %v1355_v11 = vld [vmem:[#allocation2 + $0x174] sm:$0xff] }
 0x30c   :  { %v8148_v14 = vadd.f32 %v5994_v5, %v3642_v15  ;;  %v3645_v56 = vadd.f32 %v5933_v20, %v8084_v33  ;;  %6473 = vmatprep.mubr.bf16.mxu1 %v1358_v40  ;;  %v1363_v18 = vpack.c.bf16 %v1355_v11, %v8041_v26 }
 0x30e   :  { %v8151_v59 = vadd.f32 %v5997_v8, %v3645_v56  ;;  %v5934_v54 = vpop.f32.mrb[88].mxu1  ;;  %v5998_v0 = vpop.f32.mrb[104].mxu0 }
 0x30f   :  { %v5935_v51 = vpop.f32.mrb[89].mxu1  ;;  %v5999_v49 = vpop.f32.mrb[105].mxu0 }
 0x310   :  { %v5936_v17 = vadd.f32 %v5935_v51, %v5934_v54  ;;  %v6000_v63 = vadd.f32 %v5999_v49, %v5998_v0  ;;  %v5937_v57 = vpop.f32.mrb[90].mxu1  ;;  %v6001_v10 = vpop.f32.mrb[106].mxu0 }
 0x311   :  { %v5938_v62 = vpop.f32.mrb[91].mxu1  ;;  %v6002_v55 = vpop.f32.mrb[107].mxu0 }
 0x312   :  { %v3650_v33 = vadd.f32 %v5936_v17, %v8091_v60  ;;  %v5939_v42 = vadd.f32 %v5938_v62, %v5937_v57  ;;  %v6003_v3 = vadd.f32 %v6002_v55, %v6001_v10 }
 0x313   :  { %6474 = vmatmul.mubr.bf16.gmra.mrb[196].mxu1 %v1359_v19 }
 0x314   :  { %v8154_v52 = vadd.f32 %v6000_v63, %v3650_v33  ;;  %v3653_v6 = vadd.f32 %v5939_v42, %v8094_v31  ;;  %6477 = vmatprep.mubr.bf16.mxu1 %v1360_v23 }
 0x316   :  { %v8157_v39 = vadd.f32 %v6003_v3, %v3653_v6  ;;  %v5940_v41 = vpop.f32.mrb[92].mxu1  ;;  %v6004_v1 = vpop.f32.mrb[108].mxu0 }
 0x317   :  { %v5941_v58 = vpop.f32.mrb[93].mxu1  ;;  %v6005_v27 = vpop.f32.mrb[109].mxu0 }
 0x318   :  { %v5942_v43 = vadd.f32 %v5941_v58, %v5940_v41  ;;  %v6006_v60 = vadd.f32 %v6005_v27, %v6004_v1  ;;  %v5943_v46 = vpop.f32.mrb[94].mxu1  ;;  %v6007_v16 = vpop.f32.mrb[110].mxu0 }
 0x319   :  { %v5944_v44 = vpop.f32.mrb[95].mxu1  ;;  %v6008_v22 = vpop.f32.mrb[111].mxu0 }
 0x31a   :  { %v3658_v5 = vadd.f32 %v5942_v43, %v8099_v2  ;;  %v5945_v31 = vadd.f32 %v5944_v44, %v5943_v46  ;;  %v6009_v29 = vadd.f32 %v6008_v22, %v6007_v16 }
 0x31b   :  { %6478 = vmatmul.mubr.bf16.gmra.mrb[200].mxu1 %v1361_v32 }
 0x31c   :  { %v8161_v9 = vadd.f32 %v6006_v60, %v3658_v5  ;;  %v3661_v38 = vadd.f32 %v5945_v31, %v8102_v34  ;;  %6481 = vmatprep.mubr.bf16.mxu1 %v1362_v21 }
 0x31e   :  { %v8164_v15 = vadd.f32 %v6009_v29, %v3661_v38  ;;  %v6026_v20 = vpop.f32.mrb[96].mxu1  ;;  %v6090_v8 = vpop.f32.mrb[112].mxu0 }
 0x31f   :  { %v6027_v40 = vpop.f32.mrb[97].mxu1  ;;  %v6091_v56 = vpop.f32.mrb[113].mxu0 }
 0x320   :  { %v6028_v2 = vadd.f32 %v6027_v40, %v6026_v20  ;;  %v6092_v13 = vadd.f32 %v6091_v56, %v6090_v8  ;;  %v6029_v54 = vpop.f32.mrb[98].mxu1  ;;  %v6093_v0 = vpop.f32.mrb[114].mxu0 }
 0x321   :  { %v6030_v4 = vpop.f32.mrb[99].mxu1  ;;  %v6094_v51 = vpop.f32.mrb[115].mxu0 }
 0x322   :  { %v3796_v49 = vadd.f32 %v6028_v2, %v8109_v30  ;;  %v6031_v19 = vadd.f32 %v6030_v4, %v6029_v54  ;;  %v6095_v34 = vadd.f32 %v6094_v51, %v6093_v0 }
 0x323   :  { %6482 = vmatmul.mubr.bf16.gmra.mrb[204].mxu1 %v1363_v18 }
 0x324   :  { %v8168_v47 = vadd.f32 %v6092_v13, %v3796_v49  ;;  %v3799_v50 = vadd.f32 %v6031_v19, %v8112_v28 }
 0x326   :  { %v8171_v17 = vadd.f32 %v6095_v34, %v3799_v50  ;;  %v6032_v63 = vpop.f32.mrb[100].mxu1  ;;  %v6096_v57 = vpop.f32.mrb[116].mxu0 }
 0x327   :  { %v6033_v26 = vpop.f32.mrb[101].mxu1  ;;  %v6097_v10 = vpop.f32.mrb[117].mxu0 }
 0x328   :  { %v6034_v62 = vadd.f32 %v6033_v26, %v6032_v63  ;;  %v6098_v55 = vadd.f32 %v6097_v10, %v6096_v57  ;;  %v6035_v33 = vpop.f32.mrb[102].mxu1  ;;  %v6099_v42 = vpop.f32.mrb[118].mxu0 }
 0x329   :  { %v6036_v3 = vpop.f32.mrb[103].mxu1  ;;  %v6100_v23 = vpop.f32.mrb[119].mxu0 }
 0x32a   :  { %v3804_v30 = vadd.f32 %v6034_v62, %v8118_v53  ;;  %v6037_v6 = vadd.f32 %v6036_v3, %v6035_v33  ;;  %v6101_v41 = vadd.f32 %v6100_v23, %v6099_v42 }
 0x32c   :  { %v8174_v1 = vadd.f32 %v6098_v55, %v3804_v30  ;;  %v3807_v28 = vadd.f32 %v6037_v6, %v8121_v25 }
 0x32e   :  { %v8177_v45 = vadd.f32 %v6101_v41, %v3807_v28  ;;  %v6038_v48 = vpop.f32.mrb[104].mxu1  ;;  %v6102_v58 = vpop.f32.mrb[120].mxu0 }
 0x32f   :  { %v6039_v27 = vpop.f32.mrb[105].mxu1  ;;  %v6103_v24 = vpop.f32.mrb[121].mxu0 }
 0x330   :  { %v6040_v43 = vadd.f32 %v6039_v27, %v6038_v48  ;;  %v6104_v60 = vadd.f32 %v6103_v24, %v6102_v58  ;;  %v6041_v46 = vpop.f32.mrb[106].mxu1  ;;  %v6105_v16 = vpop.f32.mrb[122].mxu0 }
 0x331   :  { %v6042_v44 = vpop.f32.mrb[107].mxu1  ;;  %v6106_v22 = vpop.f32.mrb[123].mxu0 }
 0x332   :  { %v3812_v53 = vadd.f32 %v6040_v43, %v8127_v61  ;;  %v6043_v32 = vadd.f32 %v6042_v44, %v6041_v46  ;;  %v6107_v5 = vadd.f32 %v6106_v22, %v6105_v16 }
 0x334   :  { %v8180_v31 = vadd.f32 %v6104_v60, %v3812_v53  ;;  %v3815_v25 = vadd.f32 %v6043_v32, %v8130_v36 }
 0x336   :  { %v8183_v29 = vadd.f32 %v6107_v5, %v3815_v25  ;;  %v6044_v21 = vpop.f32.mrb[108].mxu1  ;;  %v6108_v38 = vpop.f32.mrb[124].mxu0 }
 0x337   :  { %v6045_v11 = vpop.f32.mrb[109].mxu1  ;;  %v6109_v20 = vpop.f32.mrb[125].mxu0 }
 0x338   :  { %v6046_v8 = vadd.f32 %v6045_v11, %v6044_v21  ;;  %v6110_v40 = vadd.f32 %v6109_v20, %v6108_v38  ;;  %v6047_v56 = vpop.f32.mrb[110].mxu1  ;;  %v6111_v18 = vpop.f32.mrb[126].mxu0 }
 0x339   :  { %v6048_v2 = vpop.f32.mrb[111].mxu1  ;;  %v6112_v13 = vpop.f32.mrb[127].mxu0 }
 0x33a   :  { %v3820_v61 = vadd.f32 %v6046_v8, %v8135_v7  ;;  %v6049_v54 = vadd.f32 %v6048_v2, %v6047_v56  ;;  %v6113_v0 = vadd.f32 %v6112_v13, %v6111_v18 }
 0x33c   :  { %v8186_v4 = vadd.f32 %v6110_v40, %v3820_v61  ;;  %v3823_v36 = vadd.f32 %v6049_v54, %v8138_v12 }
 0x33e   :  { %v8189_v51 = vadd.f32 %v6113_v0, %v3823_v36  ;;  %v6050_v49 = vpop.f32.mrb[112].mxu1  ;;  %v6114_v19 = vpop.f32.mrb[128].mxu0 }
 0x33f   :  { %v6051_v34 = vpop.f32.mrb[113].mxu1  ;;  %v6115_v50 = vpop.f32.mrb[129].mxu0 }
 0x340   :  { %v6052_v63 = vadd.f32 %v6051_v34, %v6050_v49  ;;  %v6116_v57 = vadd.f32 %v6115_v50, %v6114_v19  ;;  %v6053_v26 = vpop.f32.mrb[114].mxu1  ;;  %v6117_v10 = vpop.f32.mrb[130].mxu0 }
 0x341   :  { %v6054_v62 = vpop.f32.mrb[115].mxu1  ;;  %v6118_v55 = vpop.f32.mrb[131].mxu0 }
 0x342   :  { %v3828_v7 = vadd.f32 %v6052_v63, %v8142_v35  ;;  %v6055_v33 = vadd.f32 %v6054_v62, %v6053_v26  ;;  %v6119_v42 = vadd.f32 %v6118_v55, %v6117_v10 }
 0x344   :  { %v8192_v3 = vadd.f32 %v6116_v57, %v3828_v7  ;;  %v3831_v12 = vadd.f32 %v6055_v33, %v8145_v37 }
 0x346   :  { %v8195_v23 = vadd.f32 %v6119_v42, %v3831_v12  ;;  %v6056_v30 = vpop.f32.mrb[116].mxu1  ;;  %v6120_v6 = vpop.f32.mrb[132].mxu0 }
 0x347   :  { %v6057_v41 = vpop.f32.mrb[117].mxu1  ;;  %v6121_v28 = vpop.f32.mrb[133].mxu0 }
 0x348   :  { %v6058_v48 = vadd.f32 %v6057_v41, %v6056_v30  ;;  %v6122_v58 = vadd.f32 %v6121_v28, %v6120_v6  ;;  %v6059_v27 = vpop.f32.mrb[118].mxu1  ;;  %v6123_v24 = vpop.f32.mrb[134].mxu0 }
 0x349   :  { %v6060_v43 = vpop.f32.mrb[119].mxu1  ;;  %v6124_v60 = vpop.f32.mrb[135].mxu0 }
 0x34a   :  { %v3836_v35 = vadd.f32 %v6058_v48, %v8148_v14  ;;  %v6061_v46 = vadd.f32 %v6060_v43, %v6059_v27  ;;  %v6125_v16 = vadd.f32 %v6124_v60, %v6123_v24 }
 0x34c   :  { %v8198_v44 = vadd.f32 %v6122_v58, %v3836_v35  ;;  %v3839_v37 = vadd.f32 %v6061_v46, %v8151_v59 }
 0x34e   :  { %v8201_v22 = vadd.f32 %v6125_v16, %v3839_v37  ;;  %v6062_v53 = vpop.f32.mrb[120].mxu1  ;;  %v6126_v32 = vpop.f32.mrb[136].mxu0 }
 0x34f   :  { %v6063_v5 = vpop.f32.mrb[121].mxu1  ;;  %v6127_v25 = vpop.f32.mrb[137].mxu0 }
 0x350   :  { %v6064_v21 = vadd.f32 %v6063_v5, %v6062_v53  ;;  %v6128_v38 = vadd.f32 %v6127_v25, %v6126_v32  ;;  %v6065_v11 = vpop.f32.mrb[122].mxu1  ;;  %v6129_v20 = vpop.f32.mrb[138].mxu0 }
 0x351   :  { %v6066_v8 = vpop.f32.mrb[123].mxu1  ;;  %v6130_v40 = vpop.f32.mrb[139].mxu0 }
 0x352   :  { %v3844_v14 = vadd.f32 %v6064_v21, %v8154_v52  ;;  %v6067_v56 = vadd.f32 %v6066_v8, %v6065_v11  ;;  %v6131_v18 = vadd.f32 %v6130_v40, %v6129_v20 }
 0x354   :  { %v8204_v2 = vadd.f32 %v6128_v38, %v3844_v14  ;;  %v3847_v59 = vadd.f32 %v6067_v56, %v8157_v39 }
 0x356   :  { %v8207_v13 = vadd.f32 %v6131_v18, %v3847_v59  ;;  %v6068_v61 = vpop.f32.mrb[124].mxu1  ;;  %v6132_v54 = vpop.f32.mrb[140].mxu0 }
 0x357   :  { %v6069_v0 = vpop.f32.mrb[125].mxu1  ;;  %v6133_v36 = vpop.f32.mrb[141].mxu0 }
 0x358   :  { %v6070_v49 = vadd.f32 %v6069_v0, %v6068_v61  ;;  %v6134_v19 = vadd.f32 %v6133_v36, %v6132_v54  ;;  %v6071_v34 = vpop.f32.mrb[126].mxu1  ;;  %v6135_v50 = vpop.f32.mrb[142].mxu0 }
 0x359   :  { %v6072_v63 = vpop.f32.mrb[127].mxu1  ;;  %v6136_v57 = vpop.f32.mrb[143].mxu0 }
 0x35a   :  { %v3852_v52 = vadd.f32 %v6070_v49, %v8161_v9  ;;  %v6073_v26 = vadd.f32 %v6072_v63, %v6071_v34  ;;  %v6137_v10 = vadd.f32 %v6136_v57, %v6135_v50 }
 0x35c   :  { %v8210_v62 = vadd.f32 %v6134_v19, %v3852_v52  ;;  %v3855_v39 = vadd.f32 %v6073_v26, %v8164_v15 }
 0x35e   :  { %v8213_v55 = vadd.f32 %v6137_v10, %v3855_v39  ;;  %v6154_v7 = vpop.f32.mrb[128].mxu1  ;;  %v6218_v33 = vpop.f32.mrb[144].mxu0 }
 0x35f   :  { %v6155_v42 = vpop.f32.mrb[129].mxu1  ;;  %v6219_v12 = vpop.f32.mrb[145].mxu0 }
 0x360   :  { %v6156_v30 = vadd.f32 %v6155_v42, %v6154_v7  ;;  %v6220_v6 = vadd.f32 %v6219_v12, %v6218_v33  ;;  %v6157_v41 = vpop.f32.mrb[130].mxu1  ;;  %v6221_v28 = vpop.f32.mrb[146].mxu0 }
 0x361   :  { %v6158_v48 = vpop.f32.mrb[131].mxu1  ;;  %v6222_v58 = vpop.f32.mrb[147].mxu0 }
 0x362   :  { %v3990_v9 = vadd.f32 %v6156_v30, %v8168_v47  ;;  %v6159_v27 = vadd.f32 %v6158_v48, %v6157_v41  ;;  %v6223_v24 = vadd.f32 %v6222_v58, %v6221_v28 }
 0x364   :  { %v8216_v43 = vadd.f32 %v6220_v6, %v3990_v9  ;;  %v3993_v15 = vadd.f32 %v6159_v27, %v8171_v17 }
 0x366   :  { %v8219_v60 = vadd.f32 %v6223_v24, %v3993_v15  ;;  %v6160_v35 = vpop.f32.mrb[132].mxu1  ;;  %v6224_v46 = vpop.f32.mrb[148].mxu0 }
 0x367   :  { %v6161_v16 = vpop.f32.mrb[133].mxu1  ;;  %v6225_v37 = vpop.f32.mrb[149].mxu0 }
 0x368   :  { %v6162_v53 = vadd.f32 %v6161_v16, %v6160_v35  ;;  %v6226_v32 = vadd.f32 %v6225_v37, %v6224_v46  ;;  %v6163_v5 = vpop.f32.mrb[134].mxu1  ;;  %v6227_v25 = vpop.f32.mrb[150].mxu0 }
 0x369   :  { %v6164_v21 = vpop.f32.mrb[135].mxu1  ;;  %v6228_v38 = vpop.f32.mrb[151].mxu0 }
 0x36a   :  { %v3998_v47 = vadd.f32 %v6162_v53, %v8174_v1  ;;  %v6165_v11 = vadd.f32 %v6164_v21, %v6163_v5  ;;  %v6229_v20 = vadd.f32 %v6228_v38, %v6227_v25 }
 0x36c   :  { %v8222_v8 = vadd.f32 %v6226_v32, %v3998_v47  ;;  %v4001_v17 = vadd.f32 %v6165_v11, %v8177_v45 }
 0x36e   :  { %v8225_v40 = vadd.f32 %v6229_v20, %v4001_v17  ;;  %v6166_v14 = vpop.f32.mrb[136].mxu1  ;;  %v6230_v56 = vpop.f32.mrb[152].mxu0 }
 0x36f   :  { %v6167_v18 = vpop.f32.mrb[137].mxu1  ;;  %v6231_v59 = vpop.f32.mrb[153].mxu0 }
 0x370   :  { %v6168_v61 = vadd.f32 %v6167_v18, %v6166_v14  ;;  %v6232_v54 = vadd.f32 %v6231_v59, %v6230_v56  ;;  %v6169_v0 = vpop.f32.mrb[138].mxu1  ;;  %v6233_v36 = vpop.f32.mrb[154].mxu0 }
 0x371   :  { %v6170_v49 = vpop.f32.mrb[139].mxu1  ;;  %v6234_v19 = vpop.f32.mrb[155].mxu0 }
 0x372   :  { %v4006_v1 = vadd.f32 %v6168_v61, %v8180_v31  ;;  %v6171_v34 = vadd.f32 %v6170_v49, %v6169_v0  ;;  %v6235_v50 = vadd.f32 %v6234_v19, %v6233_v36 }
 0x374   :  { %v8228_v63 = vadd.f32 %v6232_v54, %v4006_v1  ;;  %v4009_v45 = vadd.f32 %v6171_v34, %v8183_v29 }
 0x376   :  { %v8231_v57 = vadd.f32 %v6235_v50, %v4009_v45  ;;  %v6172_v52 = vpop.f32.mrb[140].mxu1  ;;  %v6236_v26 = vpop.f32.mrb[156].mxu0 }
 0x377   :  { %v6173_v10 = vpop.f32.mrb[141].mxu1  ;;  %v6237_v39 = vpop.f32.mrb[157].mxu0 }
 0x378   :  { %v6174_v7 = vadd.f32 %v6173_v10, %v6172_v52  ;;  %v6238_v33 = vadd.f32 %v6237_v39, %v6236_v26  ;;  %v6175_v42 = vpop.f32.mrb[142].mxu1  ;;  %v6239_v12 = vpop.f32.mrb[158].mxu0 }
 0x379   :  { %v6176_v30 = vpop.f32.mrb[143].mxu1  ;;  %v6240_v6 = vpop.f32.mrb[159].mxu0 }
 0x37a   :  { %v4014_v31 = vadd.f32 %v6174_v7, %v8186_v4  ;;  %v6177_v41 = vadd.f32 %v6176_v30, %v6175_v42  ;;  %v6241_v28 = vadd.f32 %v6240_v6, %v6239_v12 }
 0x37c   :  { %v8234_v48 = vadd.f32 %v6238_v33, %v4014_v31  ;;  %v4017_v29 = vadd.f32 %v6177_v41, %v8189_v51 }
 0x37e   :  { %v8237_v58 = vadd.f32 %v6241_v28, %v4017_v29  ;;  %v6178_v9 = vpop.f32.mrb[144].mxu1  ;;  %v6242_v27 = vpop.f32.mrb[160].mxu0 }
 0x37f   :  { %v6179_v24 = vpop.f32.mrb[145].mxu1  ;;  %v6243_v15 = vpop.f32.mrb[161].mxu0 }
 0x380   :  { %v6180_v35 = vadd.f32 %v6179_v24, %v6178_v9  ;;  %v6244_v46 = vadd.f32 %v6243_v15, %v6242_v27  ;;  %v6181_v16 = vpop.f32.mrb[146].mxu1  ;;  %v6245_v37 = vpop.f32.mrb[162].mxu0 }
 0x381   :  { %v6182_v53 = vpop.f32.mrb[147].mxu1  ;;  %v6246_v32 = vpop.f32.mrb[163].mxu0 }
 0x382   :  { %v4022_v4 = vadd.f32 %v6180_v35, %v8192_v3  ;;  %v6183_v5 = vadd.f32 %v6182_v53, %v6181_v16  ;;  %v6247_v25 = vadd.f32 %v6246_v32, %v6245_v37 }
 0x384   :  { %v8240_v21 = vadd.f32 %v6244_v46, %v4022_v4  ;;  %v4025_v51 = vadd.f32 %v6183_v5, %v8195_v23 }
 0x386   :  { %v8243_v38 = vadd.f32 %v6247_v25, %v4025_v51  ;;  %v6184_v47 = vpop.f32.mrb[148].mxu1  ;;  %v6248_v11 = vpop.f32.mrb[164].mxu0 }
 0x387   :  { %v6185_v20 = vpop.f32.mrb[149].mxu1  ;;  %v6249_v17 = vpop.f32.mrb[165].mxu0 }
 0x388   :  { %v6186_v14 = vadd.f32 %v6185_v20, %v6184_v47  ;;  %v6250_v56 = vadd.f32 %v6249_v17, %v6248_v11  ;;  %v6187_v18 = vpop.f32.mrb[150].mxu1  ;;  %v6251_v59 = vpop.f32.mrb[166].mxu0 }
 0x389   :  { %v6188_v61 = vpop.f32.mrb[151].mxu1  ;;  %v6252_v54 = vpop.f32.mrb[167].mxu0 }
 0x38a   :  { %v4030_v3 = vadd.f32 %v6186_v14, %v8198_v44  ;;  %v6189_v0 = vadd.f32 %v6188_v61, %v6187_v18  ;;  %v6253_v36 = vadd.f32 %v6252_v54, %v6251_v59 }
 0x38c   :  { %v8246_v49 = vadd.f32 %v6250_v56, %v4030_v3  ;;  %v4033_v23 = vadd.f32 %v6189_v0, %v8201_v22 }
 0x38e   :  { %v8249_v19 = vadd.f32 %v6253_v36, %v4033_v23  ;;  %v6190_v1 = vpop.f32.mrb[152].mxu1  ;;  %v6254_v34 = vpop.f32.mrb[168].mxu0 }
 0x38f   :  { %v6191_v50 = vpop.f32.mrb[153].mxu1  ;;  %v6255_v45 = vpop.f32.mrb[169].mxu0 }
 0x390   :  { %v6192_v52 = vadd.f32 %v6191_v50, %v6190_v1  ;;  %v6256_v26 = vadd.f32 %v6255_v45, %v6254_v34  ;;  %v6193_v10 = vpop.f32.mrb[154].mxu1  ;;  %v6257_v39 = vpop.f32.mrb[170].mxu0 }
 0x391   :  { %v6194_v7 = vpop.f32.mrb[155].mxu1  ;;  %v6258_v33 = vpop.f32.mrb[171].mxu0 }
 0x392   :  { %v4038_v44 = vadd.f32 %v6192_v52, %v8204_v2  ;;  %v6195_v42 = vadd.f32 %v6194_v7, %v6193_v10  ;;  %v6259_v12 = vadd.f32 %v6258_v33, %v6257_v39 }
 0x394   :  { %v8252_v30 = vadd.f32 %v6256_v26, %v4038_v44  ;;  %v4041_v22 = vadd.f32 %v6195_v42, %v8207_v13 }
 0x396   :  { %v8255_v6 = vadd.f32 %v6259_v12, %v4041_v22  ;;  %v6196_v31 = vpop.f32.mrb[156].mxu1  ;;  %v6260_v41 = vpop.f32.mrb[172].mxu0 }
 0x397   :  { %v6197_v28 = vpop.f32.mrb[157].mxu1  ;;  %v6261_v29 = vpop.f32.mrb[173].mxu0 }
 0x398   :  { %v6198_v9 = vadd.f32 %v6197_v28, %v6196_v31  ;;  %v6262_v27 = vadd.f32 %v6261_v29, %v6260_v41  ;;  %v6199_v24 = vpop.f32.mrb[158].mxu1  ;;  %v6263_v15 = vpop.f32.mrb[174].mxu0 }
 0x399   :  { %v6200_v35 = vpop.f32.mrb[159].mxu1  ;;  %v6264_v46 = vpop.f32.mrb[175].mxu0 }
 0x39a   :  { %v4046_v2 = vadd.f32 %v6198_v9, %v8210_v62  ;;  %v6201_v16 = vadd.f32 %v6200_v35, %v6199_v24  ;;  %v6265_v37 = vadd.f32 %v6264_v46, %v6263_v15 }
 0x39c   :  { %v8258_v53 = vadd.f32 %v6262_v27, %v4046_v2  ;;  %v4049_v13 = vadd.f32 %v6201_v16, %v8213_v55 }
 0x39e   :  { %v8261_v32 = vadd.f32 %v6265_v37, %v4049_v13  ;;  %v6282_v4 = vpop.f32.mrb[160].mxu1  ;;  %v6346_v5 = vpop.f32.mrb[176].mxu0 }
 0x39f   :  { %v6283_v25 = vpop.f32.mrb[161].mxu1  ;;  %v6347_v51 = vpop.f32.mrb[177].mxu0 }
 0x3a0   :  { %v6284_v47 = vadd.f32 %v6283_v25, %v6282_v4  ;;  %v6348_v11 = vadd.f32 %v6347_v51, %v6346_v5  ;;  %v6285_v20 = vpop.f32.mrb[162].mxu1  ;;  %v6349_v17 = vpop.f32.mrb[178].mxu0 }
 0x3a1   :  { %v6286_v14 = vpop.f32.mrb[163].mxu1  ;;  %v6350_v56 = vpop.f32.mrb[179].mxu0 }
 0x3a2   :  { %v4184_v62 = vadd.f32 %v6284_v47, %v8216_v43  ;;  %v6287_v18 = vadd.f32 %v6286_v14, %v6285_v20  ;;  %v6351_v59 = vadd.f32 %v6350_v56, %v6349_v17 }
 0x3a4   :  { %v4187_v61 = vadd.f32 %v6287_v18, %v8219_v60  ;;  %v8265_v54 = vadd.f32 %v6348_v11, %v4184_v62 }
 0x3a6   :  { %v6288_v55 = vpop.f32.mrb[164].mxu1  ;;  %v6352_v3 = vpop.f32.mrb[180].mxu0  ;;  %v8267_v0 = vadd.f32 %v6351_v59, %v4187_v61 }
 0x3a7   :  { %v6289_v36 = vpop.f32.mrb[165].mxu1  ;;  %v6353_v23 = vpop.f32.mrb[181].mxu0 }
 0x3a8   :  { %v6290_v1 = vadd.f32 %v6289_v36, %v6288_v55  ;;  %v6354_v34 = vadd.f32 %v6353_v23, %v6352_v3  ;;  %v6291_v50 = vpop.f32.mrb[166].mxu1  ;;  %v6355_v45 = vpop.f32.mrb[182].mxu0 }
 0x3a9   :  { %v6292_v52 = vpop.f32.mrb[167].mxu1  ;;  %v6356_v26 = vpop.f32.mrb[183].mxu0 }
 0x3aa   :  { %v4192_v43 = vadd.f32 %v6290_v1, %v8222_v8  ;;  %v6293_v10 = vadd.f32 %v6292_v52, %v6291_v50  ;;  %v6357_v39 = vadd.f32 %v6356_v26, %v6355_v45 }
 0x3ac   :  { %v4195_v60 = vadd.f32 %v6293_v10, %v8225_v40  ;;  %v8271_v7 = vadd.f32 %v6354_v34, %v4192_v43 }
 0x3ae   :  { %v6294_v33 = vpop.f32.mrb[168].mxu1  ;;  %v6358_v44 = vpop.f32.mrb[184].mxu0  ;;  %v8273_v42 = vadd.f32 %v6357_v39, %v4195_v60 }
 0x3af   :  { %v6295_v12 = vpop.f32.mrb[169].mxu1  ;;  %v6359_v22 = vpop.f32.mrb[185].mxu0 }
 0x3b0   :  { %v6296_v31 = vadd.f32 %v6295_v12, %v6294_v33  ;;  %v6360_v41 = vadd.f32 %v6359_v22, %v6358_v44  ;;  %v6297_v28 = vpop.f32.mrb[170].mxu1  ;;  %v6361_v29 = vpop.f32.mrb[186].mxu0 }
 0x3b1   :  { %v6298_v9 = vpop.f32.mrb[171].mxu1  ;;  %v6362_v27 = vpop.f32.mrb[187].mxu0 }
 0x3b2   :  { %v4200_v8 = vadd.f32 %v6296_v31, %v8228_v63  ;;  %v6299_v24 = vadd.f32 %v6298_v9, %v6297_v28  ;;  %v6363_v15 = vadd.f32 %v6362_v27, %v6361_v29 }
 0x3b4   :  { %v4203_v40 = vadd.f32 %v6299_v24, %v8231_v57  ;;  %v8277_v35 = vadd.f32 %v6360_v41, %v4200_v8 }
 0x3b6   :  { %v6300_v46 = vpop.f32.mrb[172].mxu1  ;;  %v6364_v2 = vpop.f32.mrb[188].mxu0  ;;  %v8279_v16 = vadd.f32 %v6363_v15, %v4203_v40 }
 0x3b7   :  { %v6301_v37 = vpop.f32.mrb[173].mxu1  ;;  %v6365_v13 = vpop.f32.mrb[189].mxu0 }
 0x3b8   :  { %v6302_v4 = vadd.f32 %v6301_v37, %v6300_v46  ;;  %v6303_v5 = vpop.f32.mrb[174].mxu1  ;;  %v6366_v25 = vadd.f32 %v6365_v13, %v6364_v2  ;;  %v6367_v51 = vpop.f32.mrb[190].mxu0 }
 0x3b9   :  { %v6304_v47 = vpop.f32.mrb[175].mxu1  ;;  %v6368_v11 = vpop.f32.mrb[191].mxu0 }
 0x3ba   :  { %v4208_v63 = vadd.f32 %v6302_v4, %v8234_v48  ;;  %v6305_v20 = vadd.f32 %v6304_v47, %v6303_v5  ;;  %v6369_v17 = vadd.f32 %v6368_v11, %v6367_v51  ;;  %v6749_v47 = vld [vmem:[%s8941_s9 + $0x8] sm:$0xff]  }
 0x3bc   :  { %v4211_v57 = vadd.f32 %v6305_v20, %v8237_v58  ;;  %v8283_v14 = vadd.f32 %v6366_v25, %v4208_v63 }
 0x3be   :  { %v6306_v56 = vpop.f32.mrb[176].mxu1  ;;  %v6370_v62 = vpop.f32.mrb[192].mxu0  ;;  %v8285_v18 = vadd.f32 %v6369_v17, %v4211_v57 }
 0x3bf   :  { %v6307_v59 = vpop.f32.mrb[177].mxu1  ;;  %v6371_v61 = vpop.f32.mrb[193].mxu0 }
 0x3c0   :  { %v6308_v55 = vadd.f32 %v6307_v59, %v6306_v56  ;;  %v6372_v3 = vadd.f32 %v6371_v61, %v6370_v62  ;;  %v6309_v36 = vpop.f32.mrb[178].mxu1  ;;  %v6373_v23 = vpop.f32.mrb[194].mxu0  ;;  %v6750_v62 = vld [vmem:[%s8941_s9 + $0x10] sm:$0xff]  }
 0x3c1   :  { %v6310_v1 = vpop.f32.mrb[179].mxu1  ;;  %v6374_v34 = vpop.f32.mrb[195].mxu0 }
 0x3c2   :  { %v4216_v48 = vadd.f32 %v6308_v55, %v8240_v21  ;;  %v6311_v50 = vadd.f32 %v6310_v1, %v6309_v36  ;;  %v6375_v45 = vadd.f32 %v6374_v34, %v6373_v23 }
 0x3c4   :  { %v4219_v58 = vadd.f32 %v6311_v50, %v8243_v38  ;;  %v8289_v52 = vadd.f32 %v6372_v3, %v4216_v48  ;;  %v6751_v48 = vld [vmem:[%s8941_s9 + $0x18] sm:$0xff]  }
 0x3c6   :  { %v6312_v26 = vpop.f32.mrb[180].mxu1  ;;  %v6376_v43 = vpop.f32.mrb[196].mxu0  ;;  %v8291_v10 = vadd.f32 %v6375_v45, %v4219_v58 }
 0x3c7   :  { %v6313_v39 = vpop.f32.mrb[181].mxu1  ;;  %v6377_v60 = vpop.f32.mrb[197].mxu0 }
 0x3c8   :  { %v6314_v33 = vadd.f32 %v6313_v39, %v6312_v26  ;;  %v6378_v44 = vadd.f32 %v6377_v60, %v6376_v43  ;;  %v6315_v12 = vpop.f32.mrb[182].mxu1  ;;  %v6379_v22 = vpop.f32.mrb[198].mxu0 }
 0x3c9   :  { %v6316_v31 = vpop.f32.mrb[183].mxu1  ;;  %v6380_v41 = vpop.f32.mrb[199].mxu0 }
 0x3ca   :  { %v4224_v21 = vadd.f32 %v6314_v33, %v8246_v49  ;;  %v6317_v28 = vadd.f32 %v6316_v31, %v6315_v12  ;;  %v6381_v29 = vadd.f32 %v6380_v41, %v6379_v22 }
 0x3cc   :  { %v4227_v38 = vadd.f32 %v6317_v28, %v8249_v19  ;;  %v8295_v9 = vadd.f32 %v6378_v44, %v4224_v21  ;;  %v6748_v19 = vld [vmem:[%s8941_s9] sm:$0xff]  }
 0x3cd   :  { %6485 = vmatprep.subr.bf16.mxu0 %v6748_v19 }
 0x3ce   :  { %v6318_v27 = vpop.f32.mrb[184].mxu1  ;;  %v6382_v8 = vpop.f32.mrb[200].mxu0  ;;  %v8297_v24 = vadd.f32 %v6381_v29, %v4227_v38  ;;  %6486 = vmatpush3.bf16.msra.mxu0 %v6748_v19 }
 0x3cf   :  { %v6319_v15 = vpop.f32.mrb[185].mxu1  ;;  %v6383_v40 = vpop.f32.mrb[201].mxu0  ;;  %6487 = vmatprep.subr.bf16.mxu0 %v6749_v47 }
 0x3d0   :  { %v6320_v46 = vadd.f32 %v6319_v15, %v6318_v27  ;;  %v6384_v2 = vadd.f32 %v6383_v40, %v6382_v8  ;;  %v6321_v37 = vpop.f32.mrb[186].mxu1  ;;  %v6385_v13 = vpop.f32.mrb[202].mxu0 }
 0x3d1   :  { %v6322_v4 = vpop.f32.mrb[187].mxu1  ;;  %v6386_v5 = vpop.f32.mrb[203].mxu0 }
 0x3d2   :  { %v4232_v49 = vadd.f32 %v6320_v46, %v8252_v30  ;;  %v6323_v25 = vadd.f32 %v6322_v4, %v6321_v37  ;;  %v6387_v51 = vadd.f32 %v6386_v5, %v6385_v13  ;;  %6488 = vmatpush3.bf16.msra.mxu0 %v6749_v47 }
 0x3d3   :  { %6489 = vmatprep.subr.bf16.mxu0 %v6750_v62 }
 0x3d4   :  { %v4235_v11 = vadd.f32 %v6323_v25, %v8255_v6  ;;  %v8307_v63 = vadd.f32 %v6384_v2, %v4232_v49 }
 0x3d6   :  { %v6324_v20 = vpop.f32.mrb[188].mxu1  ;;  %v6388_v17 = vpop.f32.mrb[204].mxu0  ;;  %v8309_v57 = vadd.f32 %v6387_v51, %v4235_v11  ;;  %6490 = vmatpush3.bf16.msra.mxu0 %v6750_v62 }
 0x3d7   :  { %v6325_v30 = vpop.f32.mrb[189].mxu1  ;;  %v6389_v56 = vpop.f32.mrb[205].mxu0  ;;  %6491 = vmatprep.subr.bf16.mxu0 %v6751_v48 }
 0x3d8   :  { %v6326_v59 = vadd.f32 %v6325_v30, %v6324_v20  ;;  %v6327_v61 = vpop.f32.mrb[190].mxu1  ;;  %v6390_v55 = vadd.f32 %v6389_v56, %v6388_v17  ;;  %v6391_v3 = vpop.f32.mrb[206].mxu0 }
 0x3d9   :  { %v6328_v6 = vpop.f32.mrb[191].mxu1  ;;  %v6392_v36 = vpop.f32.mrb[207].mxu0 }
 0x3da   :  { %v4240_v23 = vadd.f32 %v6326_v59, %v8258_v53  ;;  %v6329_v1 = vadd.f32 %v6328_v6, %v6327_v61  ;;  %v6393_v34 = vadd.f32 %v6392_v36, %v6391_v3  ;;  %v6752_v53 = vld [vmem:[%s8941_s9 + $0x20] sm:$0xff]   ;;  %6492 = vmatpush3.bf16.msra.mxu0 %v6751_v48 }
 0x3db   :  { %6493 = vmatprep.subr.bf16.mxu0 %v6752_v53 }
 0x3dc   :  { %v4243_v50 = vadd.f32 %v6329_v1, %v8261_v32  ;;  %v4337_v45 = vadd.f32 %v6390_v55, %v4240_v23 }
 0x3de   :  { %v6471_v58 = vpop.f32.mrb[192].mxu1  ;;  %v4340_v26 = vadd.f32 %v6393_v34, %v4243_v50  ;;  %6494 = vmatpush3.bf16.msra.mxu0 %v6752_v53 }
 0x3df   :  { %v8320_v43 = vadd.f32 %v6471_v58, %v8271_v7  ;;  %v4377_v39 = vpop.f32.mrb[193].mxu1  ;;  %v6753_v7 = vld [vmem:[%s8941_s9 + $0x28] sm:$0xff]  }
 0x3e0   :  { %v8326_v60 = vadd.f32 %v4377_v39, %v8265_v54  ;;  %v6472_v33 = vpop.f32.mrb[194].mxu1  ;;  %6495 = vmatprep.subr.bf16.mxu0 %v6753_v7 }
 0x3e1   :  { %v8329_v44 = vadd.f32 %v6472_v33, %v8273_v42  ;;  %v4380_v32 = vpop.f32.mrb[195].mxu1 }
 0x3e2   :  { %v4381_v12 = vadd.f32 %v4380_v32, %v8267_v0  ;;  %v6754_v0 = vld [vmem:[%s8941_s9 + $0x30] sm:$0xff]   ;;  %6496 = vmatpush3.bf16.msra.mxu0 %v6753_v7 }
 0x3e3   :  { %6497 = vmatprep.subr.bf16.mxu0 %v6754_v0 }
 0x3e4   :  { %v4440_v22 = vadd.f32 %v4381_v12, %v8326_v60 }
 0x3e6   :  { %v4441_v31 = vadd.f32 %v4440_v22, %v8320_v43  ;;  %v6475_v41 = vpop.f32.mrb[196].mxu1  ;;  %6498 = vmatpush3.bf16.msra.mxu0 %v6754_v0 }
 0x3e7   :  { %v4402_v54 = vadd.f32 %v6475_v41, %v8283_v14  ;;  %v4393_v21 = vpop.f32.mrb[197].mxu1  ;;  %v6755_v14 = vld [vmem:[%s8941_s9 + $0x38] sm:$0xff]  }
 0x3e8   :  { %v4394_v42 = vadd.f32 %v4393_v21, %v8277_v35  ;;  %v4442_v28 = vadd.f32 %v4441_v31, %v8329_v44  ;;  %v6476_v29 = vpop.f32.mrb[198].mxu1  ;;  %6499 = vmatprep.subr.bf16.mxu0 %v6755_v14 }
 0x3e9   :  { %v4405_v38 = vadd.f32 %v6476_v29, %v8285_v18  ;;  %v4396_v27 = vpop.f32.mrb[199].mxu1 }
 0x3ea   :  { %v4443_v8 = vadd.f32 %v4442_v28, %v4394_v42  ;;  %v4397_v15 = vadd.f32 %v4396_v27, %v8279_v16  ;;  %6500 = vmatpush3.bf16.msra.mxu0 %v6755_v14 }
 0x3ec   :  { %v4444_v40 = vadd.f32 %v4443_v8, %v4397_v15 }
 0x3ee   :  { %v4445_v46 = vadd.f32 %v4444_v40, %v4402_v54  ;;  %v6479_v2 = vpop.f32.mrb[200].mxu1 }
 0x3ef   :  { %v4418_v35 = vadd.f32 %v6479_v2, %v8295_v9  ;;  %v4409_v37 = vpop.f32.mrb[201].mxu1 }
 0x3f0   :  { %v4410_v18 = vadd.f32 %v4409_v37, %v8289_v52  ;;  %v4446_v13 = vadd.f32 %v4445_v46, %v4405_v38  ;;  %v6480_v4 = vpop.f32.mrb[202].mxu1 }
 0x3f1   :  { %v4421_v16 = vadd.f32 %v6480_v4, %v8297_v24  ;;  %v4412_v5 = vpop.f32.mrb[203].mxu1 }
 0x3f2   :  { %v4447_v49 = vadd.f32 %v4446_v13, %v4410_v18  ;;  %v4413_v25 = vadd.f32 %v4412_v5, %v8291_v10 }
 0x3f4   :  { %v4448_v51 = vadd.f32 %v4447_v49, %v4413_v25 }
 0x3f6   :  { %v4449_v19 = vadd.f32 %v4448_v51, %v4418_v35  ;;  %v6483_v47 = vpop.f32.mrb[204].mxu1 }
 0x3f7   :  { %v4434_v11 = vadd.f32 %v6483_v47, %v4337_v45  ;;  %v4425_v20 = vpop.f32.mrb[205].mxu1 }
 0x3f8   :  { %v4426_v9 = vadd.f32 %v4425_v20, %v8307_v63  ;;  %v4450_v17 = vadd.f32 %v4449_v19, %v4421_v16  ;;  %v6484_v30 = vpop.f32.mrb[206].mxu1 }
 0x3f9   :  { %v4437_v56 = vadd.f32 %v6484_v30, %v4340_v26  ;;  %v4428_v52 = vpop.f32.mrb[207].mxu1 }
 0x3fa   :  { %v4451_v62 = vadd.f32 %v4450_v17, %v4426_v9  ;;  %v4429_v59 = vadd.f32 %v4428_v52, %v8309_v57 }
 0x3fc   :  { %v4452_v24 = vadd.f32 %v4451_v62, %v4429_v59 }
 0x3fe   :  { %v4453_v61 = vadd.f32 %v4452_v24, %v4434_v11 }
 0x400   :  { %v4454_v55 = vadd.f32 %v4453_v61, %v4437_v56 }
 0x402   :  { %v4455_v3 = vrot.slane %v4454_v55, 4 }
 0x404   :  { %v4456_v10 = vadd.f32 %v4455_v3, %v4454_v55  ;;  %v8394_v55 = vld [vmem:[%s8939_s7] ss:$0 sm:$0xff] }
 0x406   :  { %v4457_v6 = vrot.slane %v4456_v10, 2 }
 0x408   :  { %v4458_v36 = vadd.f32 %v4457_v6, %v4456_v10 }
 0x40a   :  { %v4459_v23 = vrot.slane %v4458_v36, 1 }
 0x40c   :  { %v4460_v1 = vadd.f32 %v4459_v23, %v4458_v36  ;;  %v8405_v23 = vld [vmem:[%s8940_s8] ss:$0 sm:$0xff] }
 0x40e   :  { %v4461_v34 = vmul.f32 0.0078125, %v4460_v1 }
 0x410   :  { %v4462_v48 = vsub.f32 %v8326_v60, %v4461_v34  ;;  %v4463_v63 = vsub.f32 %v4381_v12, %v4461_v34  ;;  %v4464_v50 = vsub.f32 %v8320_v43, %v4461_v34  ;;  %v4465_v45 = vsub.f32 %v8329_v44, %v4461_v34 }
 0x411   :  { %v4466_v58 = vsub.f32 %v4394_v42, %v4461_v34  ;;  %v4467_v26 = vsub.f32 %v4397_v15, %v4461_v34  ;;  %v4468_v57 = vsub.f32 %v4402_v54, %v4461_v34  ;;  %v8357_v39 = vsub.f32 %v4405_v38, %v4461_v34 }
 0x412   :  { %v8359_v53 = vsub.f32 %v4410_v18, %v4461_v34  ;;  %v8361_v33 = vsub.f32 %v4413_v25, %v4461_v34  ;;  %v8363_v32 = vsub.f32 %v4418_v35, %v4461_v34  ;;  %v8365_v7 = vsub.f32 %v4421_v16, %v4461_v34 }
 0x413   :  { %v8367_v22 = vsub.f32 %v4426_v9, %v4461_v34  ;;  %v4475_v60 = vsub.f32 %v4429_v59, %v4461_v34  ;;  %v8369_v12 = vsub.f32 %v4434_v11, %v4461_v34  ;;  %v8371_v43 = vsub.f32 %v4437_v56, %v4461_v34 }
 0x414   :  { %v4478_v44 = vmul.f32 %v4462_v48, %v4462_v48  ;;  %v4479_v31 = vmul.f32 %v4463_v63, %v4463_v63  ;;  %v4480_v41 = vmul.f32 %v4464_v50, %v4464_v50  ;;  %v4481_v21 = vmul.f32 %v4465_v45, %v4465_v45 }
 0x415   :  { %v4482_v42 = vmul.f32 %v4466_v58, %v4466_v58  ;;  %v4483_v29 = vmul.f32 %v4467_v26, %v4467_v26  ;;  %v4484_v27 = vmul.f32 %v4468_v57, %v4468_v57  ;;  %v4485_v15 = vmul.f32 %v8357_v39, %v8357_v39 }
 0x416   :  { %v4494_v54 = vadd.f32 %v4479_v31, %v4478_v44  ;;  %v4486_v40 = vmul.f32 %v8359_v53, %v8359_v53  ;;  %v4487_v2 = vmul.f32 %v8361_v33, %v8361_v33  ;;  %v4488_v37 = vmul.f32 %v8363_v32, %v8363_v32 }
 0x417   :  { %v4489_v13 = vmul.f32 %v8365_v7, %v8365_v7  ;;  %v4490_v16 = vmul.f32 %v8367_v22, %v8367_v22  ;;  %v4491_v49 = vmul.f32 %v4475_v60, %v4475_v60  ;;  %v4492_v51 = vmul.f32 %v8369_v12, %v8369_v12 }
 0x418   :  { %v4495_v0 = vadd.f32 %v4494_v54, %v4480_v41  ;;  %v4493_v47 = vmul.f32 %v8371_v43, %v8371_v43 }
 0x41a   :  { %v4496_v28 = vadd.f32 %v4495_v0, %v4481_v21 }
 0x41c   :  { %v4497_v38 = vadd.f32 %v4496_v28, %v4482_v42 }
 0x41e   :  { %v4498_v8 = vadd.f32 %v4497_v38, %v4483_v29 }
 0x420   :  { %v4499_v14 = vadd.f32 %v4498_v8, %v4484_v27 }
 0x422   :  { %v4500_v46 = vadd.f32 %v4499_v14, %v4485_v15 }
 0x424   :  { %v4501_v35 = vadd.f32 %v4500_v46, %v4486_v40 }
 0x426   :  { %v4502_v18 = vadd.f32 %v4501_v35, %v4487_v2 }
 0x428   :  { %v4503_v4 = vadd.f32 %v4502_v18, %v4488_v37 }
 0x42a   :  { %v4504_v5 = vadd.f32 %v4503_v4, %v4489_v13 }
 0x42c   :  { %v4505_v25 = vadd.f32 %v4504_v5, %v4490_v16 }
 0x42e   :  { %v4506_v19 = vadd.f32 %v4505_v25, %v4491_v49 }
 0x430   :  { %v4507_v11 = vadd.f32 %v4506_v19, %v4492_v51 }
 0x432   :  { %v4508_v20 = vadd.f32 %v4507_v11, %v4493_v47 }
 0x434   :  { %v4509_v9 = vrot.slane %v4508_v20, 4 }
 0x436   :  { %v4510_v17 = vadd.f32 %v4509_v9, %v4508_v20 }
 0x438   :  { %v4511_v30 = vrot.slane %v4510_v17, 2 }
 0x43a   :  { %v4512_v56 = vadd.f32 %v4511_v30, %v4510_v17 }
 0x43c   :  { %v4513_v52 = vrot.slane %v4512_v56, 1 }
 0x43e   :  { %v4514_v62 = vadd.f32 %v4513_v52, %v4512_v56 }
 0x440   :  { %v4515_v59 = vmul.f32 0.0078125, %v4514_v62 }
 0x442   :  { %v4516_v24 = vadd.f32 1e-05, %v4515_v59 }
 0x444   :  { %6822 = vrsqrt.f32 %v4516_v24 }
 0x44e   :  { %v8389_v61 = vpop.eup %6822 }
 0x44f   :  { %v8397_v3 = vmul.f32 %v8389_v61, %v4475_v60  ;;  %v4518_v10 = vmul.f32 %v8389_v61, %v4462_v48  ;;  %v4519_v6 = vmul.f32 %v8389_v61, %v4463_v63  ;;  %v4520_v36 = vmul.f32 %v8389_v61, %v4464_v50 }
 0x450   :  { %v4521_v1 = vmul.f32 %v8389_v61, %v4465_v45  ;;  %v4522_v34 = vmul.f32 %v8389_v61, %v4466_v58  ;;  %v4523_v44 = vmul.f32 %v8389_v61, %v4467_v26  ;;  %v4524_v60 = vmul.f32 %v8389_v61, %v4468_v57 }
 0x451   :  { %v4541_v31 = vmul.f32 %v8394_v55, %v4518_v10  ;;  %v4542_v48 = vmul.f32 %v8394_v55, %v4519_v6  ;;  %v4543_v63 = vmul.f32 %v8394_v55, %v4520_v36  ;;  %v4525_v45 = vmul.f32 %v8389_v61, %v8357_v39 }
 0x452   :  { %v4544_v50 = vmul.f32 %v8394_v55, %v4521_v1  ;;  %v4545_v41 = vmul.f32 %v8394_v55, %v4522_v34  ;;  %v4546_v54 = vmul.f32 %v8394_v55, %v4523_v44  ;;  %v4547_v21 = vmul.f32 %v8394_v55, %v4524_v60 }
 0x453   :  { %v8420_v58 = vadd.f32 %v8405_v23, %v4541_v31  ;;  %v8423_v26 = vadd.f32 %v8405_v23, %v4542_v48  ;;  %v8426_v57 = vadd.f32 %v8405_v23, %v4543_v63  ;;  %v4548_v39 = vmul.f32 %v8394_v55, %v4525_v45 }
 0x454   :  { %v8430_v0 = vadd.f32 %v8405_v23, %v4544_v50  ;;  %v8433_v42 = vadd.f32 %v8405_v23, %v4545_v41  ;;  %v8436_v28 = vadd.f32 %v8405_v23, %v4546_v54  ;;  %v8443_v8 = vadd.f32 %v8405_v23, %v4547_v21 }
 0x455   :  { %v5585_v29 = vmul.f32 -1.442695, %v8420_v58  ;;  %v5586_v38 = vmul.f32 -1.442695, %v8423_v26  ;;  %v5587_v27 = vmul.f32 -1.442695, %v8426_v57  ;;  %v8448_v40 = vadd.f32 %v8405_v23, %v4548_v39 }
 0x456   :  { %v5588_v15 = vmul.f32 -1.442695, %v8430_v0  ;;  %v5589_v14 = vmul.f32 -1.442695, %v8433_v42  ;;  %v5590_v46 = vmul.f32 -1.442695, %v8436_v28  ;;  %v4526_v2 = vmul.f32 %v8389_v61, %v8359_v53 }
 0x457   :  { %6824 = vpow2.f32 %v5585_v29  ;;  %v4527_v35 = vmul.f32 %v8389_v61, %v8361_v33  ;;  %v5591_v37 = vmul.f32 -1.442695, %v8443_v8  ;;  %v4528_v18 = vmul.f32 %v8389_v61, %v8363_v32 }
 0x458   :  { %6826 = vpow2.f32 %v5586_v38  ;;  %v4529_v13 = vmul.f32 %v8389_v61, %v8365_v7  ;;  %v4549_v4 = vmul.f32 %v8394_v55, %v4526_v2  ;;  %v4530_v53 = vmul.f32 %v8389_v61, %v8367_v22 }
 0x459   :  { %6828 = vpow2.f32 %v5587_v27  ;;  %v4550_v16 = vmul.f32 %v8394_v55, %v4527_v35  ;;  %v5592_v33 = vmul.f32 -1.442695, %v8448_v40  ;;  %v4551_v5 = vmul.f32 %v8394_v55, %v4528_v18 }
 0x45a   :  { %6830 = vpow2.f32 %v5588_v15  ;;  %v4552_v49 = vmul.f32 %v8394_v55, %v4529_v13  ;;  %v8468_v32 = vadd.f32 %v8405_v23, %v4549_v4  ;;  %v4553_v25 = vmul.f32 %v8394_v55, %v4530_v53 }
 0x45b   :  { %6832 = vpow2.f32 %v5589_v14  ;;  %v8471_v7 = vadd.f32 %v8405_v23, %v4550_v16  ;;  %v8475_v51 = vadd.f32 %v8405_v23, %v4551_v5  ;;  %v4532_v17 = vmul.f32 %v8389_v61, %v8369_v12 }
 0x45c   :  { %6834 = vpow2.f32 %v5590_v46  ;;  %v8478_v22 = vadd.f32 %v8405_v23, %v4552_v49  ;;  %v5593_v19 = vmul.f32 -1.442695, %v8468_v32  ;;  %v8483_v11 = vadd.f32 %v8405_v23, %v4553_v25 }
 0x45d   :  { %6836 = vpow2.f32 %v5591_v37  ;;  %v5594_v47 = vmul.f32 -1.442695, %v8471_v7  ;;  %v5595_v20 = vmul.f32 -1.442695, %v8475_v51  ;;  %v4533_v56 = vmul.f32 %v8389_v61, %v8371_v43 }
 0x45e   :  { %6838 = vpow2.f32 %v5592_v33  ;;  %v5596_v9 = vmul.f32 -1.442695, %v8478_v22  ;;  %v5597_v30 = vmul.f32 -1.442695, %v8483_v11  ;;  %v4554_v36 = vmul.f32 %v8394_v55, %v8397_v3 }
 0x45f   :  { %6840 = vpow2.f32 %v5593_v19  ;;  %v4555_v61 = vmul.f32 %v8394_v55, %v4532_v17  ;;  %v4556_v48 = vmul.f32 %v8394_v55, %v4533_v56 }
 0x460   :  { %6842 = vpow2.f32 %v5594_v47  ;;  %v8497_v3 = vadd.f32 %v8405_v23, %v4554_v36 }
 0x461   :  { %v6825_v52 = vpop.eup %6824  ;;  %6844 = vpow2.f32 %v5595_v20  ;;  %v8500_v39 = vadd.f32 %v8405_v23, %v4555_v61  ;;  %v8503_v55 = vadd.f32 %v8405_v23, %v4556_v48 }
 0x462   :  { %v6827_v62 = vpop.eup %6826  ;;  %v4628_v59 = vadd.f32 1.0, %v6825_v52  ;;  %6846 = vpow2.f32 %v5596_v9  ;;  %v5598_v14 = vmul.f32 -1.442695, %v8497_v3 }
 0x463   :  { %v6829_v24 = vpop.eup %6828  ;;  %v4629_v10 = vadd.f32 1.0, %v6827_v62  ;;  %6848 = vpow2.f32 %v5597_v30  ;;  %v5599_v37 = vmul.f32 -1.442695, %v8500_v39  ;;  %v5600_v4 = vmul.f32 -1.442695, %v8503_v55 }
 0x464   :  { %v6831_v6 = vpop.eup %6830  ;;  %6850 = vrcp.f32 %v4628_v59  ;;  %v4630_v12 = vadd.f32 1.0, %v6829_v24 }
 0x465   :  { %v6833_v1 = vpop.eup %6832  ;;  %6852 = vrcp.f32 %v4629_v10  ;;  %v4631_v34 = vadd.f32 1.0, %v6831_v6 }
 0x466   :  { %v6835_v44 = vpop.eup %6834  ;;  %6854 = vrcp.f32 %v4630_v12  ;;  %v4632_v43 = vadd.f32 1.0, %v6833_v1 }
 0x467   :  { %v6837_v60 = vpop.eup %6836  ;;  %6856 = vrcp.f32 %v4631_v34  ;;  %v4633_v31 = vadd.f32 1.0, %v6835_v44 }
 0x468   :  { %v6839_v63 = vpop.eup %6838  ;;  %6858 = vrcp.f32 %v4632_v43  ;;  %v4634_v50 = vadd.f32 1.0, %v6837_v60 }
 0x469   :  { %v6841_v41 = vpop.eup %6840  ;;  %6860 = vrcp.f32 %v4633_v31  ;;  %v4635_v54 = vadd.f32 1.0, %v6839_v63 }
 0x46a   :  { %v6843_v45 = vpop.eup %6842  ;;  %6862 = vrcp.f32 %v4634_v50  ;;  %v4636_v21 = vadd.f32 1.0, %v6841_v41  ;;  %v8527_v41 = vld [vmem:[%s8942_s10] ss:$0 sm:$0xff] }
 0x46b   :  { %v6845_v29 = vpop.eup %6844  ;;  %6864 = vrcp.f32 %v4635_v54  ;;  %v4637_v38 = vadd.f32 1.0, %v6843_v45 }
 0x46c   :  { %v6847_v27 = vpop.eup %6846  ;;  %6866 = vrcp.f32 %v4636_v21  ;;  %v4638_v15 = vadd.f32 1.0, %v6845_v29 }
 0x46d   :  { %v6849_v46 = vpop.eup %6848  ;;  %6868 = vrcp.f32 %v4637_v38  ;;  %v4639_v2 = vadd.f32 1.0, %v6847_v27 }
 0x46e   :  { %v6851_v35 = vpop.eup %6850  ;;  %6870 = vrcp.f32 %v4638_v15  ;;  %v4640_v30 = vadd.f32 1.0, %v6849_v46 }
 0x46f   :  { %v6853_v18 = vpop.eup %6852  ;;  %v4676_v13 = vmul.f32 %v6851_v35, %v8420_v58  ;;  %6872 = vrcp.f32 %v4639_v2 }
 0x470   :  { %v6855_v23 = vpop.eup %6854  ;;  %v4677_v16 = vmul.f32 %v6853_v18, %v8423_v26  ;;  %6874 = vpow2.f32 %v5598_v14 }
 0x471   :  { %v6857_v53 = vpop.eup %6856  ;;  %v4678_v33 = vmul.f32 %v6855_v23, %v8426_v57  ;;  %6876 = vpow2.f32 %v5599_v37 }
 0x472   :  { %v6859_v5 = vpop.eup %6858  ;;  %v4692_v49 = vpack.c.bf16 %v4677_v16, %v4676_v13  ;;  %v4679_v25 = vmul.f32 %v6857_v53, %v8430_v0  ;;  %6878 = vpow2.f32 %v5600_v4  ;;  %v5085_v53 = vld [vmem:[%s8945_s13] sm:$0xff] }
 0x473   :  { %v6861_v19 = vpop.eup %6860  ;;  %v4680_v47 = vmul.f32 %v6859_v5, %v8433_v42  ;;  %6880 = vrcp.f32 %v4640_v30  ;;  %v5087_v5 = vld [vmem:[%s8945_s13 + $0x10] sm:$0xff] }
 0x474   :  { %v6863_v58 = vpop.eup %6862  ;;  %6501 = vmatprep.mubr.bf16.mxu0 %v4692_v49  ;;  %v4693_v20 = vpack.c.bf16 %v4679_v25, %v4678_v33  ;;  %v4681_v9 = vmul.f32 %v6861_v19, %v8436_v28  ;;  %v5086_v33 = vld [vmem:[%s8945_s13 + $0x8] sm:$0xff]  ;;  %v6939_v19 = vmov 0.0|0.0  }
 0x475   :  { %v6865_v17 = vpop.eup %6864  ;;  %v4682_v26 = vmul.f32 %v6863_v58, %v8443_v8  ;;  %6533 = vmatprep.subr.bf16.mxu1 %v6939_v19  ;;  %v5088_v58 = vld [vmem:[%s8945_s13 + $0x18] sm:$0xff] }
 0x476   :  { %v6867_v56 = vpop.eup %6866  ;;  %6502 = vmatmul.mubr.bf16.vlgmr.msra.gmra.mrb[208].mxu0 %v4693_v20  ;;  %v4694_v57 = vpack.c.bf16 %v4681_v9, %v4680_v47  ;;  %v4683_v52 = vmul.f32 %v6865_v17, %v8448_v40  ;;  %v6534_v47 = vpack.c.bf16 %v5086_v33, %v5085_v53  ;;  %v8958_v9 = vmov 0.0  }
 0x477   :  { %v6869_v0 = vpop.eup %6868  ;;  %v4684_v62 = vmul.f32 %v6867_v56, %v8468_v32  ;;  %6525 = vmatprep.mubr.msk.f32.mxu1 %vm6940_vm1, %v8958_v9  ;;  %v6537_v30 = vpack.c.bf16 %v5088_v58, %v5087_v5 }
 0x478   :  { %v6871_v59 = vpop.eup %6870  ;;  %6505 = vmatprep.mubr.bf16.mxu0 %v4694_v57  ;;  %v4695_v42 = vpack.c.bf16 %v4683_v52, %v4682_v26  ;;  %v4685_v24 = vmul.f32 %v6869_v0, %v8471_v7  ;;  %6535 = vmatpush3.bf16.msra.mxu1 %v6534_v47 }
 0x479   :  { %v6873_v10 = vpop.eup %6872  ;;  %v4686_v28 = vmul.f32 %v6871_v59, %v8475_v51  ;;  %6536 = vmatprep.subr.bf16.mxu1 %v6939_v19 }
 0x47a   :  { %v6875_v6 = vpop.eup %6874  ;;  %v4696_v8 = vpack.c.bf16 %v4685_v24, %v4684_v62  ;;  %v4687_v36 = vmul.f32 %v6873_v10, %v8478_v22 }
 0x47b   :  { %v4641_v12 = vadd.f32 1.0, %v6875_v6  ;;  %v6877_v1 = vpop.eup %6876 }
 0x47c   :  { %v4697_v34 = vpack.c.bf16 %v4687_v36, %v4686_v28  ;;  %v6879_v40 = vpop.eup %6878  ;;  %v4642_v44 = vadd.f32 1.0, %v6877_v1  ;;  %6538 = vmatpush3.bf16.msra.mxu1 %v6537_v30 }
 0x47d   :  { %6882 = vrcp.f32 %v4641_v12  ;;  %v4643_v32 = vadd.f32 1.0, %v6879_v40  ;;  %v6881_v7 = vpop.eup %6880  ;;  %6528 = vmatprep.subr.mxu1 %v8958_v9 }
 0x47e   :  { %6506 = vmatmul.mubr.bf16.gmra.mrb[212].mxu0 %v4695_v42  ;;  %6884 = vrcp.f32 %v4642_v44  ;;  %v4688_v51 = vmul.f32 %v6881_v7, %v8483_v11 }
 0x47f   :  { %6509 = vmatprep.mubr.bf16.mxu0 %v4696_v8  ;;  %6886 = vrcp.f32 %v4643_v32 }
 0x486   :  { %6510 = vmatmul.mubr.bf16.gmra.mrb[216].mxu0 %v4697_v34 }
 0x487   :  { %v6883_v43 = vpop.eup %6882 }
 0x488   :  { %v4689_v61 = vmul.f32 %v6883_v43, %v8497_v3  ;;  %v6885_v60 = vpop.eup %6884 }
 0x489   :  { %v6887_v22 = vpop.eup %6886  ;;  %v4690_v48 = vmul.f32 %v6885_v60, %v8500_v39 }
 0x48a   :  { %v4698_v31 = vpack.c.bf16 %v4689_v61, %v4688_v51  ;;  %v4691_v63 = vmul.f32 %v6887_v22, %v8503_v55 }
 0x48c   :  { %6513 = vmatprep.mubr.bf16.mxu0 %v4698_v31  ;;  %v4699_v50 = vpack.c.bf16 %v4691_v63, %v4690_v48 }
 0x48e   :  { %6514 = vmatmul.mubr.bf16.gmra.mrb[220].mxu0 %v4699_v50 }
 0x549   :  { %v6503_v54 = vpop.f32.mrb[208].mxu0 }
 0x54a   :  { %v4805_v11 = vpop.f32.mrb[209].mxu0  ;;  %v8533_v29 = vadd.f32 %v6503_v54, %v8527_v41 }
 0x54b   :  { %v8530_v45 = vadd.f32 %v8527_v41, %v4805_v11  ;;  %v6504_v3 = vpop.f32.mrb[210].mxu0 }
 0x54c   :  { %v4808_v21 = vpop.f32.mrb[211].mxu0  ;;  %v8541_v55 = vadd.f32 %v6504_v3, %v8527_v41  ;;  %v4871_v14 = vsel %vm112_vm0, %v8533_v29, 0.0 }
 0x54d   :  { %v8536_v39 = vadd.f32 %v8527_v41, %v4808_v21  ;;  %v4868_v38 = vsel %vm112_vm0, %v8530_v45, 0.0 }
 0x54e   :  { %v4873_v37 = vsel %vm112_vm0, %v8541_v55, 0.0 }
 0x54f   :  { %v4869_v27 = vsel %vm112_vm0, %v8536_v39, 0.0 }
 0x550   :  { %v4870_v15 = vadd.f32 %v4869_v27, %v4868_v38 }
 0x551   :  { %v6507_v46 = vpop.f32.mrb[212].mxu0 }
 0x552   :  { %v4872_v2 = vadd.f32 %v4871_v14, %v4870_v15  ;;  %v4821_v35 = vpop.f32.mrb[213].mxu0  ;;  %v8553_v4 = vadd.f32 %v6507_v46, %v8527_v41 }
 0x553   :  { %v8550_v18 = vadd.f32 %v8527_v41, %v4821_v35  ;;  %v6508_v13 = vpop.f32.mrb[214].mxu0 }
 0x554   :  { %v4874_v23 = vadd.f32 %v4873_v37, %v4872_v2  ;;  %v4824_v16 = vpop.f32.mrb[215].mxu0  ;;  %v4833_v17 = vadd.f32 %v6508_v13, %v8527_v41  ;;  %v4879_v57 = vsel %vm112_vm0, %v8553_v4, 0.0 }
 0x555   :  { %v4875_v49 = vsel %vm112_vm0, %v8550_v18, 0.0  ;;  %v8567_v25 = vadd.f32 %v8527_v41, %v4824_v16 }
 0x556   :  { %v4876_v20 = vadd.f32 %v4875_v49, %v4874_v23  ;;  %v4881_v59 = vsel %vm112_vm0, %v4833_v17, 0.0 }
 0x557   :  { %v4877_v26 = vsel %vm112_vm0, %v8567_v25, 0.0 }
 0x558   :  { %v4878_v56 = vadd.f32 %v4877_v26, %v4876_v20 }
 0x559   :  { %v6511_v52 = vpop.f32.mrb[216].mxu0 }
 0x55a   :  { %v4880_v0 = vadd.f32 %v4879_v57, %v4878_v56  ;;  %v4837_v62 = vpop.f32.mrb[217].mxu0  ;;  %v4846_v6 = vadd.f32 %v6511_v52, %v8527_v41 }
 0x55b   :  { %v4838_v42 = vadd.f32 %v8527_v41, %v4837_v62  ;;  %v6512_v24 = vpop.f32.mrb[218].mxu0 }
 0x55c   :  { %v4882_v10 = vadd.f32 %v4881_v59, %v4880_v0  ;;  %v4840_v28 = vpop.f32.mrb[219].mxu0  ;;  %v4849_v1 = vadd.f32 %v6512_v24, %v8527_v41  ;;  %v4887_v44 = vsel %vm112_vm0, %v4846_v6, 0.0 }
 0x55d   :  { %v4883_v8 = vsel %vm112_vm0, %v4838_v42, 0.0  ;;  %v4841_v36 = vadd.f32 %v8527_v41, %v4840_v28 }
 0x55e   :  { %v4884_v12 = vadd.f32 %v4883_v8, %v4882_v10  ;;  %v4889_v51 = vsel %vm112_vm0, %v4849_v1, 0.0 }
 0x55f   :  { %v4885_v34 = vsel %vm112_vm0, %v4841_v36, 0.0 }
 0x560   :  { %v4886_v40 = vadd.f32 %v4885_v34, %v4884_v12 }
 0x561   :  { %v6515_v7 = vpop.f32.mrb[220].mxu0 }
 0x562   :  { %v4888_v32 = vadd.f32 %v4887_v44, %v4886_v40  ;;  %v4853_v43 = vpop.f32.mrb[221].mxu0  ;;  %v4862_v48 = vadd.f32 %v6515_v7, %v8527_v41 }
 0x563   :  { %v4854_v61 = vadd.f32 %v8527_v41, %v4853_v43  ;;  %v6516_v22 = vpop.f32.mrb[222].mxu0 }
 0x564   :  { %v4890_v60 = vadd.f32 %v4889_v51, %v4888_v32  ;;  %v4856_v31 = vpop.f32.mrb[223].mxu0  ;;  %v4865_v11 = vadd.f32 %v6516_v22, %v8527_v41  ;;  %v4895_v38 = vsel %vm112_vm0, %v4862_v48, 0.0 }
 0x565   :  { %v4891_v63 = vsel %vm112_vm0, %v4854_v61, 0.0  ;;  %v4857_v50 = vadd.f32 %v8527_v41, %v4856_v31 }
 0x566   :  { %v4892_v54 = vadd.f32 %v4891_v63, %v4890_v60  ;;  %v4897_v15 = vsel %vm112_vm0, %v4865_v11, 0.0 }
 0x567   :  { %v4893_v3 = vsel %vm112_vm0, %v4857_v50, 0.0 }
 0x568   :  { %v4894_v21 = vadd.f32 %v4893_v3, %v4892_v54 }
 0x56a   :  { %v4896_v27 = vadd.f32 %v4895_v38, %v4894_v21 }
 0x56c   :  { %v4898_v14 = vadd.f32 %v4897_v15, %v4896_v27 }
 0x56e   :  { %v4899_v46 = vrot.slane %v4898_v14, 4 }
 0x570   :  { %v4900_v2 = vadd.f32 %v4899_v46, %v4898_v14 }
 0x572   :  { %v4901_v35 = vrot.slane %v4900_v2, 2 }
 0x574   :  { %v4902_v37 = vadd.f32 %v4901_v35, %v4900_v2 }
 0x576   :  { %v4903_v13 = vrot.slane %v4902_v37, 1 }
 0x578   :  { %v4904_v23 = vadd.f32 %v4903_v13, %v4902_v37 }
 0x57a   :  { %v4905_v16 = vmul.f32 0.0078125, %v4904_v23 }
 0x57c   :  { %v8598_v53 = vsub.f32 %v8530_v45, %v4905_v16  ;;  %v8601_v41 = vsub.f32 %v8536_v39, %v4905_v16  ;;  %v8604_v33 = vsub.f32 %v8533_v29, %v4905_v16  ;;  %v8607_v5 = vsub.f32 %v8541_v55, %v4905_v16 }
 0x57d   :  { %v8610_v49 = vsub.f32 %v8550_v18, %v4905_v16  ;;  %v8613_v19 = vsub.f32 %v8567_v25, %v4905_v16  ;;  %v8616_v47 = vsub.f32 %v8553_v4, %v4905_v16  ;;  %v8618_v45 = vsub.f32 %v4833_v17, %v4905_v16 }
 0x57e   :  { %v8620_v58 = vsub.f32 %v4838_v42, %v4905_v16  ;;  %v8622_v39 = vsub.f32 %v4841_v36, %v4905_v16  ;;  %v8624_v29 = vsub.f32 %v4846_v6, %v4905_v16  ;;  %v8626_v20 = vsub.f32 %v4849_v1, %v4905_v16 }
 0x57f   :  { %v8628_v55 = vsub.f32 %v4854_v61, %v4905_v16  ;;  %v8630_v18 = vsub.f32 %v4857_v50, %v4905_v16  ;;  %v8632_v26 = vsub.f32 %v4862_v48, %v4905_v16  ;;  %v8634_v25 = vsub.f32 %v4865_v11, %v4905_v16 }
 0x580   :  { %v4922_v4 = vmul.f32 %v8598_v53, %v8598_v53  ;;  %v4923_v17 = vmul.f32 %v8601_v41, %v8601_v41  ;;  %v4924_v30 = vmul.f32 %v8604_v33, %v8604_v33  ;;  %v4925_v56 = vmul.f32 %v8607_v5, %v8607_v5 }
 0x581   :  { %v4926_v62 = vmul.f32 %v8610_v49, %v8610_v49  ;;  %v4927_v24 = vmul.f32 %v8613_v19, %v8613_v19  ;;  %v4928_v6 = vmul.f32 %v8616_v47, %v8616_v47  ;;  %v4929_v12 = vmul.f32 %v8618_v45, %v8618_v45 }
 0x582   :  { %v4938_v57 = vsel %vm112_vm0, %v4922_v4, 0.0  ;;  %v4939_v52 = vsel %vm112_vm0, %v4923_v17, 0.0  ;;  %v4941_v59 = vsel %vm112_vm0, %v4924_v30, 0.0  ;;  %v4943_v10 = vsel %vm112_vm0, %v4925_v56, 0.0 }
 0x583   :  { %v4940_v0 = vadd.f32 %v4939_v52, %v4938_v57  ;;  %v4945_v8 = vsel %vm112_vm0, %v4926_v62, 0.0  ;;  %v4947_v1 = vsel %vm112_vm0, %v4927_v24, 0.0  ;;  %v4930_v40 = vmul.f32 %v8620_v58, %v8620_v58 }
 0x584   :  { %v4949_v44 = vsel %vm112_vm0, %v4928_v6, 0.0  ;;  %v4931_v7 = vmul.f32 %v8622_v39, %v8622_v39  ;;  %v4951_v51 = vsel %vm112_vm0, %v4929_v12, 0.0  ;;  %v4932_v61 = vmul.f32 %v8624_v29, %v8624_v29 }
 0x585   :  { %v4942_v42 = vadd.f32 %v4941_v59, %v4940_v0  ;;  %v4953_v60 = vsel %vm112_vm0, %v4930_v40, 0.0  ;;  %v4933_v31 = vmul.f32 %v8626_v20, %v8626_v20  ;;  %v4934_v50 = vmul.f32 %v8628_v55, %v8628_v55 }
 0x586   :  { %v4955_v48 = vsel %vm112_vm0, %v4931_v7, 0.0  ;;  %v4957_v54 = vsel %vm112_vm0, %v4932_v61, 0.0  ;;  %v4935_v3 = vmul.f32 %v8630_v18, %v8630_v18  ;;  %v4936_v27 = vmul.f32 %v8632_v26, %v8632_v26 }
 0x587   :  { %v4944_v28 = vadd.f32 %v4943_v10, %v4942_v42  ;;  %v4959_v21 = vsel %vm112_vm0, %v4933_v31, 0.0  ;;  %v4961_v15 = vsel %vm112_vm0, %v4934_v50, 0.0  ;;  %v4937_v46 = vmul.f32 %v8634_v25, %v8634_v25  ;;  %v8687_v42 = vld [vmem:[%s8943_s11] ss:$0 sm:$0xff] }
 0x588   :  { %v4963_v2 = vsel %vm112_vm0, %v4935_v3, 0.0  ;;  %v4965_v37 = vsel %vm112_vm0, %v4936_v27, 0.0 }
 0x589   :  { %v4946_v36 = vadd.f32 %v4945_v8, %v4944_v28  ;;  %v4967_v23 = vsel %vm112_vm0, %v4937_v46, 0.0 }
 0x58b   :  { %v4948_v34 = vadd.f32 %v4947_v1, %v4946_v36 }
 0x58d   :  { %v4950_v32 = vadd.f32 %v4949_v44, %v4948_v34  ;;  %v8700_v34 = vld [vmem:[%s8944_s12] ss:$0 sm:$0xff] }
 0x58f   :  { %v4952_v43 = vadd.f32 %v4951_v51, %v4950_v32 }
 0x591   :  { %v4954_v22 = vadd.f32 %v4953_v60, %v4952_v43 }
 0x593   :  { %v4956_v63 = vadd.f32 %v4955_v48, %v4954_v22 }
 0x595   :  { %v4958_v11 = vadd.f32 %v4957_v54, %v4956_v63 }
 0x597   :  { %v4960_v38 = vadd.f32 %v4959_v21, %v4958_v11 }
 0x599   :  { %v4962_v14 = vadd.f32 %v4961_v15, %v4960_v38 }
 0x59b   :  { %v4964_v35 = vadd.f32 %v4963_v2, %v4962_v14 }
 0x59d   :  { %v4966_v13 = vadd.f32 %v4965_v37, %v4964_v35 }
 0x59f   :  { %v4968_v16 = vadd.f32 %v4967_v23, %v4966_v13 }
 0x5a1   :  { %v4969_v4 = vrot.slane %v4968_v16, 4 }
 0x5a3   :  { %v4970_v17 = vadd.f32 %v4969_v4, %v4968_v16 }
 0x5a5   :  { %v4971_v30 = vrot.slane %v4970_v17, 2 }
 0x5a7   :  { %v4972_v56 = vadd.f32 %v4971_v30, %v4970_v17 }
 0x5a9   :  { %v4973_v57 = vrot.slane %v4972_v56, 1 }
 0x5ab   :  { %v4974_v52 = vadd.f32 %v4973_v57, %v4972_v56 }
 0x5ad   :  { %v4975_v0 = vmul.f32 0.0078125, %v4974_v52 }
 0x5af   :  { %v4976_v62 = vadd.f32 1e-05, %v4975_v0 }
 0x5b1   :  { %6888 = vrsqrt.f32 %v4976_v62 }
 0x5bb   :  { %v6889_v59 = vpop.eup %6888 }
 0x5bc   :  { %v4986_v24 = vmul.f32 %v6889_v59, %v8620_v58  ;;  %v4987_v10 = vmul.f32 %v6889_v59, %v8622_v39  ;;  %v4988_v28 = vmul.f32 %v6889_v59, %v8624_v29  ;;  %v4989_v6 = vmul.f32 %v6889_v59, %v8626_v20 }
 0x5bd   :  { %v4990_v8 = vmul.f32 %v6889_v59, %v8628_v55  ;;  %v4991_v36 = vmul.f32 %v6889_v59, %v8630_v18  ;;  %v4992_v12 = vmul.f32 %v6889_v59, %v8632_v26  ;;  %v4993_v1 = vmul.f32 %v6889_v59, %v8634_v25 }
 0x5be   :  { %v5009_v58 = vmul.f32 %v8687_v42, %v4986_v24  ;;  %v5010_v39 = vmul.f32 %v8687_v42, %v4987_v10  ;;  %v5011_v29 = vmul.f32 %v8687_v42, %v4988_v28  ;;  %v5012_v20 = vmul.f32 %v8687_v42, %v4989_v6 }
 0x5bf   :  { %v5013_v55 = vmul.f32 %v8687_v42, %v4990_v8  ;;  %v5014_v18 = vmul.f32 %v8687_v42, %v4991_v36  ;;  %v5015_v32 = vmul.f32 %v8687_v42, %v4992_v12  ;;  %v5016_v7 = vmul.f32 %v8687_v42, %v4993_v1 }
 0x5c0   :  { %v8709_v26 = vadd.f32 %v8700_v34, %v5009_v58  ;;  %v8712_v25 = vadd.f32 %v8700_v34, %v5010_v39  ;;  %v8715_v40 = vadd.f32 %v8700_v34, %v5011_v29  ;;  %v8718_v44 = vadd.f32 %v8700_v34, %v5012_v20 }
 0x5c1   :  { %v8727_v61 = vadd.f32 %v8700_v34, %v5013_v55  ;;  %v8730_v60 = vadd.f32 %v8700_v34, %v5014_v18  ;;  %v4978_v63 = vmul.f32 %v6889_v59, %v8598_v53  ;;  %v4979_v50 = vmul.f32 %v6889_v59, %v8601_v41 }
 0x5c2   :  { %v5061_v51 = vsel %vm112_vm0, %v8709_v26, 0.0  ;;  %v5062_v43 = vsel %vm112_vm0, %v8712_v25, 0.0  ;;  %v5064_v31 = vsel %vm112_vm0, %v8715_v40, 0.0  ;;  %v5066_v48 = vsel %vm112_vm0, %v8718_v44, 0.0 }
 0x5c3   :  { %v5063_v22 = vadd.f32 %v5062_v43, %v5061_v51  ;;  %v4980_v54 = vmul.f32 %v6889_v59, %v8604_v33  ;;  %v4981_v3 = vmul.f32 %v6889_v59, %v8607_v5  ;;  %v4982_v21 = vmul.f32 %v6889_v59, %v8610_v49 }
 0x5c4   :  { %v4983_v38 = vmul.f32 %v6889_v59, %v8613_v19  ;;  %v4984_v27 = vmul.f32 %v6889_v59, %v8616_v47  ;;  %v4985_v15 = vmul.f32 %v6889_v59, %v8618_v45  ;;  %v5001_v14 = vmul.f32 %v8687_v42, %v4978_v63 }
 0x5c5   :  { %v5065_v11 = vadd.f32 %v5064_v31, %v5063_v22  ;;  %v5002_v46 = vmul.f32 %v8687_v42, %v4979_v50  ;;  %v5003_v41 = vmul.f32 %v8687_v42, %v4980_v54  ;;  %v5004_v33 = vmul.f32 %v8687_v42, %v4981_v3 }
 0x5c6   :  { %v8749_v2 = vadd.f32 %v8700_v34, %v5015_v32  ;;  %v5068_v5 = vsel %vm112_vm0, %v8727_v61, 0.0  ;;  %v8754_v49 = vadd.f32 %v8700_v34, %v5001_v14  ;;  %v5005_v47 = vmul.f32 %v8687_v42, %v4982_v21 }
 0x5c7   :  { %v5067_v53 = vadd.f32 %v5066_v48, %v5065_v11  ;;  %v8758_v45 = vadd.f32 %v8700_v34, %v5002_v46  ;;  %v8761_v35 = vadd.f32 %v8700_v34, %v5003_v41  ;;  %v8764_v37 = vadd.f32 %v8700_v34, %v5016_v7 }
 0x5c8   :  { %v5070_v13 = vsel %vm112_vm0, %v8730_v60, 0.0  ;;  %v5006_v23 = vmul.f32 %v8687_v42, %v4983_v38  ;;  %v8770_v4 = vadd.f32 %v8700_v34, %v5004_v33  ;;  %v5040_v17 = vsel %vm112_vm0, %v8754_v49, 0.0 }
 0x5c9   :  { %v5069_v19 = vadd.f32 %v5068_v5, %v5067_v53  ;;  %v5041_v30 = vsel %vm112_vm0, %v8758_v45, 0.0  ;;  %v5072_v56 = vsel %vm112_vm0, %v8749_v2, 0.0  ;;  %v5007_v0 = vmul.f32 %v8687_v42, %v4984_v27 }
 0x5ca   :  { %v5042_v57 = vadd.f32 %v5041_v30, %v5040_v17  ;;  %v8780_v62 = vadd.f32 %v8700_v34, %v5005_v47  ;;  %v5043_v59 = vsel %vm112_vm0, %v8761_v35, 0.0  ;;  %v5074_v24 = vsel %vm112_vm0, %v8764_v37, 0.0 }
 0x5cb   :  { %v5071_v16 = vadd.f32 %v5070_v13, %v5069_v19  ;;  %v5008_v6 = vmul.f32 %v8687_v42, %v4985_v15  ;;  %v8788_v8 = vadd.f32 %v8700_v34, %v5006_v23  ;;  %v5045_v36 = vsel %vm112_vm0, %v8770_v4, 0.0  ;;  %v5166_v15 = vld [vmem:[%s8946_s14] sm:$0x3] }
 0x5cc   :  { %v5044_v10 = vadd.f32 %v5043_v59, %v5042_v57  ;;  %v5030_v58 = vadd.f32 %v8700_v34, %v5007_v0  ;;  %v5047_v39 = vsel %vm112_vm0, %v8780_v62, 0.0  ;;  %v6941_v23 = vmov 1966171168  }
 0x5cd   :  { %v5073_v52 = vadd.f32 %v5072_v56, %v5071_v16  ;;  %v5031_v20 = vadd.f32 %v8700_v34, %v5008_v6  ;;  %v5049_v55 = vsel %vm112_vm0, %v8788_v8, 0.0  ;;  %v5253_v16 = vunpack.c.l.s4 %v6941_v23  ;;  %v6904_v23 = vld [vmem:[%s8932_s0 + $0x48] sm:$0xff] }
 0x5ce   :  { %v5046_v12 = vadd.f32 %v5045_v36, %v5044_v10  ;;  %v5051_v32 = vsel %vm112_vm0, %v5030_v58, 0.0  ;;  %v5255_v17 = vlaneseq }
 0x5cf   :  { %v5075_v28 = vadd.f32 %v5074_v24, %v5073_v52  ;;  %v5053_v43 = vsel %vm112_vm0, %v5031_v20, 0.0  ;;  %v5254_v30 = vunpack.c.0.s8 %v5253_v16 }
 0x5d0   :  { %v5048_v29 = vadd.f32 %v5047_v39, %v5046_v12  ;;  %v5256_v56 = vshrl.u32 %v5255_v17, 7  ;;  %v6905_v17 = vld [vmem:[%s8932_s0 + $0x50] sm:$0xff] }
 0x5d1   :  { %v5076_v1 = vrot.slane %v5075_v28, 4 }
 0x5d2   :  { %v5050_v18 = vadd.f32 %v5049_v55, %v5048_v29  ;;  %v5257_v57 = vsub.s32 %v5254_v30, %v5256_v56  ;;  %v5276_v0 = vsub.s32 0, %v5256_v56  ;;  %v6906_v56 = vld [vmem:[%s8932_s0 + $0x58] sm:$0xff] }
 0x5d3   :  { %v5077_v42 = vadd.f32 %v5076_v1, %v5075_v28 }
 0x5d4   :  { %v5052_v51 = vadd.f32 %v5051_v32, %v5050_v18 }
 0x5d5   :  { %v5078_v7 = vrot.slane %v5077_v42, 2 }
 0x5d6   :  { %v5054_v22 = vadd.f32 %v5053_v43, %v5052_v51 }
 0x5d7   :  { %v5079_v31 = vadd.f32 %v5078_v7, %v5077_v42 }
 0x5d8   :  { %v5055_v48 = vrot.slane %v5054_v22, 4 }
 0x5d9   :  { %v5080_v50 = vrot.slane %v5079_v31, 1 }
 0x5da   :  { %v5056_v63 = vadd.f32 %v5055_v48, %v5054_v22 }
 0x5db   :  { %v5081_v3 = vadd.f32 %v5080_v50, %v5079_v31 }
 0x5dc   :  { %v5057_v54 = vrot.slane %v5056_v63, 2 }
 0x5dd   :  { %v5084_v38 = vmul.f32 0.015625, %v5081_v3  ;;  %v6897_v3 = vld [vmem:[%s8932_s0 + $0x10] sm:$0xff] }
 0x5de   :  { %v5058_v11 = vadd.f32 %v5057_v54, %v5056_v63 }
 0x5e0   :  { %v5059_v34 = vrot.slane %v5058_v11, 1 }
 0x5e2   :  { %v5060_v21 = vadd.f32 %v5059_v34, %v5058_v11 }
 0x5e4   :  { %v5083_v27 = vmul.f32 0.015625, %v5060_v21 }
 0x5e6   :  { %v5092_v14 = vsel %vm5091_vm2, %v5084_v38, %v5083_v27  ;;  %v6898_v38 = vld [vmem:[%s8932_s0 + $0x18] sm:$0xff] }
 0x5e7   :  { %6526 = vmatmul.mubr.msk.f32.vlgmr.msra.gmra.mrb[208].mxu1 %vm112_vm0, %v5092_v14 }
 0x5e8   :  { %6529 = vmatpush3.msk.msra.mxu1 %vm5171_vm3, %v5166_v15  ;;  %6530 = vmatprep.mubr.msk.f32.mxu1 %vm6940_vm1, %v8958_v9  ;;  %v6899_v15 = vld [vmem:[%s8932_s0 + $0x20] sm:$0xff] }
 0x6ba   :  { %v5161_v46 = vpop.f32.mrb[208].mxu1 }
 0x6bb   :  { %v5165_v53 = vmax.f32 %v5161_v46, 0.0  ;;  %v6527_v41 = vpop.f32.mrb[209].mxu1  ;;  %v6900_v46 = vld [vmem:[%s8932_s0 + $0x28] sm:$0xff] }
 0x6bc   :  { %v6901_v41 = vld [vmem:[%s8932_s0 + $0x30] sm:$0xff] }
 0x6bd   :  { %6531 = vmatmul.mubr.msk.f32.vlgmr.msra.gmra.mrb[210].mxu1 %vm5167_vm4, %v5165_v53 }
 0x790   :  { %v5241_v33 = vpop.f32.mrb[210].mxu1 }
 0x791   :  { %v5615_v5 = vmul.f32 -1.442695, %v5241_v33  ;;  %v6532_v19 = vpop.f32.mrb[211].mxu1 }
 0x793   :  { %6890 = vpow2.f32 %v5615_v5  ;;  %v6902_v5 = vld [vmem:[%s8932_s0 + $0x38] sm:$0xff] }
 0x79d   :  { %v6891_v47 = vpop.eup %6890 }
 0x79e   :  { %v5248_v13 = vadd.f32 1.0, %v6891_v47  ;;  %v6903_v47 = vld [vmem:[%s8932_s0 + $0x40] sm:$0xff] }
 0x7a0   :  { %6892 = vrcp.f32 %v5248_v13 }
 0x7aa   :  { %v6893_v52 = vpop.eup %6892 }
 0x7ab   :  { %v5258_v9 = vrot.slane %v6893_v52, %v5257_v57  ;;  %v6907_v52 = vld [vmem:[%s8932_s0 + $0x60] sm:$0xff] }
 0x7ad   :  { %v5259_v59 = vcombine.high %v5258_v9, %v5258_v9  ;;  %v5266_v24 = vrot.slane %v5258_v9, %v5257_v57 }
 0x7af   :  { %v5273_v10 = vrot.slane %v5259_v59, %v5257_v57  ;;  %v5277_v28 = vrot.slane %v5266_v24, %v5276_v0  ;;  %v6909_v24 = vld [vmem:[%s8932_s0 + $0x70] sm:$0xff] }
 0x7b1   :  { %v5281_v6 = vrot.slane %v5273_v10, %v5276_v0  ;;  %v5284_v36 = vmul.f32 %v5277_v28, %v8754_v49  ;;  %v5285_v12 = vmul.f32 %v5277_v28, %v8758_v45  ;;  %v5286_v1 = vmul.f32 %v5277_v28, %v8761_v35  ;;  %v6908_v0 = vld [vmem:[%s8932_s0 + $0x68] sm:$0xff] }
 0x7b2   :  { %v5287_v39 = vmul.f32 %v5277_v28, %v8770_v4  ;;  %v5288_v29 = vmul.f32 %v5277_v28, %v8780_v62  ;;  %v5289_v55 = vmul.f32 %v5277_v28, %v8788_v8  ;;  %v5290_v42 = vmul.f32 %v5277_v28, %v5030_v58 }
 0x7b3   :  { %v5291_v18 = vmul.f32 %v5277_v28, %v5031_v20  ;;  %v5292_v32 = vmul.f32 %v5281_v6, %v8709_v26  ;;  %v5293_v7 = vmul.f32 %v5281_v6, %v8712_v25  ;;  %v5294_v51 = vmul.f32 %v5281_v6, %v8715_v40  ;;  %v6895_v40 = vld [vmem:[%s8932_s0] sm:$0xff]  ;;  %v6910_v28 = vld [vmem:[%s8932_s0 + $0x78] sm:$0xff] }
 0x7b4   :  { %v5295_v49 = vmul.f32 %v5281_v6, %v8718_v44  ;;  %v5296_v45 = vmul.f32 %v5281_v6, %v8727_v61  ;;  %v5297_v35 = vmul.f32 %v5281_v6, %v8730_v60  ;;  %v5298_v4 = vmul.f32 %v5281_v6, %v8749_v2  ;;  %v6896_v2 = vld [vmem:[%s8932_s0 + $0x8] sm:$0xff] }
 0x7b5   :  { %v5300_v43 = vmul.f32 0.1, %v5284_v36  ;;  %v5301_v62 = vmul.f32 0.1, %v5285_v12  ;;  %v5302_v22 = vmul.f32 0.1, %v5286_v1  ;;  %v5299_v8 = vmul.f32 %v5281_v6, %v8764_v37 }
 0x7b6   :  { %v5303_v58 = vmul.f32 0.1, %v5287_v39  ;;  %v5304_v20 = vmul.f32 0.1, %v5288_v29  ;;  %v5305_v26 = vmul.f32 0.1, %v5289_v55 }
 0x7b7   :  { %v5306_v31 = vmul.f32 0.1, %v5290_v42  ;;  %v5307_v25 = vmul.f32 0.1, %v5291_v18  ;;  %v5308_v48 = vmul.f32 0.1, %v5292_v32  ;;  %v5316_v44 = vadd.f32 %v6895_v40, %v5300_v43 }
 0x7b8   :  { %v5309_v61 = vmul.f32 0.1, %v5293_v7  ;;  %v5310_v60 = vmul.f32 0.1, %v5294_v51  ;;  %v5311_v63 = vmul.f32 0.1, %v5295_v49  ;;  %v5317_v50 = vadd.f32 %v6896_v2, %v5301_v62 }
 0x7b9   :  { %v5312_v37 = vmul.f32 0.1, %v5296_v45  ;;  %v5313_v54 = vmul.f32 0.1, %v5297_v35  ;;  %v5314_v11 = vmul.f32 0.1, %v5298_v4  ;;  %v5318_v34 = vadd.f32 %v6897_v3, %v5302_v22 }
 0x7ba   :  { %5332 = vst.msk [vmem:[%s8947_s15] sm:$0xff] %vm112_vm0, %v5316_v44  ;;  %v5315_v21 = vmul.f32 0.1, %v5299_v8  ;;  %v5319_v27 = vadd.f32 %v6898_v38, %v5303_v58  ;;  %v5320_v14 = vadd.f32 %v6899_v15, %v5304_v20  ;;  %v5321_v53 = vadd.f32 %v6900_v46, %v5305_v26  ;;  %5333 = vst.msk [vmem:[%s8947_s15 + $0x8] sm:$0xff] %vm112_vm0, %v5317_v50 }
 0x7bb   :  { %v5322_v33 = vadd.f32 %v6901_v41, %v5306_v31  ;;  %v5323_v19 = vadd.f32 %v6902_v5, %v5307_v25  ;;  %v5324_v13 = vadd.f32 %v6903_v47, %v5308_v48  ;;  %v5325_v16 = vadd.f32 %v6904_v23, %v5309_v61  ;;  %5334 = vst.msk [vmem:[%s8947_s15 + $0x10] sm:$0xff] %vm112_vm0, %v5318_v34 }
 0x7bc   :  { %v5326_v30 = vadd.f32 %v6905_v17, %v5310_v60  ;;  %v5327_v57 = vadd.f32 %v6906_v56, %v5311_v63  ;;  %v5328_v9 = vadd.f32 %v6907_v52, %v5312_v37  ;;  %v5329_v59 = vadd.f32 %v6908_v0, %v5313_v54  ;;  %5335 = vst.msk [vmem:[%s8947_s15 + $0x18] sm:$0xff] %vm112_vm0, %v5319_v27 }
 0x7bd   :  { %5336 = vst.msk [vmem:[%s8947_s15 + $0x20] sm:$0xff] %vm112_vm0, %v5320_v14  ;;  %5337 = vst.msk [vmem:[%s8947_s15 + $0x28] sm:$0xff] %vm112_vm0, %v5321_v53  ;;  %v5330_v10 = vadd.f32 %v6909_v24, %v5314_v11  ;;  %v5331_v6 = vadd.f32 %v6910_v28, %v5315_v21 }
 0x7be   :  { %5338 = vst.msk [vmem:[%s8947_s15 + $0x30] sm:$0xff] %vm112_vm0, %v5322_v33  ;;  %5339 = vst.msk [vmem:[%s8947_s15 + $0x38] sm:$0xff] %vm112_vm0, %v5323_v19 }
 0x7bf   :  { %5340 = vst.msk [vmem:[%s8947_s15 + $0x40] sm:$0xff] %vm112_vm0, %v5324_v13  ;;  %5341 = vst.msk [vmem:[%s8947_s15 + $0x48] sm:$0xff] %vm112_vm0, %v5325_v16 }
 0x7c0   :  { %5342 = vst.msk [vmem:[%s8947_s15 + $0x50] sm:$0xff] %vm112_vm0, %v5326_v30  ;;  %5343 = vst.msk [vmem:[%s8947_s15 + $0x58] sm:$0xff] %vm112_vm0, %v5327_v57 }
 0x7c1   :  { %5344 = vst.msk [vmem:[%s8947_s15 + $0x60] sm:$0xff] %vm112_vm0, %v5328_v9  ;;  %5345 = vst.msk [vmem:[%s8947_s15 + $0x68] sm:$0xff] %vm112_vm0, %v5329_v59 }
 0x7c2   :  { %5346 = vst.msk [vmem:[%s8947_s15 + $0x70] sm:$0xff] %vm112_vm0, %v5330_v10  ;;  %5347 = vst.msk [vmem:[%s8947_s15 + $0x78] sm:$0xff] %vm112_vm0, %v5331_v6 }
 0x7c3   :  { %5352 = vsyncpa [#allocation5], 1 }

</bundles_post_ra>
